<compile_context>
chip_gen: v7x
topology: tpu7x:2x2x1
jax: 0.10.0
libtpu: 0.0.40
codegen_flags: <defaults>
</compile_context>

<pallas_src>
from functools import partial

import numpy as np
import jax
import jax.numpy as jnp
from jax.experimental import pallas as pl
from jax.experimental.pallas import tpu as pltpu

VIEWS = ("front", "rear", "left", "right")

# Small demo configuration.  The real MVA_Net uses 224x224 images, ResNet base
# width 64 and torchvision AlexNet widths; only widths / image sizes are
# scaled down -- the op structure (resnet34_mva [3,4,6,3] trunk, SVA
# attention, AlexNet map branch, 4-layer LSTMs, 1473-d fusion head) is intact.
CFG = {
    "image_size": 32,                    # 224 in the original
    "map_size": 64,                      # 224 in the original
    "resnet_width": 8,                   # 64 in the original
    "resnet_blocks": (3, 4, 6, 3),       # resnet34_mva (unchanged)
    "num_classes": 1000,                 # feeds the 1000-d MVA Linears (unchanged)
    "alexnet_channels": (16, 32, 48, 32, 32),   # (64,192,384,256,256) originally
    "alexnet_fc": 256,                   # 4096 originally
}

_PALLAS_MIN_ROWS = 256   # below this M a GEMM is latency-bound -> plain XLA dot


def _is_v7x():
    try:
        return "v7" in jax.devices()[0].device_kind.lower()
    except Exception:
        return False


_IS_V7X = _is_v7x()


def _round_up(x, m):
    return ((x + m - 1) // m) * m


def _cp(c):
    """Pad a channel count to a lane-dense 128-multiple."""
    return _round_up(c, 128)


def _pick_div(x, candidates):
    for c in candidates:
        if x % c == 0:
            return c
    return None


# ---------------------------------------------------------------------------
# Fused Pallas GEMM kernel:  out = act((A @ B) [* scale] [+ bias] [+ addend])
# ---------------------------------------------------------------------------
def _fused_matmul_kernel(*refs, act, has_scale, has_bias, has_addend):
    a_ref, b_ref = refs[0], refs[1]
    i = 2
    s_ref = z_ref = r_ref = None
    if has_scale:
        s_ref = refs[i]; i += 1
    if has_bias:
        z_ref = refs[i]; i += 1
    if has_addend:
        r_ref = refs[i]; i += 1
    o_ref, acc_ref = refs[i], refs[i + 1]

    @pl.when(pl.program_id(2) == 0)
    def _():
        acc_ref[...] = jnp.zeros_like(acc_ref)

    acc_ref[...] += jnp.dot(a_ref[...], b_ref[...],
                            preferred_element_type=jnp.float32)

    @pl.when(pl.program_id(2) == pl.num_programs(2) - 1)
    def _():
        y = acc_ref[...]
        if has_scale:
            y = y * s_ref[...]          # folded BN scale
        if has_bias:
            y = y + z_ref[...]          # folded BN bias / conv bias
        if has_addend:
            y = y + r_ref[...].astype(jnp.float32)   # fused residual add
        if act == "relu":
            y = jnp.maximum(y, 0.0)
        elif act == "leaky":
            y = jnp.where(y >= 0.0, y, 0.01 * y)
        o_ref[...] = y.astype(o_ref.dtype)


def _pallas_matmul_fused(a, b, scale, bias, addend, act):
    """a: (M, K) bf16, K % 128 == 0.  b: (K, N) bf16, N % 128 == 0.
    scale/bias: (1, N) f32 or None.  addend: (M, N) bf16 or None."""
    M, K = a.shape
    _, N = b.shape

    tm = _pick_div(M, (512, 384, 256, 128))
    if tm is None:
        tm = min(512, _round_up(M, 128))
    tk = _pick_div(K, (2048, 1536, 1152, 1024, 768, 512, 384, 256, 128))
    tn = _pick_div(N, (512, 384, 256, 128))
    Mp = _round_up(M, tm)

    # v7x has 2 TensorCores: make sure the parallel grid product is >= 2.
    if _IS_V7X and (Mp // tm) == 1 and (N // tn) == 1 and tm % 256 == 0:
        tm //= 2

    a_p = a if Mp == M else jnp.pad(a, ((0, Mp - M), (0, 0)))

    has_scale = scale is not None
    has_bias = bias is not None
    has_addend = addend is not None

    operands = [a_p, b]
    in_specs = [pl.BlockSpec((tm, tk), lambda i, j, k: (i, k)),
                pl.BlockSpec((tk, tn), lambda i, j, k: (k, j))]
    if has_scale:
        operands.append(scale)
        in_specs.append(pl.BlockSpec((1, tn), lambda i, j, k: (0, j)))
    if has_bias:
        operands.append(bias)
        in_specs.append(pl.BlockSpec((1, tn), lambda i, j, k: (0, j)))
    if has_addend:
        add_p = addend if Mp == M else jnp.pad(addend, ((0, Mp - M), (0, 0)))
        operands.append(add_p)
        in_specs.append(pl.BlockSpec((tm, tn), lambda i, j, k: (i, j)))

    out = pl.pallas_call(
        partial(_fused_matmul_kernel, act=act, has_scale=has_scale,
                has_bias=has_bias, has_addend=has_addend),
        out_shape=jax.ShapeDtypeStruct((Mp, N), jnp.bfloat16),
        grid_spec=pltpu.PrefetchScalarGridSpec(
            num_scalar_prefetch=0,
            grid=(Mp // tm, N // tn, K // tk),
            in_specs=in_specs,
            out_specs=pl.BlockSpec((tm, tn), lambda i, j, k: (i, j)),
            scratch_shapes=[pltpu.VMEM((tm, tn), jnp.float32)]),
        compiler_params=pltpu.CompilerParams(
            dimension_semantics=("parallel", "parallel", "arbitrary")),
    )(*operands)
    return out if Mp == M else out[:M]


def _apply_act(y, act):
    if act == "relu":
        return jnp.maximum(y, 0.0)
    if act == "leaky":
        return jnp.where(y >= 0.0, y, 0.01 * y)
    return y


def matmul_fused(a, b, *, scale=None, bias=None, act="none", addend=None):
    """act((a @ b) * scale + bias + addend), bf16 output.  Large-M goes
    through the Pallas MXU kernel; tiny-M stays in plain XLA."""
    M, K = a.shape
    _, N = b.shape
    if M >= _PALLAS_MIN_ROWS and K % 128 == 0 and N % 128 == 0:
        return _pallas_matmul_fused(a, b, scale, bias, addend, act)
    y = jnp.dot(a, b, preferred_element_type=jnp.float32)
    if scale is not None:
        y = y * scale
    if bias is not None:
        y = y + bias
    if addend is not None:
        y = y + addend.astype(jnp.float32)
    return _apply_act(y, act).astype(jnp.bfloat16)


# ---------------------------------------------------------------------------
# Conv / pooling / dense built on the fused GEMM (padded channels, bf16)
# ---------------------------------------------------------------------------
def conv2d(x, wp, *, stride=1, padding=0, scale=None, bias=None, act="none",
           addend=None):
    """x: NHWC bf16 with C already padded to wp.shape[0].
    wp: (Cin_p, kh, kw, Cout_p) bf16 with padded rows/cols == 0, so the
    (c, kh, kw) K ordering matches lax.conv_general_dilated_patches.
    scale/bias: (1, Cout_p) f32 or None.  addend: NHWC bf16 (Cout_p) or None.
    Returns NHWC bf16 with Cout_p channels (padding stays exactly zero)."""
    B = x.shape[0]
    cin_p, kh, kw, cout_p = wp.shape
    if kh == 1 and kw == 1:                 # 1x1 convs here always have padding 0
        xs = x[:, ::stride, ::stride, :] if stride > 1 else x
        OH, OW = xs.shape[1], xs.shape[2]
        patches = xs.reshape(B * OH * OW, cin_p)
    else:
        patches = jax.lax.conv_general_dilated_patches(
            x, (kh, kw), (stride, stride),
            ((padding, padding), (padding, padding)),
            dimension_numbers=("NHWC", "OIHW", "NHWC"))
        _, OH, OW, pk = patches.shape
        patches = patches.reshape(B * OH * OW, pk)
    add2d = None if addend is None else addend.reshape(B * OH * OW, cout_p)
    y = matmul_fused(patches, wp.reshape(cin_p * kh * kw, cout_p),
                     scale=scale, bias=bias, act=act, addend=add2d)
    return y.reshape(B, OH, OW, cout_p)


def conv2d_rgb(x, w_oihw, *, stride, padding, scale=None, bias=None,
               act="none"):
    """RGB-input stem conv via lax.conv (Cin=3 would waste a padded GEMM K).
    w_oihw: (Cout_p, 3, kh, kw) bf16 with padded output filters == 0."""
    y = jax.lax.conv_general_dilated(
        x, w_oihw, (stride, stride),
        ((padding, padding), (padding, padding)),
        dimension_numbers=("NHWC", "OIHW", "NHWC"),
        preferred_element_type=jnp.float32)
    if scale is not None:
        y = y * scale
    if bias is not None:
        y = y + bias
    return _apply_act(y, act).astype(jnp.bfloat16)


def maxpool2d(x, k, s, p):
    return jax.lax.reduce_window(
        x, jnp.array(-jnp.inf, x.dtype), jax.lax.max,
        window_dimensions=(1, k, k, 1), window_strides=(1, s, s, 1),
        padding=((0, 0), (p, p), (p, p), (0, 0)))


def adaptive_avg_pool(x, out_hw):
    """PyTorch AdaptiveAvgPool2d semantics, NHWC."""
    B, H, W, C = x.shape
    oh, ow = out_hw
    if H % oh == 0 and W % ow == 0:
        return x.reshape(B, oh, H // oh, ow, W // ow, C).mean(axis=(2, 4))
    if oh % H == 0 and ow % W == 0:
        return jnp.repeat(jnp.repeat(x, oh // H, axis=1), ow // W, axis=2)
    rows = []                                   # general fallback (rare)
    for i in range(oh):
        h0, h1 = (i * H) // oh, -((-(i + 1) * H) // oh)
        cols = []
        for j in range(ow):
            w0, w1 = (j * W) // ow, -((-(j + 1) * W) // ow)
            cols.append(jnp.mean(x[:, h0:h1, w0:w1, :], axis=(1, 2)))
        rows.append(jnp.stack(cols, axis=1))
    return jnp.stack(rows, axis=1)


def dense_f32(x, p, act="none"):
    y = jnp.dot(x, p["w"], preferred_element_type=jnp.float32) + p["b"]
    return _apply_act(y, act)


def mlp_leaky(x, layers):
    for lp in layers:
        x = dense_f32(x, lp, act="leaky")
    return x


def head(x, layers):
    for lp in layers[:-1]:
        x = dense_f32(x, lp, act="leaky")
    return dense_f32(x, layers[-1], act="none")


# ---------------------------------------------------------------------------
# MVA attention modules (operate on bf16, channel-padded activations)
# ---------------------------------------------------------------------------
def taylor_softmax(x, axis, n=4):
    fn = jnp.ones_like(x)
    p = jnp.ones_like(x)
    denor = 1.0
    for i in range(1, n + 1):      # incremental powers (no x**i re-exponentiation)
        denor *= i
        p = p * x
        fn = fn + p * (1.0 / denor)
    return fn / jnp.sum(fn, axis=axis, keepdims=True)


def _conv_nhwc(x, w_oihw, stride, padding):
    return jax.lax.conv_general_dilated(
        x, w_oihw, window_strides=(stride, stride),
        padding=((padding, padding), (padding, padding)),
        dimension_numbers=("NHWC", "OIHW", "NHWC"))


def channel_attention(p, views):
    # Padded channels contribute zero (fc1 rows for padded channels are zero),
    # and their sigmoid(0)=0.5 gates multiply zero activations -> stay zero.
    avg = jnp.concatenate(
        [jnp.mean(v.astype(jnp.float32), axis=(1, 2)) for v in views], axis=-1)
    mx = jnp.concatenate(
        [jnp.max(v, axis=(1, 2)).astype(jnp.float32) for v in views], axis=-1)
    z = jnp.concatenate([avg, mx], axis=0)       # both paths in one tiny MLP
    h = jnp.maximum(jnp.dot(z, p["fc1"]), 0.0)
    o = jnp.dot(h, p["fc2"])
    B = avg.shape[0]
    out = jax.nn.sigmoid(o[:B] + o[B:])
    gates = jnp.split(out, 4, axis=-1)
    return [g[:, None, None, :].astype(jnp.bfloat16) for g in gates]


def spatial_attention(p, views, planes):
    xs = []
    for v in views:
        vf = v.astype(jnp.float32)
        # mean/max over REAL channels only (padded channels are zero, so the
        # sum is exact; max is taken over a slice of the real channels).
        avg = jnp.sum(vf, axis=-1, keepdims=True) * (1.0 / planes)
        mx = jnp.max(vf[..., :planes], axis=-1, keepdims=True)
        z = jnp.concatenate([avg, mx], axis=-1)
        # NOTE: the reference applies conv_front to all four views (as written).
        z = _conv_nhwc(z, p["conv_front"], 1, 3)
        xs.append(jax.nn.sigmoid(z))
    x = jnp.concatenate(xs, axis=1)              # concat along H (torch dim 2)
    x = _conv_nhwc(x, p["conv_fusion"], 1, 1)
    x = x[..., 0]                                # (B, 4H, W)
    x = taylor_softmax(x, axis=1, n=4)
    parts = jnp.split(x, 4, axis=1)
    return [q[..., None].astype(jnp.bfloat16) for q in parts]


def sva_body(p, views, planes):
    ca = channel_attention(p["ca"], views)
    ca_out = [g * v for g, v in zip(ca, views)]
    sa = spatial_attention(p["sa"], ca_out, planes)
    return [s * v for s, v in zip(sa, ca_out)]


# ---------------------------------------------------------------------------
# ResNet-34 MVA trunk (BN + ReLU + residual fused into the conv GEMMs)
# ---------------------------------------------------------------------------
def basic_block(p, views, *, stride, planes):
    outs = []
    for name, v in zip(VIEWS, views):
        vp = p[name]
        o = conv2d(v, vp["conv1"], stride=stride, padding=1,
                   scale=vp["bn1_scale"], bias=vp["bn1_bias"], act="relu")
        o = conv2d(o, vp["conv2"], stride=1, padding=1,
                   scale=vp["bn2_scale"], bias=vp["bn2_bias"], act="none")
        outs.append(o)
    outs = sva_body(p["sva"], outs, planes)
    final = []
    for name, v, o in zip(VIEWS, views, outs):
        vp = p[name]
        if "down_conv" in vp:
            # downsample conv + BN + residual add + ReLU fused into one GEMM.
            r = conv2d(v, vp["down_conv"], stride=stride, padding=0,
                       scale=vp["down_scale"], bias=vp["down_bias"],
                       act="relu", addend=o)
            final.append(r)
        else:
            final.append(jnp.maximum(o + v, 0.0))
    return final


def resnet_mva_forward(p, views_nchw):
    base = CFG["resnet_width"]
    views = []
    for name, v in zip(VIEWS, views_nchw):
        x = jnp.transpose(v, (0, 2, 3, 1)).astype(jnp.bfloat16)   # NCHW -> NHWC
        sp = p[name + "_stem"]
        y = conv2d_rgb(x, sp["w"], stride=2, padding=3,
                       scale=sp["scale"], bias=sp["bias"], act="relu")
        views.append(maxpool2d(y, 3, 2, 1))
    plan = [("layer1", base, 1), ("layer2", base * 2, 2),
            ("layer3", base * 4, 2), ("layer4", base * 8, 2)]
    for lname, planes, lstride in plan:
        for bi, bp in enumerate(p[lname]):
            views = basic_block(bp, views, stride=(lstride if bi == 0 else 1),
                                planes=planes)
    c_last = base * 8
    feats = []
    for name, o in zip(VIEWS, views):
        o = conv2d(o, p[name + "_conv2"], stride=1, padding=0)   # 1x1, no BN/act
        o = jnp.mean(o.astype(jnp.float32), axis=(1, 2))          # AvgPool2d
        o = o[:, :c_last]                       # drop padded channels (tiny)
        feats.append(dense_f32(o, p[name + "_fc"], act="none"))
    return feats


# ---------------------------------------------------------------------------
# AlexNet map backbone (bias + ReLU fused into the conv GEMMs), LSTM
# ---------------------------------------------------------------------------
def alexnet_forward(p, x_nchw):
    x = jnp.transpose(x_nchw, (0, 2, 3, 1)).astype(jnp.bfloat16)
    x = conv2d_rgb(x, p["c1_w"], stride=4, padding=2, bias=p["c1_b"], act="relu")
    x = maxpool2d(x, 3, 2, 0)
    x = conv2d(x, p["c2_w"], stride=1, padding=2, bias=p["c2_b"], act="relu")
    x = maxpool2d(x, 3, 2, 0)
    x = conv2d(x, p["c3_w"], stride=1, padding=1, bias=p["c3_b"], act="relu")
    x = conv2d(x, p["c4_w"], stride=1, padding=1, bias=p["c4_b"], act="relu")
    x = conv2d(x, p["c5_w"], stride=1, padding=1, bias=p["c5_b"], act="relu")
    x = maxpool2d(x, 3, 2, 0)
    x = adaptive_avg_pool(x, (6, 6))
    B = x.shape[0]
    c5_real = CFG["alexnet_channels"][4]
    x = x[..., :c5_real]                         # drop padded channels
    x = jnp.transpose(x, (0, 3, 1, 2)).reshape(B, -1).astype(jnp.float32)
    x = dense_f32(x, p["fc1"], act="relu")       # dropout (eval) = identity
    x = dense_f32(x, p["fc2"], act="relu")
    return dense_f32(x, p["fc3"], act="none")


def lstm_forward(layers, x):
    """PyTorch-semantics multi-layer LSTM; x: (T, B, D), h0 = c0 = 0.
    Input projections batched over time, recurrence under lax.scan."""
    seq = x
    for lp in layers:
        H = lp["w_hh"].shape[0]
        B = seq.shape[1]
        xg = jnp.einsum("tbd,dh->tbh", seq, lp["w_ih"]) + lp["b"]
        w_hh = lp["w_hh"]

        def step(carry, g_x, w_hh=w_hh):
            h, c = carry
            gates = g_x + jnp.dot(h, w_hh)
            i, f, g, o = jnp.split(gates, 4, axis=-1)
            c = jax.nn.sigmoid(f) * c + jax.nn.sigmoid(i) * jnp.tanh(g)
            h = jax.nn.sigmoid(o) * jnp.tanh(c)
            return (h, c), h

        init = (jnp.zeros((B, H), jnp.float32), jnp.zeros((B, H), jnp.float32))
        _, seq = jax.lax.scan(step, init, xg)
    return seq


# ---------------------------------------------------------------------------
# MVA_Net forward (whole graph under one jit)
# ---------------------------------------------------------------------------
def mva_net_forward(params, front_in, rear_in, left_in, right_in, map_in,
                    speed_in, batch_size):
    front, rear, left, right = resnet_mva_forward(
        params["resnet"], [front_in, rear_in, left_in, right_in])
    speed_feature = speed_in
    tomtom_map = alexnet_forward(params["alexnet"], map_in)
    map_feature = dense_f32(tomtom_map, params["map"], act="leaky")  # dropout=id

    def regroup(feat):
        # feat[(k*batch_size + x)] -> out[k, x]  ==  reshape(4, batch_size, D)
        return feat.reshape(4, batch_size, feat.shape[-1])

    front_feature = regroup(mlp_leaky(front, params["front_mlp"]))
    front_feature_lstm = lstm_forward(params["front_lstm"], front_feature)
    rear_feature = lstm_forward(params["rear_lstm"],
                                regroup(mlp_leaky(rear, params["rear_mlp"])))
    left_feature = lstm_forward(params["left_lstm"],
                                regroup(mlp_leaky(left, params["left_mlp"])))
    right_feature = lstm_forward(params["right_lstm"],
                                 regroup(mlp_leaky(right, params["right_mlp"])))
    concat = jnp.concatenate(
        [front_feature_lstm[-1], front_feature[-1], rear_feature[-1],
         left_feature[-1], right_feature[-1], map_feature, speed_feature], axis=1)
    steer = head(concat, params["steer"])
    speed = head(concat, params["speed"])
    return steer, speed


mva_net_forward_jit = jax.jit(mva_net_forward, static_argnames=("batch_size",))


# ---------------------------------------------------------------------------
# Deterministic parameter init (synthetic; no checkpoint loading).
# Weights are pre-cast to bf16 and pre-padded to 128-multiple channels so the
# forward pass never pads/casts a weight.
# ---------------------------------------------------------------------------
class KeyGen:
    def __init__(self, seed):
        self._key = jax.random.PRNGKey(seed)

    def __call__(self):
        self._key, sub = jax.random.split(self._key)
        return sub


def init_conv_gemm(kg, cout, cin, k, cinp, coutp):
    # ResNet._init_weight: normal(0, sqrt(2/n)), n = k*k*cout.  Stored as
    # (Cin_p, kh, kw, Cout_p) bf16 with zero padded rows/cols.
    n = k * k * cout
    w = jax.random.normal(kg(), (cout, cin, k, k), jnp.float32) * np.sqrt(2.0 / n)
    w = jnp.transpose(w, (1, 2, 3, 0))
    w = jnp.pad(w, ((0, cinp - cin), (0, 0), (0, 0), (0, coutp - cout)))
    return w.astype(jnp.bfloat16)


def init_conv_oihw(kg, cout, cin, k):
    n = k * k * cout
    return jax.random.normal(kg(), (cout, cin, k, k), jnp.float32) * np.sqrt(2.0 / n)


def init_bn(c, cp, eps=1e-5):
    gamma = jnp.ones((c,), jnp.float32)
    beta = jnp.zeros((c,), jnp.float32)
    mean = jnp.zeros((c,), jnp.float32)
    var = jnp.ones((c,), jnp.float32)
    scale = gamma / jnp.sqrt(var + eps)
    bias = beta - mean * scale
    scale = jnp.pad(scale, (0, cp - c)).reshape(1, cp)
    bias = jnp.pad(bias, (0, cp - c)).reshape(1, cp)
    return scale, bias


def init_linear(kg, din, dout):
    w = jax.random.normal(kg(), (din, dout), jnp.float32) / np.sqrt(din)
    return {"w": w, "b": jnp.zeros((dout,), jnp.float32)}


def init_ca(kg, planes, cp):
    c4 = planes * 4
    hid = max(c4 // 16, 1)
    fc1 = jax.random.normal(kg(), (c4, hid), jnp.float32) * np.sqrt(2.0 / hid)
    fc2 = jax.random.normal(kg(), (hid, c4), jnp.float32) * np.sqrt(2.0 / c4)
    fc1p = jnp.zeros((4 * cp, hid), jnp.float32)
    fc2p = jnp.zeros((hid, 4 * cp), jnp.float32)
    for v in range(4):
        fc1p = fc1p.at[v * cp:v * cp + planes].set(fc1[v * planes:(v + 1) * planes])
        fc2p = fc2p.at[:, v * cp:v * cp + planes].set(fc2[:, v * planes:(v + 1) * planes])
    return {"fc1": fc1p, "fc2": fc2p}


def init_lstm(kg, din, hidden, layers):
    out = []
    k = 1.0 / np.sqrt(hidden)
    for layer in range(layers):
        d = din if layer == 0 else hidden
        w_ih = jax.random.uniform(kg(), (d, 4 * hidden), jnp.float32, -k, k)
        w_hh = jax.random.uniform(kg(), (hidden, 4 * hidden), jnp.float32, -k, k)
        b_ih = jax.random.uniform(kg(), (4 * hidden,), jnp.float32, -k, k)
        b_hh = jax.random.uniform(kg(), (4 * hidden,), jnp.float32, -k, k)
        out.append({"w_ih": w_ih, "w_hh": w_hh, "b": b_ih + b_hh})
    return out


def init_resnet_mva(kg, base, blocks, num_classes):
    p = {}
    basep = _cp(base)
    for v in VIEWS:
        n = 7 * 7 * base
        w = jax.random.normal(kg(), (base, 3, 7, 7), jnp.float32) * np.sqrt(2.0 / n)
        w = jnp.pad(w, ((0, basep - base), (0, 0), (0, 0), (0, 0))).astype(jnp.bfloat16)
        sc, bs = init_bn(base, basep)
        p[v + "_stem"] = {"w": w, "scale": sc, "bias": bs}
    inplanes = base
    plan = [("layer1", base, blocks[0], 1), ("layer2", base * 2, blocks[1], 2),
            ("layer3", base * 4, blocks[2], 2), ("layer4", base * 8, blocks[3], 2)]
    for lname, planes, nblocks, s0 in plan:
        blist = []
        pp = _cp(planes)
        for bi in range(nblocks):
            s = s0 if bi == 0 else 1
            cin = inplanes if bi == 0 else planes
            cinp = _cp(cin)
            need_down = (bi == 0) and (s != 1 or inplanes != planes)
            bp = {}
            for v in VIEWS:
                sc1, bs1 = init_bn(planes, pp)
                sc2, bs2 = init_bn(planes, pp)
                vp = {"conv1": init_conv_gemm(kg, planes, cin, 3, cinp, pp),
                      "bn1_scale": sc1, "bn1_bias": bs1,
                      "conv2": init_conv_gemm(kg, planes, planes, 3, pp, pp),
                      "bn2_scale": sc2, "bn2_bias": bs2}
                if need_down:
                    dsc, dbs = init_bn(planes, pp)
                    vp["down_conv"] = init_conv_gemm(kg, planes, cin, 1, cinp, pp)
                    vp["down_scale"] = dsc
                    vp["down_bias"] = dbs
                bp[v] = vp
            bp["sva"] = {"ca": init_ca(kg, planes, pp),
                         "sa": {"conv_front": init_conv_oihw(kg, 1, 2, 7),
                                "conv_fusion": init_conv_oihw(kg, 1, 1, 3)}}
            blist.append(bp)
        p[lname] = blist
        inplanes = planes
    c_last = base * 8
    c_lastp = _cp(c_last)
    for v in VIEWS:
        p[v + "_conv2"] = init_conv_gemm(kg, c_last, c_last, 1, c_lastp, c_lastp)
        p[v + "_fc"] = init_linear(kg, c_last, num_classes)
    return p


def init_alexnet(kg, chans, fc_dim, num_classes):
    c1, c2, c3, c4, c5 = chans

    def conv_rgb(cout, cin, k):
        coutp = _cp(cout)
        w = jax.random.normal(kg(), (cout, cin, k, k), jnp.float32) / np.sqrt(cin * k * k)
        w = jnp.pad(w, ((0, coutp - cout), (0, 0), (0, 0), (0, 0))).astype(jnp.bfloat16)
        return w, jnp.zeros((1, coutp), jnp.float32)

    def conv(cout, cin, k):
        cinp, coutp = _cp(cin), _cp(cout)
        w = jax.random.normal(kg(), (cout, cin, k, k), jnp.float32) / np.sqrt(cin * k * k)
        w = jnp.transpose(w, (1, 2, 3, 0))
        w = jnp.pad(w, ((0, cinp - cin), (0, 0), (0, 0), (0, coutp - cout)))
        return w.astype(jnp.bfloat16), jnp.zeros((1, coutp), jnp.float32)

    c1_w, c1_b = conv_rgb(c1, 3, 11)
    c2_w, c2_b = conv(c2, c1, 5)
    c3_w, c3_b = conv(c3, c2, 3)
    c4_w, c4_b = conv(c4, c3, 3)
    c5_w, c5_b = conv(c5, c4, 3)
    return {"c1_w": c1_w, "c1_b": c1_b, "c2_w": c2_w, "c2_b": c2_b,
            "c3_w": c3_w, "c3_b": c3_b, "c4_w": c4_w, "c4_b": c4_b,
            "c5_w": c5_w, "c5_b": c5_b,
            "fc1": init_linear(kg, c5 * 6 * 6, fc_dim),
            "fc2": init_linear(kg, fc_dim, fc_dim),
            "fc3": init_linear(kg, fc_dim, num_classes)}


def init_mva_net(seed, cfg):
    kg = KeyGen(seed)
    nc = cfg["num_classes"]
    p = {"resnet": init_resnet_mva(kg, cfg["resnet_width"], cfg["resnet_blocks"], nc),
         "alexnet": init_alexnet(kg, cfg["alexnet_channels"], cfg["alexnet_fc"], nc)}
    p["front_mlp"] = [init_linear(kg, nc, 1024), init_linear(kg, 1024, 1024)]
    p["front_lstm"] = init_lstm(kg, 1024, 128, 4)
    for v in ("rear", "left", "right"):
        p[v + "_mlp"] = [init_linear(kg, nc, 128), init_linear(kg, 128, 64)]
        p[v + "_lstm"] = init_lstm(kg, 64, 64, 4)
    p["map"] = init_linear(kg, nc, 128)
    concat_dim = 128 + 1024 + 64 + 64 + 64 + 128 + 1     # = 1473, as in MVA_Net
    p["steer"] = [init_linear(kg, concat_dim, 512), init_linear(kg, 512, 64),
                  init_linear(kg, 64, 32), init_linear(kg, 32, 1)]
    p["speed"] = [init_linear(kg, concat_dim, 512), init_linear(kg, 512, 64),
                  init_linear(kg, 64, 32), init_linear(kg, 32, 1)]
    return p


# ---------------------------------------------------------------------------
if __name__ == "__main__":
    cfg = CFG
    batch_size = 1                 # each camera stream carries batch_size*4 frames
    N = batch_size * 4
    S = cfg["image_size"]
    MS = cfg["map_size"]

    key = jax.random.PRNGKey(0)
    ks = jax.random.split(key, 6)
    front_in = jax.random.normal(ks[0], (N, 3, S, S), jnp.float32)
    rear_in = jax.random.normal(ks[1], (N, 3, S, S), jnp.float32)
    left_in = jax.random.normal(ks[2], (N, 3, S, S), jnp.float32)
    right_in = jax.random.normal(ks[3], (N, 3, S, S), jnp.float32)
    map_in = jax.random.normal(ks[4], (batch_size, 3, MS, MS), jnp.float32)
    speed_in = jax.random.normal(ks[5], (batch_size, 1), jnp.float32)

    params = init_mva_net(0, cfg)
    steer, speed = mva_net_forward_jit(params, front_in, rear_in, left_in,
                                       right_in, map_in, speed_in,
                                       batch_size=batch_size)
    jax.block_until_ready((steer, speed))
    assert steer.shape == (batch_size, 1) and speed.shape == (batch_size, 1)
    assert bool(jnp.all(jnp.isfinite(steer))) and bool(jnp.all(jnp.isfinite(speed)))
    print("KERNEL_OK")
</pallas_src>

<mosaic_0001>
module attributes {stable_mosaic.version = 11 : i64} {
  func.func @_fused_matmul_kernel(%arg0: i32, %arg1: i32, %arg2: i32, %arg3: memref<256x1152xbf16, #tpu.memory_space<vmem>>, %arg4: memref<1152x128xbf16, #tpu.memory_space<vmem>>, %arg5: memref<1x128xf32, #tpu.memory_space<vmem>>, %arg6: memref<1x128xf32, #tpu.memory_space<vmem>>, %arg7: memref<256x128xbf16, #tpu.memory_space<vmem>>, %arg8: memref<256x128xf32, #tpu.memory_space<vmem>>) attributes {dimension_semantics = [#tpu.dimension_semantics<parallel>, #tpu.dimension_semantics<parallel>, #tpu.dimension_semantics<arbitrary>], iteration_bounds = array<i64: 1, 1, 1>, scalar_prefetch = 0 : i64, scratch_operands = 1 : i64, tpu.core_type = #tpu.core_type<tc>, window_params = [{transform_indices = @transform_0, window_bounds = array<i64: 256, 1152>}, {transform_indices = @transform_1, window_bounds = array<i64: 1152, 128>}, {transform_indices = @transform_2, window_bounds = array<i64: 1, 128>}, {transform_indices = @transform_3, window_bounds = array<i64: 1, 128>}, {transform_indices = @transform_4, window_bounds = array<i64: 256, 128>}]} {
    %c0_i32 = arith.constant 0 : i32
    %0 = arith.cmpi eq, %arg2, %c0_i32 : i32
    %1 = arith.extui %0 : i1 to i32
    %c0_i32_0 = arith.constant 0 : i32
    %2 = arith.cmpi ne, %1, %c0_i32_0 : i32
    scf.if %2 {
      %cst_10 = arith.constant 0.000000e+00 : f32
      %12 = vector.broadcast %cst_10 : f32 to vector<256x128xf32>
      %c0_11 = arith.constant 0 : index
      %c0_12 = arith.constant 0 : index
      %13 = vector.load %arg8[%c0_11, %c0_12] : memref<256x128xf32, #tpu.memory_space<vmem>>, vector<256x128xf32>
      tpu.vector_store %arg8[%c0_11, %c0_12], %12 {strides = array<i32>} : memref<256x128xf32, #tpu.memory_space<vmem>>, vector<256x128xf32>,
    } else {
    }
    %c0 = arith.constant 0 : index
    %c0_1 = arith.constant 0 : index
    %3 = vector.load %arg8[%c0, %c0_1] : memref<256x128xf32, #tpu.memory_space<vmem>>, vector<256x128xf32>
    %c0_2 = arith.constant 0 : index
    %c0_3 = arith.constant 0 : index
    %4 = vector.load %arg3[%c0_2, %c0_3] : memref<256x1152xbf16, #tpu.memory_space<vmem>>, vector<256x1152xbf16>
    %c0_4 = arith.constant 0 : index
    %c0_5 = arith.constant 0 : index
    %5 = vector.load %arg4[%c0_4, %c0_5] : memref<1152x128xbf16, #tpu.memory_space<vmem>>, vector<1152x128xbf16>
    %cst = arith.constant dense<0.000000e+00> : vector<256x128xf32>
    %6 = tpu.matmul %4, %5, %cst {dimension_numbers = #tpu.dot_dimension_numbers<[1], [0], [0], [1], [0, 0, 1, 1], [], []>} : vector<256x1152xbf16>, vector<1152x128xbf16>, vector<256x128xf32> -> vector<256x128xf32>
    %7 = arith.addf %3, %6 : vector<256x128xf32>
    %c0_6 = arith.constant 0 : index
    %c0_7 = arith.constant 0 : index
    %8 = vector.load %arg8[%c0_6, %c0_7] : memref<256x128xf32, #tpu.memory_space<vmem>>, vector<256x128xf32>
    tpu.vector_store %arg8[%c0_6, %c0_7], %7 {strides = array<i32>} : memref<256x128xf32, #tpu.memory_space<vmem>>, vector<256x128xf32>,
    %c0_i32_8 = arith.constant 0 : i32
    %9 = arith.cmpi eq, %arg2, %c0_i32_8 : i32
    %10 = arith.extui %9 : i1 to i32
    %c0_i32_9 = arith.constant 0 : i32
    %11 = arith.cmpi ne, %10, %c0_i32_9 : i32
    scf.if %11 {
      %c0_10 = arith.constant 0 : index
      %c0_11 = arith.constant 0 : index
      %12 = vector.load %arg8[%c0_10, %c0_11] : memref<256x128xf32, #tpu.memory_space<vmem>>, vector<256x128xf32>
      %c0_12 = arith.constant 0 : index
      %c0_13 = arith.constant 0 : index
      %13 = vector.load %arg5[%c0_12, %c0_13] : memref<1x128xf32, #tpu.memory_space<vmem>>, vector<1x128xf32>
      %14 = vector.broadcast %13 : vector<1x128xf32> to vector<256x128xf32>
      %15 = arith.mulf %12, %14 : vector<256x128xf32>
      %c0_14 = arith.constant 0 : index
      %c0_15 = arith.constant 0 : index
      %16 = vector.load %arg6[%c0_14, %c0_15] : memref<1x128xf32, #tpu.memory_space<vmem>>, vector<1x128xf32>
      %17 = vector.broadcast %16 : vector<1x128xf32> to vector<256x128xf32>
      %18 = arith.addf %15, %17 : vector<256x128xf32>
      %cst_16 = arith.constant 0.000000e+00 : f32
      %19 = vector.broadcast %cst_16 : f32 to vector<256x128xf32>
      %20 = arith.maximumf %18, %19 : vector<256x128xf32>
      %21 = arith.truncf %20 : vector<256x128xf32> to vector<256x128xbf16>
      %c0_17 = arith.constant 0 : index
      %c0_18 = arith.constant 0 : index
      %22 = vector.load %arg7[%c0_17, %c0_18] : memref<256x128xbf16, #tpu.memory_space<vmem>>, vector<256x128xbf16>
      tpu.vector_store %arg7[%c0_17, %c0_18], %21 {strides = array<i32>} : memref<256x128xbf16, #tpu.memory_space<vmem>>, vector<256x128xbf16>,
    } else {
    }
    return
  }
  func.func @transform_0(%arg0: i32, %arg1: i32, %arg2: i32) -> (i32, i32) {
    %c0_i32 = arith.constant 0 : i32
    return %arg0, %arg2 : i32, i32
  }
  func.func @transform_1(%arg0: i32, %arg1: i32, %arg2: i32) -> (i32, i32) {
    %c0_i32 = arith.constant 0 : i32
    return %arg2, %arg1 : i32, i32
  }
  func.func @transform_2(%arg0: i32, %arg1: i32, %arg2: i32) -> (i32, i32) {
    %c0_i32 = arith.constant 0 : i32
    %c0_i32_0 = arith.constant 0 : i32
    return %c0_i32, %arg1 : i32, i32
  }
  func.func @transform_3(%arg0: i32, %arg1: i32, %arg2: i32) -> (i32, i32) {
    %c0_i32 = arith.constant 0 : i32
    %c0_i32_0 = arith.constant 0 : i32
    return %c0_i32, %arg1 : i32, i32
  }
  func.func @transform_4(%arg0: i32, %arg1: i32, %arg2: i32) -> (i32, i32) {
    %c0_i32 = arith.constant 0 : i32
    return %arg0, %arg1 : i32, i32
  }
}

module attributes {stable_mosaic.version = 11 : i64} {
  func.func @_fused_matmul_kernel(%arg0: i32, %arg1: i32, %arg2: i32, %arg3: memref<256x1152xbf16, #tpu.memory_space<vmem>>, %arg4: memref<1152x128xbf16, #tpu.memory_space<vmem>>, %arg5: memref<1x128xf32, #tpu.memory_space<vmem>>, %arg6: memref<1x128xf32, #tpu.memory_space<vmem>>, %arg7: memref<256x128xbf16, #tpu.memory_space<vmem>>, %arg8: memref<256x128xf32, #tpu.memory_space<vmem>>) attributes {dimension_semantics = [#tpu.dimension_semantics<parallel>, #tpu.dimension_semantics<parallel>, #tpu.dimension_semantics<arbitrary>], iteration_bounds = array<i64: 1, 1, 1>, scalar_prefetch = 0 : i64, scratch_operands = 1 : i64, tpu.core_type = #tpu.core_type<tc>, window_params = [{transform_indices = @transform_0, window_bounds = array<i64: 256, 1152>}, {transform_indices = @transform_1, window_bounds = array<i64: 1152, 128>}, {transform_indices = @transform_2, window_bounds = array<i64: 1, 128>}, {transform_indices = @transform_3, window_bounds = array<i64: 1, 128>}, {transform_indices = @transform_4, window_bounds = array<i64: 256, 128>}]} {
    %c0_i32 = arith.constant 0 : i32
    %0 = arith.cmpi eq, %arg2, %c0_i32 : i32
    %1 = arith.extui %0 : i1 to i32
    %c0_i32_0 = arith.constant 0 : i32
    %2 = arith.cmpi ne, %1, %c0_i32_0 : i32
    scf.if %2 {
      %cst_10 = arith.constant 0.000000e+00 : f32
      %12 = vector.broadcast %cst_10 : f32 to vector<256x128xf32>
      %c0_11 = arith.constant 0 : index
      %c0_12 = arith.constant 0 : index
      %13 = vector.load %arg8[%c0_11, %c0_12] : memref<256x128xf32, #tpu.memory_space<vmem>>, vector<256x128xf32>
      tpu.vector_store %arg8[%c0_11, %c0_12], %12 {strides = array<i32>} : memref<256x128xf32, #tpu.memory_space<vmem>>, vector<256x128xf32>,
    } else {
    }
    %c0 = arith.constant 0 : index
    %c0_1 = arith.constant 0 : index
    %3 = vector.load %arg8[%c0, %c0_1] : memref<256x128xf32, #tpu.memory_space<vmem>>, vector<256x128xf32>
    %c0_2 = arith.constant 0 : index
    %c0_3 = arith.constant 0 : index
    %4 = vector.load %arg3[%c0_2, %c0_3] : memref<256x1152xbf16, #tpu.memory_space<vmem>>, vector<256x1152xbf16>
    %c0_4 = arith.constant 0 : index
    %c0_5 = arith.constant 0 : index
    %5 = vector.load %arg4[%c0_4, %c0_5] : memref<1152x128xbf16, #tpu.memory_space<vmem>>, vector<1152x128xbf16>
    %cst = arith.constant dense<0.000000e+00> : vector<256x128xf32>
    %6 = tpu.matmul %4, %5, %cst {dimension_numbers = #tpu.dot_dimension_numbers<[1], [0], [0], [1], [0, 0, 1, 1], [], []>} : vector<256x1152xbf16>, vector<1152x128xbf16>, vector<256x128xf32> -> vector<256x128xf32>
    %7 = arith.addf %3, %6 : vector<256x128xf32>
    %c0_6 = arith.constant 0 : index
    %c0_7 = arith.constant 0 : index
    %8 = vector.load %arg8[%c0_6, %c0_7] : memref<256x128xf32, #tpu.memory_space<vmem>>, vector<256x128xf32>
    tpu.vector_store %arg8[%c0_6, %c0_7], %7 {strides = array<i32>} : memref<256x128xf32, #tpu.memory_space<vmem>>, vector<256x128xf32>,
    %c0_i32_8 = arith.constant 0 : i32
    %9 = arith.cmpi eq, %arg2, %c0_i32_8 : i32
    %10 = arith.extui %9 : i1 to i32
    %c0_i32_9 = arith.constant 0 : i32
    %11 = arith.cmpi ne, %10, %c0_i32_9 : i32
    scf.if %11 {
      %c0_10 = arith.constant 0 : index
      %c0_11 = arith.constant 0 : index
      %12 = vector.load %arg8[%c0_10, %c0_11] : memref<256x128xf32, #tpu.memory_space<vmem>>, vector<256x128xf32>
      %c0_12 = arith.constant 0 : index
      %c0_13 = arith.constant 0 : index
      %13 = vector.load %arg5[%c0_12, %c0_13] : memref<1x128xf32, #tpu.memory_space<vmem>>, vector<1x128xf32>
      %14 = vector.broadcast %13 : vector<1x128xf32> to vector<256x128xf32>
      %15 = arith.mulf %12, %14 : vector<256x128xf32>
      %c0_14 = arith.constant 0 : index
      %c0_15 = arith.constant 0 : index
      %16 = vector.load %arg6[%c0_14, %c0_15] : memref<1x128xf32, #tpu.memory_space<vmem>>, vector<1x128xf32>
      %17 = vector.broadcast %16 : vector<1x128xf32> to vector<256x128xf32>
      %18 = arith.addf %15, %17 : vector<256x128xf32>
      %19 = arith.truncf %18 : vector<256x128xf32> to vector<256x128xbf16>
      %c0_16 = arith.constant 0 : index
      %c0_17 = arith.constant 0 : index
      %20 = vector.load %arg7[%c0_16, %c0_17] : memref<256x128xbf16, #tpu.memory_space<vmem>>, vector<256x128xbf16>
      tpu.vector_store %arg7[%c0_16, %c0_17], %19 {strides = array<i32>} : memref<256x128xbf16, #tpu.memory_space<vmem>>, vector<256x128xbf16>,
    } else {
    }
    return
  }
  func.func @transform_0(%arg0: i32, %arg1: i32, %arg2: i32) -> (i32, i32) {
    %c0_i32 = arith.constant 0 : i32
    return %arg0, %arg2 : i32, i32
  }
  func.func @transform_1(%arg0: i32, %arg1: i32, %arg2: i32) -> (i32, i32) {
    %c0_i32 = arith.constant 0 : i32
    return %arg2, %arg1 : i32, i32
  }
  func.func @transform_2(%arg0: i32, %arg1: i32, %arg2: i32) -> (i32, i32) {
    %c0_i32 = arith.constant 0 : i32
    %c0_i32_0 = arith.constant 0 : i32
    return %c0_i32, %arg1 : i32, i32
  }
  func.func @transform_3(%arg0: i32, %arg1: i32, %arg2: i32) -> (i32, i32) {
    %c0_i32 = arith.constant 0 : i32
    %c0_i32_0 = arith.constant 0 : i32
    return %c0_i32, %arg1 : i32, i32
  }
  func.func @transform_4(%arg0: i32, %arg1: i32, %arg2: i32) -> (i32, i32) {
    %c0_i32 = arith.constant 0 : i32
    return %arg0, %arg1 : i32, i32
  }
}

</mosaic_0001>

<bundles_post_ra>
// kernel: mva_net_forward.24
= control target key start
LH: loop header
LB: loop body
LE: loop exit
PB: predicated region body
PF: predicated region fallthrough
CT: control target
= control target key end

     0   :  { %s5063_s1 = inlined_call_operand.vmem [shape: bf16[1152,128], index: 1, kind: input, shape index: {}]   ;;  %s5064_s0 = inlined_call_operand.vmem [shape: bf16[256,1152], index: 0, kind: input, shape index: {}]   ;;  %s5065_s2 = inlined_call_operand.vmem [shape: f32[1,128], index: 2, kind: input, shape index: {}]   ;;  %s5066_s3 = inlined_call_operand.vmem [shape: f32[1,128], index: 3, kind: input, shape index: {}]   ;;  %s5067_s4 = inlined_call_operand.vmem [shape: bf16[256,128], index: 4, kind: output, shape index: {}]  }
   0x1   :  { %v3649_v0 = vld [vmem:[%s5063_s1 + $0x40] sm:$0xff]   ;;  %v3651_v2 = vld [vmem:[%s5063_s1 + $0x48] sm:$0xff]   ;;  %v3653_v4 = vld [vmem:[%s5063_s1 + $0x50] sm:$0xff]  }
   0x2   :  { %v3650_v1 = vld [vmem:[%s5063_s1] sm:$0xff]   ;;  %3113 = vmatprep.subr.bf16.mxu0 %v3649_v0  ;;  %3633 = vmatprep.subr.bf16.mxu1 %v3649_v0  ;;  %v3652_v3 = vld [vmem:[%s5063_s1 + $0x8] sm:$0xff]   ;;  %v3654_v5 = vld [vmem:[%s5063_s1 + $0x10] sm:$0xff]  }
   0x3   :  { %3114 = vmatpush3.bf16.msra.mxu0 %v3650_v1  ;;  %3641 = vmatpush3.bf16.msra.mxu1 %v3650_v1  ;;  %v3655_v6 = vld [vmem:[%s5063_s1 + $0x58] sm:$0xff]   ;;  %v3657_v8 = vld [vmem:[%s5063_s1 + $0x60] sm:$0xff]   ;;  %v3659_v10 = vld [vmem:[%s5063_s1 + $0x68] sm:$0xff]  }
   0x4   :  { %3115 = vmatprep.subr.bf16.mxu0 %v3651_v2  ;;  %3634 = vmatprep.subr.bf16.mxu1 %v3651_v2  ;;  %v3656_v7 = vld [vmem:[%s5063_s1 + $0x18] sm:$0xff]   ;;  %v3658_v9 = vld [vmem:[%s5063_s1 + $0x20] sm:$0xff]   ;;  %v3660_v13 = vld [vmem:[%s5063_s1 + $0x28] sm:$0xff]  }
   0x5   :  { %v3667_v11 = vld [vmem:[%s5064_s0 + $0x4] ss:$36 sps:$4 sm:$0xff]   ;;  %v3661_v14 = vld [vmem:[%s5063_s1 + $0x70] sm:$0xff]   ;;  %v3663_v16 = vld [vmem:[%s5063_s1 + $0x78] sm:$0xff]  }
   0x6   :  { %v3670_v12 = vld [vmem:[%s5064_s0 + $0x364] ss:$36 sps:$4 sm:$0xff]   ;;  %1590 = vmatprep.mubr.bf16.mxu0 %v3667_v11  ;;  %v3662_v15 = vld [vmem:[%s5063_s1 + $0x30] sm:$0xff]   ;;  %v3664_v17 = vld [vmem:[%s5063_s1 + $0x38] sm:$0xff]  }
   0x7   :  { %3116 = vmatpush3.bf16.msra.mxu0 %v3652_v3  ;;  %3642 = vmatpush3.bf16.msra.mxu1 %v3652_v3  ;;  %v3671_v18 = vld [vmem:[%s5063_s1 + $0xc0] sm:$0xff]   ;;  %v3673_v23 = vld [vmem:[%s5063_s1 + $0xc8] sm:$0xff]   ;;  %v3683_v31 = vld [vmem:[%s5063_s1 + $0xd0] sm:$0xff]  }
   0x8   :  { %3117 = vmatprep.subr.bf16.mxu0 %v3653_v4  ;;  %3635 = vmatprep.subr.bf16.mxu1 %v3653_v4  ;;  %v3665_v19 = vld [vmem:[%s5064_s0] ss:$36 sps:$4 sm:$0xff]   ;;  %v3677_v25 = vld [vmem:[%s5064_s0 + $0x4c] ss:$36 sps:$4 sm:$0xff]   ;;  %v3685_v34 = vld [vmem:[%s5063_s1 + $0xd8] sm:$0xff]  }
   0x9   :  { %1686 = vmatprep.mubr.bf16.mxu1 %v3670_v12  ;;  %v3668_v20 = vld [vmem:[%s5064_s0 + $0x360] ss:$36 sps:$4 sm:$0xff]   ;;  %v3679_v26 = vld [vmem:[%s5064_s0 + $0x3ac] ss:$36 sps:$4 sm:$0xff]   ;;  %v3687_v35 = vld [vmem:[%s5064_s0 + $0x94] ss:$36 sps:$4 sm:$0xff]  }
   0xa   :  { %v3674_v21 = vld [vmem:[%s5063_s1 + $0x140] sm:$0xff]   ;;  %v3675_v27 = vld [vmem:[%s5063_s1 + $0x88] sm:$0xff]   ;;  %v3684_v32 = vld [vmem:[%s5063_s1 + $0x90] sm:$0xff]  }
   0xb   :  { %3118 = vmatpush3.bf16.msra.mxu0 %v3654_v5  ;;  %3643 = vmatpush3.bf16.msra.mxu1 %v3654_v5  ;;  %v3672_v22 = vld [vmem:[%s5063_s1 + $0x80] sm:$0xff]   ;;  %v3694_v28 = vld [vmem:[%s5063_s1 + $0x148] sm:$0xff]   ;;  %v3689_v36 = vld [vmem:[%s5064_s0 + $0x3f4] ss:$36 sps:$4 sm:$0xff]  }
   0xc   :  { %3119 = vmatprep.subr.bf16.mxu0 %v3655_v6  ;;  %3636 = vmatprep.subr.bf16.mxu1 %v3655_v6  ;;  %v3676_v24 = vld [vmem:[%s5063_s1 + $0x100] sm:$0xff]   ;;  %v3681_v29 = vld [vmem:[%s5064_s0 + $0x48] ss:$36 sps:$4 sm:$0xff]   ;;  %v3686_v37 = vld [vmem:[%s5063_s1 + $0x98] sm:$0xff]  }
   0xd   :  { %v3682_v30 = vld [vmem:[%s5064_s0 + $0x3a8] ss:$36 sps:$4 sm:$0xff]   ;;  %v3691_v38 = vld [vmem:[%s5064_s0 + $0x90] ss:$36 sps:$4 sm:$0xff]   ;;  %v3693_v40 = vld [vmem:[%s5063_s1 + $0xe0] sm:$0xff]  }
   0xe   :  { %v3696_v33 = vld [vmem:[%s5063_s1 + $0x108] sm:$0xff]   ;;  %v3692_v39 = vld [vmem:[%s5064_s0 + $0x3f0] ss:$36 sps:$4 sm:$0xff]   ;;  %v3695_v41 = vld [vmem:[%s5063_s1 + $0xa0] sm:$0xff]  }
   0xf   :  { %3120 = vmatpush3.bf16.msra.mxu0 %v3656_v7  ;;  %3644 = vmatpush3.bf16.msra.mxu1 %v3656_v7  ;;  %v3697_v42 = vld [vmem:[%s5063_s1 + $0xe8] sm:$0xff]   ;;  %v3708_v43 = vld [vmem:[%s5063_s1 + $0x150] sm:$0xff]   ;;  %v3699_v44 = vld [vmem:[%s5064_s0 + $0xdc] ss:$36 sps:$4 sm:$0xff]  }
  0x10   :  { %3121 = vmatprep.subr.bf16.mxu0 %v3657_v8  ;;  %3637 = vmatprep.subr.bf16.mxu1 %v3657_v8  ;;  %v3701_v45 = vld [vmem:[%s5064_s0 + $0x43c] ss:$36 sps:$4 sm:$0xff]   ;;  %v3710_v46 = vld [vmem:[%s5063_s1 + $0x110] sm:$0xff]   ;;  %v3698_v47 = vld [vmem:[%s5063_s1 + $0xa8] sm:$0xff]  }
  0x11   :  { %v3705_v48 = vld [vmem:[%s5063_s1 + $0xf0] sm:$0xff]   ;;  %v3703_v49 = vld [vmem:[%s5064_s0 + $0xd8] ss:$36 sps:$4 sm:$0xff]   ;;  %v3711_v53 = vld [vmem:[%s5064_s0 + $0x124] ss:$36 sps:$4 sm:$0xff]  }
  0x12   :  { %v3704_v50 = vld [vmem:[%s5064_s0 + $0x438] ss:$36 sps:$4 sm:$0xff]   ;;  %v3706_v51 = vld [vmem:[%s5063_s1 + $0xb0] sm:$0xff]   ;;  %v3713_v58 = vld [vmem:[%s5064_s0 + $0x8] ss:$36 sps:$4 sm:$0xff]  }
  0x13   :  { %3122 = vmatpush3.bf16.msra.mxu0 %v3658_v9  ;;  %3645 = vmatpush3.bf16.msra.mxu1 %v3658_v9  ;;  %v3707_v52 = vld [vmem:[%s5063_s1 + $0xf8] sm:$0xff]   ;;  %v3715_v54 = vld [vmem:[%s5064_s0 + $0xc] ss:$36 sps:$4 sm:$0xff]   ;;  %v3716_v59 = vld [vmem:[%s5064_s0 + $0x120] ss:$36 sps:$4 sm:$0xff]  }
  0x14   :  { %3123 = vmatprep.subr.bf16.mxu0 %v3659_v10  ;;  %3638 = vmatprep.subr.bf16.mxu1 %v3659_v10  ;;  %v3725_v55 = vld [vmem:[%s5063_s1 + $0x158] sm:$0xff]   ;;  %v3717_v60 = vld [vmem:[%s5063_s1 + $0x1c0] sm:$0xff]   ;;  %v3719_v62 = vld [vmem:[%s5064_s0 + $0x16c] ss:$36 sps:$4 sm:$0xff]  }
  0x15   :  { %v3726_v56 = vld [vmem:[%s5063_s1 + $0x118] sm:$0xff]   ;;  %v3718_v61 = vld [vmem:[%s5063_s1 + $0x180] sm:$0xff]   ;;  %v3733_v1 = vld [vmem:[%s5063_s1 + $0x1c8] sm:$0xff]  }
  0x16   :  { %v3709_v57 = vld [vmem:[%s5063_s1 + $0xb8] sm:$0xff]   ;;  %v3735_v0 = vld [vmem:[%s5063_s1 + $0x160] sm:$0xff]   ;;  %v3734_v3 = vld [vmem:[%s5063_s1 + $0x188] sm:$0xff]  }
  0x17   :  { %3124 = vmatpush3.bf16.msra.mxu0 %v3660_v13  ;;  %3646 = vmatpush3.bf16.msra.mxu1 %v3660_v13  ;;  %v3721_v63 = vld [vmem:[%s5064_s0 + $0x54] ss:$36 sps:$4 sm:$0xff]   ;;  %v3736_v2 = vld [vmem:[%s5063_s1 + $0x120] sm:$0xff]   ;;  %v3723_v4 = vld [vmem:[%s5064_s0 + $0x168] ss:$36 sps:$4 sm:$0xff]  }
  0x18   :  { %3125 = vmatprep.subr.bf16.mxu0 %v3661_v14  ;;  %3639 = vmatprep.subr.bf16.mxu1 %v3661_v14  ;;  %v3724_v5 = vld [vmem:[%s5064_s0 + $0x50] ss:$36 sps:$4 sm:$0xff]   ;;  %v3729_v7 = vld [vmem:[%s5064_s0 + $0x9c] ss:$36 sps:$4 sm:$0xff]   ;;  %v3749_v8 = vld [vmem:[%s5063_s1 + $0x168] sm:$0xff]  }
  0x19   :  { %v3727_v6 = vld [vmem:[%s5064_s0 + $0x1b4] ss:$36 sps:$4 sm:$0xff]   ;;  %v3751_v10 = vld [vmem:[%s5063_s1 + $0x128] sm:$0xff]   ;;  %v3737_v14 = vld [vmem:[%s5064_s0 + $0x1fc] ss:$36 sps:$4 sm:$0xff]  }
  0x1a   :  { %v3750_v9 = vld [vmem:[%s5063_s1 + $0x1d0] sm:$0xff]   ;;  %v3732_v13 = vld [vmem:[%s5064_s0 + $0x98] ss:$36 sps:$4 sm:$0xff]  }
  0x1b   :  { %3126 = vmatpush3.bf16.msra.mxu0 %v3662_v15  ;;  %3647 = vmatpush3.bf16.msra.mxu1 %v3662_v15  ;;  %v3752_v11 = vld [vmem:[%s5063_s1 + $0x190] sm:$0xff]  }
  0x1c   :  { %3127 = vmatprep.subr.bf16.mxu0 %v3663_v16  ;;  %3640 = vmatprep.subr.bf16.mxu1 %v3663_v16  ;;  %v3731_v12 = vld [vmem:[%s5064_s0 + $0x1b0] ss:$36 sps:$4 sm:$0xff]  }
  0x1d   :  { %v3759_v15 = vld [vmem:[%s5063_s1 + $0x170] sm:$0xff]  }
  0x1e   :  { %v3760_v16 = vld [vmem:[%s5063_s1 + $0x130] sm:$0xff]  }
  0x1f   :  { %3128 = vmatpush3.bf16.msra.mxu0 %v3664_v17  ;;  %3648 = vmatpush3.bf16.msra.mxu1 %v3664_v17  ;;  %v3739_v17 = vld [vmem:[%s5064_s0 + $0xe4] ss:$36 sps:$4 sm:$0xff]  }
  0x20   :  { %3225 = vmatprep.subr.bf16.mxu1 %v3671_v18  ;;  %3337 = vmatprep.subr.bf16.mxu0 %v3674_v21  ;;  %v3767_v18 = vld [vmem:[%s5063_s1 + $0x1d8] sm:$0xff]   ;;  %v3742_v21 = vld [vmem:[%s5064_s0 + $0xe0] ss:$36 sps:$4 sm:$0xff]  }
  0x22   :  { %1591 = vmatmul.mubr.bf16.vlgmr.msra.gmra.mrb[0].mxu0 %v3665_v19  ;;  %1687 = vmatmul.mubr.bf16.vlgmr.msra.gmra.mrb[0].mxu1 %v3668_v20  ;;  %v3768_v19 = vld [vmem:[%s5063_s1 + $0x198] sm:$0xff]  }
  0x23   :  { %3226 = vmatpush3.bf16.msra.mxu1 %v3672_v22  ;;  %3338 = vmatpush3.bf16.msra.mxu0 %v3676_v24  ;;  %v3741_v20 = vld [vmem:[%s5064_s0 + $0x1f8] ss:$36 sps:$4 sm:$0xff]   ;;  %v3743_v22 = vld [vmem:[%s5064_s0 + $0x244] ss:$36 sps:$4 sm:$0xff]  }
  0x24   :  { %3227 = vmatprep.subr.bf16.mxu1 %v3673_v23  ;;  %1598 = vmatprep.mubr.bf16.mxu0 %v3677_v25  ;;  %v3745_v23 = vld [vmem:[%s5064_s0 + $0x12c] ss:$36 sps:$4 sm:$0xff]   ;;  %v3775_v24 = vld [vmem:[%s5063_s1 + $0x178] sm:$0xff]  }
  0x25   :  { %1694 = vmatprep.mubr.bf16.mxu1 %v3679_v26  ;;  %3339 = vmatprep.subr.bf16.mxu0 %v3694_v28  ;;  %v3776_v25 = vld [vmem:[%s5063_s1 + $0x138] sm:$0xff]   ;;  %v3783_v26 = vld [vmem:[%s5063_s1 + $0x1e0] sm:$0xff]  }
  0x26   :  { %v3784_v28 = vld [vmem:[%s5063_s1 + $0x1a0] sm:$0xff]  }
  0x27   :  { %3228 = vmatpush3.bf16.msra.mxu1 %v3675_v27  ;;  %3340 = vmatpush3.bf16.msra.mxu0 %v3696_v33  ;;  %v3747_v27 = vld [vmem:[%s5064_s0 + $0x240] ss:$36 sps:$4 sm:$0xff]   ;;  %v3798_v33 = vld [vmem:[%s5063_s1 + $0x1e8] sm:$0xff]  }
  0x28   :  { %3229 = vmatprep.subr.bf16.mxu1 %v3683_v31  ;;  %3341 = vmatprep.subr.bf16.mxu0 %v3708_v43  ;;  %v3753_v31 = vld [vmem:[%s5064_s0 + $0x28c] ss:$36 sps:$4 sm:$0xff]   ;;  %v3769_v43 = vld [vmem:[%s5064_s0 + $0x31c] ss:$36 sps:$4 sm:$0xff]  }
  0x2a   :  { %1599 = vmatmul.mubr.bf16.gmra.mrb[4].mxu0 %v3681_v29  ;;  %1695 = vmatmul.mubr.bf16.gmra.mrb[4].mxu1 %v3682_v30  ;;  %v3785_v29 = vld [vmem:[%s5063_s1 + $0x200] sm:$0xff]   ;;  %v3748_v30 = vld [vmem:[%s5064_s0 + $0x128] ss:$36 sps:$4 sm:$0xff]  }
  0x2b   :  { %3230 = vmatpush3.bf16.msra.mxu1 %v3684_v32  ;;  %1606 = vmatprep.mubr.bf16.mxu0 %v3687_v35  ;;  %v3755_v32 = vld [vmem:[%s5064_s0 + $0x174] ss:$36 sps:$4 sm:$0xff]   ;;  %v3799_v35 = vld [vmem:[%s5063_s1 + $0x1a8] sm:$0xff]  }
  0x2c   :  { %3231 = vmatprep.subr.bf16.mxu1 %v3685_v34  ;;  %1702 = vmatprep.mubr.bf16.mxu1 %v3689_v36  ;;  %v3757_v34 = vld [vmem:[%s5064_s0 + $0x288] ss:$36 sps:$4 sm:$0xff]   ;;  %v3758_v36 = vld [vmem:[%s5064_s0 + $0x170] ss:$36 sps:$4 sm:$0xff]  }
  0x2d   :  { %3342 = vmatpush3.bf16.msra.mxu0 %v3710_v46  ;;  %v3774_v46 = vld [vmem:[%s5064_s0 + $0x200] ss:$36 sps:$4 sm:$0xff]  }
  0x2e   :  { %3343 = vmatprep.subr.bf16.mxu0 %v3725_v55  ;;  %v3800_v55 = vld [vmem:[%s5063_s1 + $0x208] sm:$0xff]  }
  0x2f   :  { %3232 = vmatpush3.bf16.msra.mxu1 %v3686_v37  ;;  %v3761_v37 = vld [vmem:[%s5064_s0 + $0x2d4] ss:$36 sps:$4 sm:$0xff]  }
  0x30   :  { %3233 = vmatprep.subr.bf16.mxu1 %v3693_v40  ;;  %v3766_v40 = vld [vmem:[%s5064_s0 + $0x1b8] ss:$36 sps:$4 sm:$0xff]  }
  0x31   :  { %3344 = vmatpush3.bf16.msra.mxu0 %v3726_v56  ;;  %v3815_v56 = vld [vmem:[%s5063_s1 + $0x210] sm:$0xff]  }
  0x32   :  { %1607 = vmatmul.mubr.bf16.gmra.mrb[8].mxu0 %v3691_v38  ;;  %1703 = vmatmul.mubr.bf16.gmra.mrb[8].mxu1 %v3692_v39  ;;  %v3763_v38 = vld [vmem:[%s5064_s0 + $0x1bc] ss:$36 sps:$4 sm:$0xff]   ;;  %v3765_v39 = vld [vmem:[%s5064_s0 + $0x2d0] ss:$36 sps:$4 sm:$0xff]  }
  0x33   :  { %3234 = vmatpush3.bf16.msra.mxu1 %v3695_v41  ;;  %1614 = vmatprep.mubr.bf16.mxu0 %v3699_v44  ;;  %v3813_v41 = vld [vmem:[%s5063_s1 + $0x1f0] sm:$0xff]   ;;  %v3771_v44 = vld [vmem:[%s5064_s0 + $0x204] ss:$36 sps:$4 sm:$0xff]  }
  0x34   :  { %3235 = vmatprep.subr.bf16.mxu1 %v3697_v42  ;;  %1710 = vmatprep.mubr.bf16.mxu1 %v3701_v45  ;;  %v3814_v42 = vld [vmem:[%s5063_s1 + $0x1b0] sm:$0xff]   ;;  %v3773_v45 = vld [vmem:[%s5064_s0 + $0x318] ss:$36 sps:$4 sm:$0xff]  }
  0x35   :  { %3345 = vmatprep.subr.bf16.mxu0 %v3735_v0  ;;  %v3797_v0 = vld [vmem:[%s5064_s0 + $0xa0] ss:$36 sps:$4 sm:$0xff]  }
  0x36   :  { %3346 = vmatpush3.bf16.msra.mxu0 %v3736_v2  ;;  %v3803_v2 = vld [vmem:[%s5064_s0 + $0xec] ss:$36 sps:$4 sm:$0xff]  }
  0x37   :  { %3236 = vmatpush3.bf16.msra.mxu1 %v3698_v47  ;;  %3347 = vmatprep.subr.bf16.mxu0 %v3749_v8  ;;  %v3828_v47 = vld [vmem:[%s5063_s1 + $0x1f8] sm:$0xff]  }
  0x38   :  { %3237 = vmatprep.subr.bf16.mxu1 %v3705_v48  ;;  %v3829_v48 = vld [vmem:[%s5063_s1 + $0x1b8] sm:$0xff]  }
  0x39   :  { %v3809_v8 = vld [vmem:[%s5064_s0 + $0x134] ss:$36 sps:$4 sm:$0xff]  }
  0x3a   :  { %1615 = vmatmul.mubr.bf16.gmra.mrb[12].mxu0 %v3703_v49  ;;  %1711 = vmatmul.mubr.bf16.gmra.mrb[12].mxu1 %v3704_v50  ;;  %v3777_v49 = vld [vmem:[%s5064_s0 + $0x24c] ss:$36 sps:$4 sm:$0xff]   ;;  %v3781_v50 = vld [vmem:[%s5064_s0 + $0x14] ss:$36 sps:$4 sm:$0xff]  }
  0x3b   :  { %3238 = vmatpush3.bf16.msra.mxu1 %v3706_v51  ;;  %1622 = vmatprep.mubr.bf16.mxu0 %v3711_v53  ;;  %v3779_v51 = vld [vmem:[%s5064_s0 + $0x10] ss:$36 sps:$4 sm:$0xff]  }
  0x3c   :  { %3239 = vmatprep.subr.bf16.mxu1 %v3707_v52  ;;  %1751 = vmatprep.mubr.bf16.mxu1 %v3715_v54  ;;  %v3782_v52 = vld [vmem:[%s5064_s0 + $0x248] ss:$36 sps:$4 sm:$0xff]   ;;  %v3786_v53 = vld [vmem:[%s5064_s0 + $0x294] ss:$36 sps:$4 sm:$0xff]   ;;  %v3788_v54 = vld [vmem:[%s5064_s0 + $0x5c] ss:$36 sps:$4 sm:$0xff]  }
  0x3d   :  { %3348 = vmatpush3.bf16.msra.mxu0 %v3751_v10  ;;  %v3811_v10 = vld [vmem:[%s5064_s0 + $0x368] ss:$36 sps:$4 sm:$0xff]  }
  0x3e   :  { %3349 = vmatprep.subr.bf16.mxu0 %v3759_v15  ;;  %v3821_v15 = vld [vmem:[%s5064_s0 + $0x178] ss:$36 sps:$4 sm:$0xff]  }
  0x3f   :  { %3240 = vmatpush3.bf16.msra.mxu1 %v3709_v57  ;;  %v3790_v57 = vld [vmem:[%s5064_s0 + $0x290] ss:$36 sps:$4 sm:$0xff]  }
  0x40   :  { %3449 = vmatprep.subr.bf16.mxu1 %v3717_v60  ;;  %v3794_v60 = vld [vmem:[%s5064_s0 + $0xa4] ss:$36 sps:$4 sm:$0xff]  }
  0x41   :  { %3350 = vmatpush3.bf16.msra.mxu0 %v3760_v16  ;;  %v3822_v16 = vld [vmem:[%s5064_s0 + $0x3fc] ss:$36 sps:$4 sm:$0xff]  }
  0x42   :  { %1623 = vmatmul.mubr.bf16.gmra.mrb[16].mxu0 %v3716_v59  ;;  %1752 = vmatmul.mubr.bf16.vlgmr.msra.gmra.mrb[16].mxu1 %v3713_v58  ;;  %v3791_v58 = vld [vmem:[%s5064_s0 + $0x58] ss:$36 sps:$4 sm:$0xff]  }
  0x43   :  { %3450 = vmatpush3.bf16.msra.mxu1 %v3718_v61  ;;  %1630 = vmatprep.mubr.bf16.mxu0 %v3719_v62  ;;  %v3792_v59 = vld [vmem:[%s5064_s0 + $0x2dc] ss:$36 sps:$4 sm:$0xff]  }
  0x44   :  { %1759 = vmatprep.mubr.bf16.mxu1 %v3721_v63  ;;  %3451 = vmatprep.subr.bf16.mxu1 %v3733_v1  ;;  %v3830_v61 = vld [vmem:[%s5063_s1 + $0x218] sm:$0xff]   ;;  %v3843_v62 = vld [vmem:[%s5063_s1 + $0x220] sm:$0xff]  }
  0x45   :  { %3351 = vmatprep.subr.bf16.mxu0 %v3775_v24  ;;  %v3796_v63 = vld [vmem:[%s5064_s0 + $0x2d8] ss:$36 sps:$4 sm:$0xff]   ;;  %v3801_v1 = vld [vmem:[%s5064_s0 + $0x324] ss:$36 sps:$4 sm:$0xff]  }
  0x46   :  { %3352 = vmatpush3.bf16.msra.mxu0 %v3776_v25  ;;  %v3837_v24 = vld [vmem:[%s5064_s0 + $0x254] ss:$36 sps:$4 sm:$0xff]   ;;  %v3841_v25 = vld [vmem:[%s5064_s0 + $0x1c] ss:$36 sps:$4 sm:$0xff]  }
  0x47   :  { %3452 = vmatpush3.bf16.msra.mxu1 %v3734_v3  ;;  %3585 = vmatprep.subr.bf16.mxu0 %v3785_v29  ;;  %v3856_v3 = vld [vmem:[%s5063_s1 + $0x228] sm:$0xff]  }
  0x48   :  { %3453 = vmatprep.subr.bf16.mxu1 %v3750_v9  ;;  %v3882_v9 = vld [vmem:[%s5063_s1 + $0x238] sm:$0xff]  }
  0x4a   :  { %1631 = vmatmul.mubr.bf16.gmra.mrb[20].mxu0 %v3723_v4  ;;  %1760 = vmatmul.mubr.bf16.gmra.mrb[20].mxu1 %v3724_v5  ;;  %v3805_v4 = vld [vmem:[%s5064_s0 + $0x320] ss:$36 sps:$4 sm:$0xff]   ;;  %v3806_v5 = vld [vmem:[%s5064_s0 + $0xe8] ss:$36 sps:$4 sm:$0xff]  }
  0x4b   :  { %1638 = vmatprep.mubr.bf16.mxu0 %v3727_v6  ;;  %1767 = vmatprep.mubr.bf16.mxu1 %v3729_v7  ;;  %v3869_v6 = vld [vmem:[%s5063_s1 + $0x230] sm:$0xff]  }
  0x4c   :  { %3454 = vmatpush3.bf16.msra.mxu1 %v3752_v11  ;;  %v3807_v7 = vld [vmem:[%s5064_s0 + $0x36c] ss:$36 sps:$4 sm:$0xff]  }
  0x4d   :  { %3455 = vmatprep.subr.bf16.mxu1 %v3767_v18  ;;  %v3812_v11 = vld [vmem:[%s5064_s0 + $0x130] ss:$36 sps:$4 sm:$0xff]   ;;  %v3826_v18 = vld [vmem:[%s5064_s0 + $0x3f8] ss:$36 sps:$4 sm:$0xff]  }
  0x50   :  { %3456 = vmatpush3.bf16.msra.mxu1 %v3768_v19  ;;  %v3827_v19 = vld [vmem:[%s5064_s0 + $0x1c0] ss:$36 sps:$4 sm:$0xff]  }
  0x51   :  { %3457 = vmatprep.subr.bf16.mxu1 %v3783_v26  ;;  %v3839_v26 = vld [vmem:[%s5064_s0 + $0x18] ss:$36 sps:$4 sm:$0xff]  }
  0x52   :  { %1639 = vmatmul.mubr.bf16.gmra.mrb[24].mxu0 %v3731_v12  ;;  %1768 = vmatmul.mubr.bf16.gmra.mrb[24].mxu1 %v3732_v13  ;;  %v3816_v12 = vld [vmem:[%s5064_s0 + $0x3b4] ss:$36 sps:$4 sm:$0xff]   ;;  %v3818_v13 = vld [vmem:[%s5064_s0 + $0x17c] ss:$36 sps:$4 sm:$0xff]  }
  0x53   :  { %1646 = vmatprep.mubr.bf16.mxu0 %v3737_v14  ;;  %1775 = vmatprep.mubr.bf16.mxu1 %v3739_v17  ;;  %v3820_v14 = vld [vmem:[%s5064_s0 + $0x3b0] ss:$36 sps:$4 sm:$0xff]   ;;  %v3824_v17 = vld [vmem:[%s5064_s0 + $0x1c4] ss:$36 sps:$4 sm:$0xff]  }
  0x54   :  { %3458 = vmatpush3.bf16.msra.mxu1 %v3784_v28  ;;  %v3844_v28 = vld [vmem:[%s5064_s0 + $0x29c] ss:$36 sps:$4 sm:$0xff]  }
  0x55   :  { %3459 = vmatprep.subr.bf16.mxu1 %v3798_v33  ;;  %v3852_v33 = vld [vmem:[%s5064_s0 + $0xac] ss:$36 sps:$4 sm:$0xff]  }
  0x58   :  { %3460 = vmatpush3.bf16.msra.mxu1 %v3799_v35  ;;  %v3855_v35 = vld [vmem:[%s5064_s0 + $0xa8] ss:$36 sps:$4 sm:$0xff]  }
  0x59   :  { %3461 = vmatprep.subr.bf16.mxu1 %v3813_v41  ;;  %v3865_v41 = vld [vmem:[%s5064_s0 + $0x13c] ss:$36 sps:$4 sm:$0xff]  }
  0x5a   :  { %1647 = vmatmul.mubr.bf16.gmra.mrb[28].mxu0 %v3741_v20  ;;  %1776 = vmatmul.mubr.bf16.gmra.mrb[28].mxu1 %v3742_v21  ;;  %v3831_v20 = vld [vmem:[%s5064_s0 + $0x444] ss:$36 sps:$4 sm:$0xff]   ;;  %v3833_v21 = vld [vmem:[%s5064_s0 + $0x20c] ss:$36 sps:$4 sm:$0xff]  }
  0x5b   :  { %1654 = vmatprep.mubr.bf16.mxu0 %v3743_v22  ;;  %1783 = vmatprep.mubr.bf16.mxu1 %v3745_v23  ;;  %v3835_v22 = vld [vmem:[%s5064_s0 + $0x440] ss:$36 sps:$4 sm:$0xff]   ;;  %v3836_v23 = vld [vmem:[%s5064_s0 + $0x208] ss:$36 sps:$4 sm:$0xff]  }
  0x5c   :  { %3462 = vmatpush3.bf16.msra.mxu1 %v3814_v42  ;;  %v3867_v42 = vld [vmem:[%s5064_s0 + $0x370] ss:$36 sps:$4 sm:$0xff]  }
  0x5d   :  { %3463 = vmatprep.subr.bf16.mxu1 %v3828_v47  ;;  %v3875_v47 = vld [vmem:[%s5064_s0 + $0x180] ss:$36 sps:$4 sm:$0xff]  }
  0x60   :  { %3464 = vmatpush3.bf16.msra.mxu1 %v3829_v48  ;;  %v3876_v48 = vld [vmem:[%s5064_s0 + $0x404] ss:$36 sps:$4 sm:$0xff]  }
  0x62   :  { %1655 = vmatmul.mubr.bf16.gmra.mrb[32].mxu0 %v3747_v27  ;;  %1784 = vmatmul.mubr.bf16.gmra.mrb[32].mxu1 %v3748_v30  ;;  %v3842_v27 = vld [vmem:[%s5064_s0 + $0x250] ss:$36 sps:$4 sm:$0xff]   ;;  %v3848_v30 = vld [vmem:[%s5064_s0 + $0x298] ss:$36 sps:$4 sm:$0xff]  }
  0x63   :  { %1662 = vmatprep.mubr.bf16.mxu0 %v3753_v31  ;;  %1791 = vmatprep.mubr.bf16.mxu1 %v3755_v32  ;;  %v3849_v31 = vld [vmem:[%s5064_s0 + $0x60] ss:$36 sps:$4 sm:$0xff]  }
  0x64   :  { %v3850_v32 = vld [vmem:[%s5064_s0 + $0x2e4] ss:$36 sps:$4 sm:$0xff]  }
  0x6a   :  { %1663 = vmatmul.mubr.bf16.gmra.mrb[36].mxu0 %v3757_v34  ;;  %1792 = vmatmul.mubr.bf16.gmra.mrb[36].mxu1 %v3758_v36  ;;  %v3854_v34 = vld [vmem:[%s5064_s0 + $0x2e0] ss:$36 sps:$4 sm:$0xff]   ;;  %v3857_v36 = vld [vmem:[%s5064_s0 + $0x32c] ss:$36 sps:$4 sm:$0xff]  }
  0x6b   :  { %1670 = vmatprep.mubr.bf16.mxu0 %v3761_v37  ;;  %1799 = vmatprep.mubr.bf16.mxu1 %v3763_v38  ;;  %v3859_v37 = vld [vmem:[%s5064_s0 + $0xf4] ss:$36 sps:$4 sm:$0xff]   ;;  %v3861_v38 = vld [vmem:[%s5064_s0 + $0x328] ss:$36 sps:$4 sm:$0xff]  }
  0x72   :  { %1671 = vmatmul.mubr.bf16.gmra.mrb[40].mxu0 %v3765_v39  ;;  %1800 = vmatmul.mubr.bf16.gmra.mrb[40].mxu1 %v3766_v40  ;;  %v3862_v39 = vld [vmem:[%s5064_s0 + $0xf0] ss:$36 sps:$4 sm:$0xff]  }
  0x73   :  { %1678 = vmatprep.mubr.bf16.mxu0 %v3769_v43  ;;  %1807 = vmatprep.mubr.bf16.mxu1 %v3771_v44  ;;  %v3863_v40 = vld [vmem:[%s5064_s0 + $0x374] ss:$36 sps:$4 sm:$0xff]   ;;  %v3870_v44 = vld [vmem:[%s5064_s0 + $0x3bc] ss:$36 sps:$4 sm:$0xff]  }
  0x74   :  { %v3868_v43 = vld [vmem:[%s5064_s0 + $0x138] ss:$36 sps:$4 sm:$0xff]  }
  0x7a   :  { %1679 = vmatmul.mubr.bf16.gmra.mrb[44].mxu0 %v3773_v45  ;;  %1808 = vmatmul.mubr.bf16.gmra.mrb[44].mxu1 %v3774_v46  ;;  %v3872_v45 = vld [vmem:[%s5064_s0 + $0x184] ss:$36 sps:$4 sm:$0xff]   ;;  %v3874_v46 = vld [vmem:[%s5064_s0 + $0x3b8] ss:$36 sps:$4 sm:$0xff]  }
  0x7b   :  { %1815 = vmatprep.mubr.bf16.mxu1 %v3777_v49  ;;  %1912 = vmatprep.mubr.bf16.mxu0 %v3781_v50  ;;  %v3878_v49 = vld [vmem:[%s5064_s0 + $0x1cc] ss:$36 sps:$4 sm:$0xff]   ;;  %v3880_v50 = vld [vmem:[%s5064_s0 + $0x400] ss:$36 sps:$4 sm:$0xff]  }
  0x82   :  { %1816 = vmatmul.mubr.bf16.gmra.mrb[48].mxu1 %v3782_v52  ;;  %1913 = vmatmul.mubr.bf16.vlgmr.msra.gmra.mrb[48].mxu0 %v3779_v51  ;;  %v3881_v51 = vld [vmem:[%s5064_s0 + $0x1c8] ss:$36 sps:$4 sm:$0xff]  }
  0x83   :  { %3586 = vmatpush3.bf16.msra.mxu0 %v3785_v29  ;;  %1823 = vmatprep.mubr.bf16.mxu1 %v3786_v53  ;;  %v3846_v29 = vld [vmem:[%s5064_s0 + $0x64] ss:$36 sps:$4 sm:$0xff]   ;;  %v3883_v52 = vld [vmem:[%s5064_s0 + $0x44c] ss:$36 sps:$4 sm:$0xff]   ;;  %v3885_v53 = vld [vmem:[%s5064_s0 + $0x214] ss:$36 sps:$4 sm:$0xff]  }
  0x84   :  { %1920 = vmatprep.mubr.bf16.mxu0 %v3788_v54  ;;  %3587 = vmatprep.subr.bf16.mxu0 %v3800_v55 }
  0x87   :  { %3588 = vmatpush3.bf16.msra.mxu0 %v3800_v55 }
  0x88   :  { %3589 = vmatprep.subr.bf16.mxu0 %v3815_v56 }
  0x8a   :  { %1824 = vmatmul.mubr.bf16.gmra.mrb[52].mxu1 %v3790_v57  ;;  %1921 = vmatmul.mubr.bf16.gmra.mrb[52].mxu0 %v3791_v58  ;;  %v3887_v58 = vld [vmem:[%s5064_s0 + $0x448] ss:$36 sps:$4 sm:$0xff]  }
  0x8b   :  { %1831 = vmatprep.mubr.bf16.mxu1 %v3792_v59  ;;  %1928 = vmatprep.mubr.bf16.mxu0 %v3794_v60  ;;  %v3888_v59 = vld [vmem:[%s5064_s0 + $0x210] ss:$36 sps:$4 sm:$0xff]  }
  0x8c   :  { %3590 = vmatpush3.bf16.msra.mxu0 %v3815_v56 }
  0x8d   :  { %3591 = vmatprep.subr.bf16.mxu0 %v3830_v61 }
  0x90   :  { %3592 = vmatpush3.bf16.msra.mxu0 %v3830_v61 }
  0x91   :  { %3593 = vmatprep.subr.bf16.mxu0 %v3843_v62 }
  0x92   :  { %1832 = vmatmul.mubr.bf16.gmra.mrb[56].mxu1 %v3796_v63  ;;  %1929 = vmatmul.mubr.bf16.gmra.mrb[56].mxu0 %v3797_v0  ;;  %v3889_v0 = vld [vmem:[%s5064_s0 + $0x25c] ss:$36 sps:$4 sm:$0xff]  }
  0x93   :  { %1839 = vmatprep.mubr.bf16.mxu1 %v3801_v1  ;;  %1936 = vmatprep.mubr.bf16.mxu0 %v3803_v2  ;;  %v3891_v1 = vld [vmem:[%s5064_s0 + $0x20] ss:$36 sps:$4 sm:$0xff]  }
  0x94   :  { %3594 = vmatpush3.bf16.msra.mxu0 %v3843_v62 }
  0x95   :  { %3595 = vmatprep.subr.bf16.mxu0 %v3856_v3 }
  0x98   :  { %3596 = vmatpush3.bf16.msra.mxu0 %v3856_v3 }
  0x99   :  { %3597 = vmatprep.subr.bf16.mxu0 %v3869_v6 }
  0x9a   :  { %1840 = vmatmul.mubr.bf16.gmra.mrb[60].mxu1 %v3805_v4  ;;  %1937 = vmatmul.mubr.bf16.gmra.mrb[60].mxu0 %v3806_v5 }
  0x9b   :  { %1847 = vmatprep.mubr.bf16.mxu1 %v3807_v7  ;;  %1944 = vmatprep.mubr.bf16.mxu0 %v3809_v8 }
  0x9c   :  { %3598 = vmatpush3.bf16.msra.mxu0 %v3869_v6 }
  0x9d   :  { %3599 = vmatprep.subr.bf16.mxu0 %v3882_v9 }
  0xa0   :  { %3600 = vmatpush3.bf16.msra.mxu0 %v3882_v9 }
  0xa2   :  { %1848 = vmatmul.mubr.bf16.gmra.mrb[64].mxu1 %v3811_v10  ;;  %1945 = vmatmul.mubr.bf16.gmra.mrb[64].mxu0 %v3812_v11  ;;  %v3892_v10 = vld [vmem:[%s5064_s0 + $0x258] ss:$36 sps:$4 sm:$0xff]   ;;  %v3893_v11 = vld [vmem:[%s5064_s0 + $0x68] ss:$36 sps:$4 sm:$0xff]  }
  0xa3   :  { %1855 = vmatprep.mubr.bf16.mxu1 %v3816_v12  ;;  %1952 = vmatprep.mubr.bf16.mxu0 %v3818_v13 }
  0xaa   :  { %1856 = vmatmul.mubr.bf16.gmra.mrb[68].mxu1 %v3820_v14  ;;  %1953 = vmatmul.mubr.bf16.gmra.mrb[68].mxu0 %v3821_v15 }
  0xab   :  { %1863 = vmatprep.mubr.bf16.mxu1 %v3822_v16  ;;  %1960 = vmatprep.mubr.bf16.mxu0 %v3824_v17  ;;  %v3894_v16 = vld [vmem:[%s5064_s0 + $0x2a4] ss:$36 sps:$4 sm:$0xff]   ;;  %v3896_v17 = vld [vmem:[%s5064_s0 + $0xb0] ss:$36 sps:$4 sm:$0xff]  }
  0xb2   :  { %1864 = vmatmul.mubr.bf16.gmra.mrb[72].mxu1 %v3826_v18  ;;  %1961 = vmatmul.mubr.bf16.gmra.mrb[72].mxu0 %v3827_v19 }
  0xb3   :  { %1871 = vmatprep.mubr.bf16.mxu1 %v3831_v20  ;;  %1968 = vmatprep.mubr.bf16.mxu0 %v3833_v21 }
  0xba   :  { %1872 = vmatmul.mubr.bf16.gmra.mrb[76].mxu1 %v3835_v22  ;;  %1969 = vmatmul.mubr.bf16.gmra.mrb[76].mxu0 %v3836_v23 }
  0xbb   :  { %1976 = vmatprep.mubr.bf16.mxu0 %v3837_v24  ;;  %2073 = vmatprep.mubr.bf16.mxu1 %v3841_v25 }
  0xc2   :  { %1977 = vmatmul.mubr.bf16.gmra.mrb[80].mxu0 %v3842_v27  ;;  %2074 = vmatmul.mubr.bf16.vlgmr.msra.gmra.mrb[80].mxu1 %v3839_v26  ;;  %v3897_v26 = vld [vmem:[%s5064_s0 + $0x2a0] ss:$36 sps:$4 sm:$0xff]   ;;  %v3898_v27 = vld [vmem:[%s5064_s0 + $0xf8] ss:$36 sps:$4 sm:$0xff]  }
  0xc3   :  { %1984 = vmatprep.mubr.bf16.mxu0 %v3844_v28  ;;  %2081 = vmatprep.mubr.bf16.mxu1 %v3846_v29 }
  0xca   :  { %1985 = vmatmul.mubr.bf16.gmra.mrb[84].mxu0 %v3848_v30  ;;  %2082 = vmatmul.mubr.bf16.gmra.mrb[84].mxu1 %v3849_v31 }
  0xcb   :  { %1992 = vmatprep.mubr.bf16.mxu0 %v3850_v32  ;;  %2089 = vmatprep.mubr.bf16.mxu1 %v3852_v33  ;;  %v3899_v32 = vld [vmem:[%s5064_s0 + $0x2ec] ss:$36 sps:$4 sm:$0xff]   ;;  %v3901_v33 = vld [vmem:[%s5064_s0 + $0x140] ss:$36 sps:$4 sm:$0xff]  }
  0xd2   :  { %1993 = vmatmul.mubr.bf16.gmra.mrb[88].mxu0 %v3854_v34  ;;  %2090 = vmatmul.mubr.bf16.gmra.mrb[88].mxu1 %v3855_v35 }
  0xd3   :  { %2000 = vmatprep.mubr.bf16.mxu0 %v3857_v36  ;;  %2097 = vmatprep.mubr.bf16.mxu1 %v3859_v37 }
  0xda   :  { %2001 = vmatmul.mubr.bf16.gmra.mrb[92].mxu0 %v3861_v38  ;;  %2098 = vmatmul.mubr.bf16.gmra.mrb[92].mxu1 %v3862_v39 }
  0xdb   :  { %2008 = vmatprep.mubr.bf16.mxu0 %v3863_v40  ;;  %2105 = vmatprep.mubr.bf16.mxu1 %v3865_v41 }
  0xe2   :  { %2009 = vmatmul.mubr.bf16.gmra.mrb[96].mxu0 %v3867_v42  ;;  %2106 = vmatmul.mubr.bf16.gmra.mrb[96].mxu1 %v3868_v43  ;;  %v3902_v42 = vld [vmem:[%s5064_s0 + $0x2e8] ss:$36 sps:$4 sm:$0xff]  }
  0xe3   :  { %2016 = vmatprep.mubr.bf16.mxu0 %v3870_v44  ;;  %2113 = vmatprep.mubr.bf16.mxu1 %v3872_v45  ;;  %v3903_v43 = vld [vmem:[%s5064_s0 + $0x188] ss:$36 sps:$4 sm:$0xff]  }
  0xea   :  { %2017 = vmatmul.mubr.bf16.gmra.mrb[100].mxu0 %v3874_v46  ;;  %2114 = vmatmul.mubr.bf16.gmra.mrb[100].mxu1 %v3875_v47 }
  0xeb   :  { %2024 = vmatprep.mubr.bf16.mxu0 %v3876_v48  ;;  %2121 = vmatprep.mubr.bf16.mxu1 %v3878_v49  ;;  %v3904_v48 = vld [vmem:[%s5064_s0 + $0x334] ss:$36 sps:$4 sm:$0xff]  }
  0xec   :  { %v3906_v49 = vld [vmem:[%s5064_s0 + $0x1d0] ss:$36 sps:$4 sm:$0xff]  }
  0xf2   :  { %2025 = vmatmul.mubr.bf16.gmra.mrb[104].mxu0 %v3880_v50  ;;  %2122 = vmatmul.mubr.bf16.gmra.mrb[104].mxu1 %v3881_v51 }
  0xf3   :  { %2032 = vmatprep.mubr.bf16.mxu0 %v3883_v52  ;;  %2129 = vmatprep.mubr.bf16.mxu1 %v3885_v53 }
  0xf5   :  { %v3201_v54 = vpop.f32.mrb[0].mxu1  ;;  %v3129_v55 = vpop.f32.mrb[0].mxu0 }
  0xf6   :  { %v3202_v56 = vpop.f32.mrb[1].mxu1  ;;  %v3130_v57 = vpop.f32.mrb[1].mxu0 }
  0xf7   :  { %v4506_v60 = vadd.f32 %v3202_v56, %v3201_v54  ;;  %v3204_v61 = vpop.f32.mrb[2].mxu1  ;;  %v4508_v62 = vadd.f32 %v3130_v57, %v3129_v55  ;;  %v3132_v63 = vpop.f32.mrb[2].mxu0 }
  0xf8   :  { %v3205_v2 = vpop.f32.mrb[3].mxu1  ;;  %v3133_v3 = vpop.f32.mrb[3].mxu0 }
  0xf9   :  { %v4516_v4 = vadd.f32 %v3205_v2, %v3204_v61  ;;  %v4518_v5 = vadd.f32 %v3133_v3, %v3132_v63  ;;  %v3909_v2 = vld [vmem:[%s5064_s0 + $0x37c] ss:$36 sps:$4 sm:$0xff]  }
  0xfa   :  { %2033 = vmatmul.mubr.bf16.gmra.mrb[108].mxu0 %v3887_v58  ;;  %2130 = vmatmul.mubr.bf16.gmra.mrb[108].mxu1 %v3888_v59  ;;  %v3907_v58 = vld [vmem:[%s5064_s0 + $0x330] ss:$36 sps:$4 sm:$0xff]   ;;  %v3908_v59 = vld [vmem:[%s5064_s0 + $0x218] ss:$36 sps:$4 sm:$0xff]   ;;  %v3911_v3 = vld [vmem:[%s5064_s0 + $0x260] ss:$36 sps:$4 sm:$0xff]  }
  0xfb   :  { %2137 = vmatprep.mubr.bf16.mxu1 %v3889_v0  ;;  %3601 = vmatprep.mubr.bf16.mxu0 %v3891_v1 }
  0xfd   :  { %v3207_v6 = vpop.f32.mrb[4].mxu1  ;;  %v3135_v7 = vpop.f32.mrb[4].mxu0 }
  0xfe   :  { %v3208_v8 = vpop.f32.mrb[5].mxu1  ;;  %v3136_v9 = vpop.f32.mrb[5].mxu0 }
  0xff   :  { %v4526_v12 = vadd.f32 %v3208_v8, %v3207_v6  ;;  %v3210_v13 = vpop.f32.mrb[6].mxu1  ;;  %v4528_v14 = vadd.f32 %v3136_v9, %v3135_v7  ;;  %v3138_v15 = vpop.f32.mrb[6].mxu0 }
 0x100   :  { %v3211_v18 = vpop.f32.mrb[7].mxu1  ;;  %v3139_v19 = vpop.f32.mrb[7].mxu0 }
 0x101   :  { %v4536_v20 = vadd.f32 %v3211_v18, %v3210_v13  ;;  %v4538_v21 = vadd.f32 %v3139_v19, %v3138_v15  ;;  %v3912_v18 = vld [vmem:[%s5064_s0 + $0x378] ss:$36 sps:$4 sm:$0xff]  }
 0x102   :  { %2138 = vmatmul.mubr.bf16.gmra.mrb[112].mxu1 %v3892_v10  ;;  %3602 = vmatmul.mubr.bf16.vlgmr.msra.gmra.mrb[112].mxu0 %v3893_v11 }
 0x103   :  { %2145 = vmatprep.mubr.bf16.mxu1 %v3894_v16  ;;  %3605 = vmatprep.mubr.bf16.mxu0 %v3896_v17 }
 0x105   :  { %v3213_v22 = vpop.f32.mrb[8].mxu1  ;;  %v3141_v23 = vpop.f32.mrb[8].mxu0 }
 0x106   :  { %v3214_v24 = vpop.f32.mrb[9].mxu1  ;;  %v3142_v25 = vpop.f32.mrb[9].mxu0 }
 0x107   :  { %v4546_v28 = vadd.f32 %v3214_v24, %v3213_v22  ;;  %v3216_v29 = vpop.f32.mrb[10].mxu1  ;;  %v4548_v30 = vadd.f32 %v3142_v25, %v3141_v23  ;;  %v3144_v31 = vpop.f32.mrb[10].mxu0  ;;  %v3914_v24 = vld [vmem:[%s5064_s0 + $0x3c4] ss:$36 sps:$4 sm:$0xff]   ;;  %v3916_v25 = vld [vmem:[%s5064_s0 + $0x2f0] ss:$36 sps:$4 sm:$0xff]  }
 0x108   :  { %v3217_v34 = vpop.f32.mrb[11].mxu1  ;;  %v3145_v35 = vpop.f32.mrb[11].mxu0 }
 0x109   :  { %v4556_v36 = vadd.f32 %v3217_v34, %v3216_v29  ;;  %v4558_v37 = vadd.f32 %v3145_v35, %v3144_v31 }
 0x10a   :  { %2146 = vmatmul.mubr.bf16.gmra.mrb[116].mxu1 %v3897_v26  ;;  %3606 = vmatmul.mubr.bf16.gmra.mrb[116].mxu0 %v3898_v27 }
 0x10b   :  { %2153 = vmatprep.mubr.bf16.mxu1 %v3899_v32  ;;  %3609 = vmatprep.mubr.bf16.mxu0 %v3901_v33 }
 0x10d   :  { %v3219_v38 = vpop.f32.mrb[12].mxu1  ;;  %v3147_v39 = vpop.f32.mrb[12].mxu0 }
 0x10e   :  { %v3220_v40 = vpop.f32.mrb[13].mxu1  ;;  %v3148_v41 = vpop.f32.mrb[13].mxu0 }
 0x10f   :  { %v4566_v44 = vadd.f32 %v3220_v40, %v3219_v38  ;;  %v3222_v45 = vpop.f32.mrb[14].mxu1  ;;  %v4568_v46 = vadd.f32 %v3148_v41, %v3147_v39  ;;  %v3150_v47 = vpop.f32.mrb[14].mxu0  ;;  %v3917_v40 = vld [vmem:[%s5064_s0 + $0x3c0] ss:$36 sps:$4 sm:$0xff]  }
 0x110   :  { %v3223_v50 = vpop.f32.mrb[15].mxu1  ;;  %v3151_v51 = vpop.f32.mrb[15].mxu0 }
 0x111   :  { %v4576_v52 = vadd.f32 %v3223_v50, %v3222_v45  ;;  %v4578_v53 = vadd.f32 %v3151_v51, %v3150_v47  ;;  %v3919_v45 = vld [vmem:[%s5064_s0 + $0x40c] ss:$36 sps:$4 sm:$0xff]   ;;  %v3921_v47 = vld [vmem:[%s5064_s0 + $0x380] ss:$36 sps:$4 sm:$0xff]  }
 0x112   :  { %2154 = vmatmul.mubr.bf16.gmra.mrb[120].mxu1 %v3902_v42  ;;  %3610 = vmatmul.mubr.bf16.gmra.mrb[120].mxu0 %v3903_v43 }
 0x113   :  { %2161 = vmatprep.mubr.bf16.mxu1 %v3904_v48  ;;  %3613 = vmatprep.mubr.bf16.mxu0 %v3906_v49 }
 0x115   :  { %v3241_v54 = vpop.f32.mrb[16].mxu1  ;;  %v3153_v55 = vpop.f32.mrb[16].mxu0 }
 0x116   :  { %v3242_v56 = vpop.f32.mrb[17].mxu1  ;;  %v3154_v57 = vpop.f32.mrb[17].mxu0 }
 0x117   :  { %v3243_v61 = vadd.f32 %v3242_v56, %v3241_v54  ;;  %v3244_v63 = vpop.f32.mrb[18].mxu1  ;;  %v4586_v0 = vadd.f32 %v3154_v57, %v3153_v55  ;;  %v3156_v1 = vpop.f32.mrb[18].mxu0 }
 0x118   :  { %v3245_v6 = vpop.f32.mrb[19].mxu1  ;;  %v3157_v7 = vpop.f32.mrb[19].mxu0 }
 0x119   :  { %v4595_v8 = vadd.f32 %v3243_v61, %v4508_v62  ;;  %v3246_v9 = vadd.f32 %v3245_v6, %v3244_v63  ;;  %v4597_v10 = vadd.f32 %v3157_v7, %v3156_v1  ;;  %v3913_v62 = vld [vmem:[%s5064_s0 + $0x2a8] ss:$36 sps:$4 sm:$0xff]   ;;  %v3926_v6 = vld [vmem:[%s5064_s0 + $0x410] ss:$36 sps:$4 sm:$0xff]  }
 0x11a   :  { %2162 = vmatmul.mubr.bf16.gmra.mrb[124].mxu1 %v3907_v58  ;;  %3614 = vmatmul.mubr.bf16.gmra.mrb[124].mxu0 %v3908_v59  ;;  %v3922_v61 = vld [vmem:[%s5064_s0 + $0x408] ss:$36 sps:$4 sm:$0xff]  }
 0x11b   :  { %v4600_v11 = vadd.f32 %v3246_v9, %v4518_v5  ;;  %2169 = vmatprep.mubr.bf16.mxu1 %v3909_v2  ;;  %3617 = vmatprep.mubr.bf16.mxu0 %v3911_v3  ;;  %v3924_v3 = vld [vmem:[%s5064_s0 + $0x454] ss:$36 sps:$4 sm:$0xff]  }
 0x11d   :  { %v3247_v13 = vpop.f32.mrb[20].mxu1  ;;  %v3159_v15 = vpop.f32.mrb[20].mxu0 }
 0x11e   :  { %v3248_v16 = vpop.f32.mrb[21].mxu1  ;;  %v3160_v17 = vpop.f32.mrb[21].mxu0 }
 0x11f   :  { %v3249_v19 = vadd.f32 %v3248_v16, %v3247_v13  ;;  %v3250_v22 = vpop.f32.mrb[22].mxu1  ;;  %v4608_v23 = vadd.f32 %v3160_v17, %v3159_v15  ;;  %v3162_v5 = vpop.f32.mrb[22].mxu0 }
 0x120   :  { %v3251_v26 = vpop.f32.mrb[23].mxu1  ;;  %v3163_v27 = vpop.f32.mrb[23].mxu0 }
 0x121   :  { %v4617_v29 = vadd.f32 %v3249_v19, %v4528_v14  ;;  %v3252_v31 = vadd.f32 %v3251_v26, %v3250_v22  ;;  %v4619_v32 = vadd.f32 %v3163_v27, %v3162_v5  ;;  %v3918_v14 = vld [vmem:[%s5064_s0 + $0x338] ss:$36 sps:$4 sm:$0xff]   ;;  %v3927_v5 = vld [vmem:[%s5064_s0 + $0x450] ss:$36 sps:$4 sm:$0xff]  }
 0x122   :  { %2170 = vmatmul.mubr.bf16.gmra.mrb[128].mxu1 %v3912_v18  ;;  %3618 = vmatmul.mubr.bf16.gmra.mrb[128].mxu0 %v3913_v62 }
 0x123   :  { %v4622_v33 = vadd.f32 %v3252_v31, %v4538_v21  ;;  %2177 = vmatprep.mubr.bf16.mxu1 %v3914_v24  ;;  %3621 = vmatprep.mubr.bf16.mxu0 %v3916_v25 }
 0x125   :  { %v3253_v34 = vpop.f32.mrb[24].mxu1  ;;  %v3165_v35 = vpop.f32.mrb[24].mxu0 }
 0x126   :  { %v3254_v38 = vpop.f32.mrb[25].mxu1  ;;  %v3166_v39 = vpop.f32.mrb[25].mxu0 }
 0x127   :  { %v3255_v41 = vadd.f32 %v3254_v38, %v3253_v34  ;;  %v3256_v42 = vpop.f32.mrb[26].mxu1  ;;  %v4630_v43 = vadd.f32 %v3166_v39, %v3165_v35  ;;  %v3168_v21 = vpop.f32.mrb[26].mxu0 }
 0x128   :  { %v3257_v48 = vpop.f32.mrb[27].mxu1  ;;  %v3169_v49 = vpop.f32.mrb[27].mxu0 }
 0x129   :  { %v4639_v50 = vadd.f32 %v3255_v41, %v4548_v30  ;;  %v3258_v51 = vadd.f32 %v3257_v48, %v3256_v42  ;;  %v4641_v54 = vadd.f32 %v3169_v49, %v3168_v21  ;;  %v3923_v30 = vld [vmem:[%s5064_s0 + $0x3c8] ss:$36 sps:$4 sm:$0xff]  }
 0x12a   :  { %2178 = vmatmul.mubr.bf16.gmra.mrb[132].mxu1 %v3917_v40  ;;  %3622 = vmatmul.mubr.bf16.gmra.mrb[132].mxu0 %v3918_v14 }
 0x12b   :  { %v4644_v55 = vadd.f32 %v3258_v51, %v4558_v37  ;;  %2185 = vmatprep.mubr.bf16.mxu1 %v3919_v45  ;;  %3625 = vmatprep.mubr.bf16.mxu0 %v3921_v47 }
 0x12d   :  { %v3259_v56 = vpop.f32.mrb[28].mxu1  ;;  %v3171_v57 = vpop.f32.mrb[28].mxu0 }
 0x12e   :  { %v3260_v58 = vpop.f32.mrb[29].mxu1  ;;  %v3172_v59 = vpop.f32.mrb[29].mxu0 }
 0x12f   :  { %v3261_v63 = vadd.f32 %v3260_v58, %v3259_v56  ;;  %v3262_v1 = vpop.f32.mrb[30].mxu1  ;;  %v4652_v2 = vadd.f32 %v3172_v59, %v3171_v57  ;;  %v3174_v37 = vpop.f32.mrb[30].mxu0 }
 0x130   :  { %v3263_v7 = vpop.f32.mrb[31].mxu1  ;;  %v3175_v9 = vpop.f32.mrb[31].mxu0 }
 0x131   :  { %v4661_v13 = vadd.f32 %v3261_v63, %v4568_v46  ;;  %v3264_v15 = vadd.f32 %v3263_v7, %v3262_v1  ;;  %v4663_v16 = vadd.f32 %v3175_v9, %v3174_v37  ;;  %v3928_v46 = vld [vmem:[%s5064_s0 + $0x458] ss:$36 sps:$4 sm:$0xff]  }
 0x132   :  { %2186 = vmatmul.mubr.bf16.gmra.mrb[136].mxu1 %v3922_v61  ;;  %3626 = vmatmul.mubr.bf16.gmra.mrb[136].mxu0 %v3923_v30 }
 0x133   :  { %v4666_v17 = vadd.f32 %v3264_v15, %v4578_v53  ;;  %2193 = vmatprep.mubr.bf16.mxu1 %v3924_v3  ;;  %3629 = vmatprep.mubr.bf16.mxu0 %v3926_v6 }
 0x135   :  { %v3265_v18 = vpop.f32.mrb[32].mxu1  ;;  %v3177_v62 = vpop.f32.mrb[32].mxu0 }
 0x136   :  { %v3266_v19 = vpop.f32.mrb[33].mxu1  ;;  %v3178_v22 = vpop.f32.mrb[33].mxu0 }
 0x137   :  { %v3267_v24 = vadd.f32 %v3266_v19, %v3265_v18  ;;  %v3268_v25 = vpop.f32.mrb[34].mxu1  ;;  %v3179_v26 = vadd.f32 %v3178_v22, %v3177_v62  ;;  %v3180_v27 = vpop.f32.mrb[34].mxu0 }
 0x138   :  { %v3269_v53 = vpop.f32.mrb[35].mxu1  ;;  %v3181_v31 = vpop.f32.mrb[35].mxu0 }
 0x139   :  { %v4675_v34 = vadd.f32 %v3267_v24, %v4586_v0  ;;  %v3270_v35 = vadd.f32 %v3269_v53, %v3268_v25  ;;  %v3182_v38 = vadd.f32 %v3181_v31, %v3180_v27 }
 0x13a   :  { %2194 = vmatmul.mubr.bf16.gmra.mrb[140].mxu1 %v3927_v5  ;;  %3630 = vmatmul.mubr.bf16.gmra.mrb[140].mxu0 %v3928_v46 }
 0x13b   :  { %v4678_v39 = vadd.f32 %v3270_v35, %v4597_v10 }
 0x13d   :  { %v3271_v40 = vpop.f32.mrb[36].mxu1  ;;  %v3183_v14 = vpop.f32.mrb[36].mxu0 }
 0x13e   :  { %v3272_v41 = vpop.f32.mrb[37].mxu1  ;;  %v3184_v42 = vpop.f32.mrb[37].mxu0 }
 0x13f   :  { %v3273_v21 = vadd.f32 %v3272_v41, %v3271_v40  ;;  %v3274_v45 = vpop.f32.mrb[38].mxu1  ;;  %v3185_v47 = vadd.f32 %v3184_v42, %v3183_v14  ;;  %v3186_v48 = vpop.f32.mrb[38].mxu0 }
 0x140   :  { %v3275_v49 = vpop.f32.mrb[39].mxu1  ;;  %v3187_v51 = vpop.f32.mrb[39].mxu0 }
 0x141   :  { %v4681_v0 = vadd.f32 %v3273_v21, %v4608_v23  ;;  %v3276_v56 = vadd.f32 %v3275_v49, %v3274_v45  ;;  %v3188_v57 = vadd.f32 %v3187_v51, %v3186_v48 }
 0x143   :  { %v4684_v58 = vadd.f32 %v3276_v56, %v4619_v32 }
 0x145   :  { %v3277_v10 = vpop.f32.mrb[40].mxu1  ;;  %v3189_v59 = vpop.f32.mrb[40].mxu0 }
 0x146   :  { %v3278_v61 = vpop.f32.mrb[41].mxu1  ;;  %v3190_v30 = vpop.f32.mrb[41].mxu0 }
 0x147   :  { %v3279_v63 = vadd.f32 %v3278_v61, %v3277_v10  ;;  %v3280_v1 = vpop.f32.mrb[42].mxu1  ;;  %v4686_v37 = vadd.f32 %v3190_v30, %v3189_v59  ;;  %v3192_v3 = vpop.f32.mrb[42].mxu0 }
 0x148   :  { %v3281_v6 = vpop.f32.mrb[43].mxu1  ;;  %v3193_v7 = vpop.f32.mrb[43].mxu0 }
 0x149   :  { %v4689_v9 = vadd.f32 %v3279_v63, %v4630_v43  ;;  %v3282_v23 = vadd.f32 %v3281_v6, %v3280_v1  ;;  %v3194_v15 = vadd.f32 %v3193_v7, %v3192_v3 }
 0x14b   :  { %v4692_v18 = vadd.f32 %v3282_v23, %v4641_v54 }
 0x14d   :  { %v3283_v32 = vpop.f32.mrb[44].mxu1  ;;  %v3195_v62 = vpop.f32.mrb[44].mxu0 }
 0x14e   :  { %v3284_v19 = vpop.f32.mrb[45].mxu1  ;;  %v3196_v22 = vpop.f32.mrb[45].mxu0 }
 0x14f   :  { %v3285_v5 = vadd.f32 %v3284_v19, %v3283_v32  ;;  %v3286_v46 = vpop.f32.mrb[46].mxu1  ;;  %v4694_v24 = vadd.f32 %v3196_v22, %v3195_v62  ;;  %v3198_v25 = vpop.f32.mrb[46].mxu0 }
 0x150   :  { %v3287_v27 = vpop.f32.mrb[47].mxu1  ;;  %v3199_v53 = vpop.f32.mrb[47].mxu0 }
 0x151   :  { %v4697_v31 = vadd.f32 %v3285_v5, %v4652_v2  ;;  %v3288_v43 = vadd.f32 %v3287_v27, %v3286_v46  ;;  %v4699_v35 = vadd.f32 %v3199_v53, %v3198_v25 }
 0x153   :  { %v4702_v54 = vadd.f32 %v3288_v43, %v4663_v16 }
 0x155   :  { %v3289_v40 = vpop.f32.mrb[48].mxu1  ;;  %v3353_v14 = vpop.f32.mrb[48].mxu0 }
 0x156   :  { %v3290_v41 = vpop.f32.mrb[49].mxu1  ;;  %v3354_v42 = vpop.f32.mrb[49].mxu0 }
 0x157   :  { %v3291_v21 = vadd.f32 %v3290_v41, %v3289_v40  ;;  %v3355_v45 = vadd.f32 %v3354_v42, %v3353_v14  ;;  %v3292_v48 = vpop.f32.mrb[50].mxu1  ;;  %v3356_v49 = vpop.f32.mrb[50].mxu0 }
 0x158   :  { %v3293_v51 = vpop.f32.mrb[51].mxu1  ;;  %v3357_v56 = vpop.f32.mrb[51].mxu0 }
 0x159   :  { %v4704_v10 = vadd.f32 %v3291_v21, %v3179_v26  ;;  %v4707_v2 = vadd.f32 %v3355_v45, %v4595_v8  ;;  %v3294_v59 = vadd.f32 %v3293_v51, %v3292_v48  ;;  %v3358_v61 = vadd.f32 %v3357_v56, %v3356_v49 }
 0x15b   :  { %v4709_v30 = vadd.f32 %v3294_v59, %v3182_v38  ;;  %v4712_v16 = vadd.f32 %v3358_v61, %v4600_v11 }
 0x15d   :  { %v3295_v63 = vpop.f32.mrb[52].mxu1  ;;  %v3359_v1 = vpop.f32.mrb[52].mxu0 }
 0x15e   :  { %v3296_v3 = vpop.f32.mrb[53].mxu1  ;;  %v3360_v6 = vpop.f32.mrb[53].mxu0 }
 0x15f   :  { %v3297_v7 = vadd.f32 %v3296_v3, %v3295_v63  ;;  %v3361_v23 = vadd.f32 %v3360_v6, %v3359_v1  ;;  %v3298_v32 = vpop.f32.mrb[54].mxu1  ;;  %v3362_v62 = vpop.f32.mrb[54].mxu0 }
 0x160   :  { %v3299_v26 = vpop.f32.mrb[55].mxu1  ;;  %v3363_v19 = vpop.f32.mrb[55].mxu0 }
 0x161   :  { %v4714_v22 = vadd.f32 %v3297_v7, %v3185_v47  ;;  %v4717_v8 = vadd.f32 %v3361_v23, %v4617_v29  ;;  %v3300_v38 = vadd.f32 %v3299_v26, %v3298_v32  ;;  %v3364_v5 = vadd.f32 %v3363_v19, %v3362_v62 }
 0x163   :  { %v4719_v46 = vadd.f32 %v3300_v38, %v3188_v57  ;;  %v4722_v11 = vadd.f32 %v3364_v5, %v4622_v33 }
 0x165   :  { %v3301_v25 = vpop.f32.mrb[56].mxu1  ;;  %v3365_v27 = vpop.f32.mrb[56].mxu0 }
 0x166   :  { %v3302_v53 = vpop.f32.mrb[57].mxu1  ;;  %v3366_v43 = vpop.f32.mrb[57].mxu0 }
 0x167   :  { %v3303_v40 = vadd.f32 %v3302_v53, %v3301_v25  ;;  %v3367_v14 = vadd.f32 %v3366_v43, %v3365_v27  ;;  %v3304_v41 = vpop.f32.mrb[58].mxu1  ;;  %v3368_v42 = vpop.f32.mrb[58].mxu0 }
 0x168   :  { %v3305_v47 = vpop.f32.mrb[59].mxu1  ;;  %v3369_v21 = vpop.f32.mrb[59].mxu0 }
 0x169   :  { %v4725_v29 = vadd.f32 %v3303_v40, %v4686_v37  ;;  %v4728_v45 = vadd.f32 %v3367_v14, %v4639_v50  ;;  %v3306_v57 = vadd.f32 %v3305_v47, %v3304_v41  ;;  %v3370_v48 = vadd.f32 %v3369_v21, %v3368_v42 }
 0x16b   :  { %v4730_v33 = vadd.f32 %v3306_v57, %v3194_v15  ;;  %v4733_v49 = vadd.f32 %v3370_v48, %v4644_v55 }
 0x16d   :  { %v3307_v51 = vpop.f32.mrb[60].mxu1  ;;  %v3371_v56 = vpop.f32.mrb[60].mxu0 }
 0x16e   :  { %v3308_v59 = vpop.f32.mrb[61].mxu1  ;;  %v3372_v61 = vpop.f32.mrb[61].mxu0 }
 0x16f   :  { %v3309_v63 = vadd.f32 %v3308_v59, %v3307_v51  ;;  %v3373_v1 = vadd.f32 %v3372_v61, %v3371_v56  ;;  %v3310_v3 = vpop.f32.mrb[62].mxu1  ;;  %v3374_v6 = vpop.f32.mrb[62].mxu0 }
 0x170   :  { %v3311_v37 = vpop.f32.mrb[63].mxu1  ;;  %v3375_v7 = vpop.f32.mrb[63].mxu0 }
 0x171   :  { %v4736_v50 = vadd.f32 %v3309_v63, %v4694_v24  ;;  %v4739_v23 = vadd.f32 %v3373_v1, %v4661_v13  ;;  %v3312_v15 = vadd.f32 %v3311_v37, %v3310_v3  ;;  %v3376_v32 = vadd.f32 %v3375_v7, %v3374_v6 }
 0x173   :  { %v4742_v55 = vadd.f32 %v3312_v15, %v4699_v35  ;;  %v4745_v62 = vadd.f32 %v3376_v32, %v4666_v17 }
 0x175   :  { %v3313_v26 = vpop.f32.mrb[64].mxu1  ;;  %v3377_v19 = vpop.f32.mrb[64].mxu0 }
 0x176   :  { %v3314_v38 = vpop.f32.mrb[65].mxu1  ;;  %v3378_v5 = vpop.f32.mrb[65].mxu0 }
 0x177   :  { %v3315_v25 = vadd.f32 %v3314_v38, %v3313_v26  ;;  %v3379_v27 = vadd.f32 %v3378_v5, %v3377_v19  ;;  %v3316_v53 = vpop.f32.mrb[66].mxu1  ;;  %v3380_v24 = vpop.f32.mrb[66].mxu0 }
 0x178   :  { %v3317_v43 = vpop.f32.mrb[67].mxu1  ;;  %v3381_v40 = vpop.f32.mrb[67].mxu0 }
 0x179   :  { %v4748_v13 = vadd.f32 %v3315_v25, %v4506_v60  ;;  %v4751_v14 = vadd.f32 %v3379_v27, %v4675_v34  ;;  %v3318_v35 = vadd.f32 %v3317_v43, %v3316_v53  ;;  %v3382_v41 = vadd.f32 %v3381_v40, %v3380_v24 }
 0x17b   :  { %v4754_v17 = vadd.f32 %v3318_v35, %v4516_v4  ;;  %v4757_v42 = vadd.f32 %v3382_v41, %v4678_v39 }
 0x17d   :  { %v3319_v47 = vpop.f32.mrb[68].mxu1  ;;  %v3383_v21 = vpop.f32.mrb[68].mxu0 }
 0x17e   :  { %v3320_v57 = vpop.f32.mrb[69].mxu1  ;;  %v3384_v48 = vpop.f32.mrb[69].mxu0 }
 0x17f   :  { %v3321_v51 = vadd.f32 %v3320_v57, %v3319_v47  ;;  %v3385_v56 = vadd.f32 %v3384_v48, %v3383_v21  ;;  %v3322_v59 = vpop.f32.mrb[70].mxu1  ;;  %v3386_v60 = vpop.f32.mrb[70].mxu0 }
 0x180   :  { %v3323_v61 = vpop.f32.mrb[71].mxu1  ;;  %v3387_v63 = vpop.f32.mrb[71].mxu0 }
 0x181   :  { %v4760_v34 = vadd.f32 %v3321_v51, %v4526_v12  ;;  %v4763_v1 = vadd.f32 %v3385_v56, %v4681_v0  ;;  %v3324_v4 = vadd.f32 %v3323_v61, %v3322_v59  ;;  %v3388_v3 = vadd.f32 %v3387_v63, %v3386_v60 }
 0x183   :  { %v4766_v39 = vadd.f32 %v3324_v4, %v4536_v20  ;;  %v4769_v6 = vadd.f32 %v3388_v3, %v4684_v58 }
 0x185   :  { %v3325_v37 = vpop.f32.mrb[72].mxu1  ;;  %v3389_v7 = vpop.f32.mrb[72].mxu0 }
 0x186   :  { %v3326_v15 = vpop.f32.mrb[73].mxu1  ;;  %v3390_v32 = vpop.f32.mrb[73].mxu0 }
 0x187   :  { %v3327_v26 = vadd.f32 %v3326_v15, %v3325_v37  ;;  %v3391_v19 = vadd.f32 %v3390_v32, %v3389_v7  ;;  %v3328_v38 = vpop.f32.mrb[74].mxu1  ;;  %v3392_v12 = vpop.f32.mrb[74].mxu0 }
 0x188   :  { %v3329_v5 = vpop.f32.mrb[75].mxu1  ;;  %v3393_v25 = vpop.f32.mrb[75].mxu0 }
 0x189   :  { %v4772_v0 = vadd.f32 %v3327_v26, %v4546_v28  ;;  %v4775_v27 = vadd.f32 %v3391_v19, %v4689_v9  ;;  %v3330_v20 = vadd.f32 %v3329_v5, %v3328_v38  ;;  %v3394_v53 = vadd.f32 %v3393_v25, %v3392_v12 }
 0x18b   :  { %v4778_v58 = vadd.f32 %v3330_v20, %v4556_v36  ;;  %v4781_v24 = vadd.f32 %v3394_v53, %v4692_v18 }
 0x18d   :  { %v3331_v43 = vpop.f32.mrb[76].mxu1  ;;  %v3395_v40 = vpop.f32.mrb[76].mxu0 }
 0x18e   :  { %v3332_v35 = vpop.f32.mrb[77].mxu1  ;;  %v3396_v41 = vpop.f32.mrb[77].mxu0 }
 0x18f   :  { %v3333_v47 = vadd.f32 %v3332_v35, %v3331_v43  ;;  %v3397_v21 = vadd.f32 %v3396_v41, %v3395_v40  ;;  %v3334_v57 = vpop.f32.mrb[78].mxu1  ;;  %v3398_v28 = vpop.f32.mrb[78].mxu0 }
 0x190   :  { %v3335_v48 = vpop.f32.mrb[79].mxu1  ;;  %v3399_v51 = vpop.f32.mrb[79].mxu0 }
 0x191   :  { %v4784_v9 = vadd.f32 %v3333_v47, %v4566_v44  ;;  %v4787_v56 = vadd.f32 %v3397_v21, %v4697_v31  ;;  %v3336_v36 = vadd.f32 %v3335_v48, %v3334_v57  ;;  %v3400_v59 = vadd.f32 %v3399_v51, %v3398_v28 }
 0x193   :  { %v4790_v18 = vadd.f32 %v3336_v36, %v4576_v52  ;;  %v4793_v60 = vadd.f32 %v3400_v59, %v4702_v54 }
 0x195   :  { %v3401_v61 = vpop.f32.mrb[80].mxu0  ;;  %v3465_v63 = vpop.f32.mrb[80].mxu1 }
 0x196   :  { %v3402_v4 = vpop.f32.mrb[81].mxu0  ;;  %v3466_v3 = vpop.f32.mrb[81].mxu1 }
 0x197   :  { %v3403_v37 = vadd.f32 %v3402_v4, %v3401_v61  ;;  %v3467_v7 = vadd.f32 %v3466_v3, %v3465_v63  ;;  %v3404_v15 = vpop.f32.mrb[82].mxu0  ;;  %v3468_v44 = vpop.f32.mrb[82].mxu1 }
 0x198   :  { %v3405_v32 = vpop.f32.mrb[83].mxu0  ;;  %v3469_v26 = vpop.f32.mrb[83].mxu1 }
 0x199   :  { %v4796_v31 = vadd.f32 %v3403_v37, %v4704_v10  ;;  %v3406_v19 = vadd.f32 %v3405_v32, %v3404_v15  ;;  %v3470_v38 = vadd.f32 %v3469_v26, %v3468_v44  ;;  %v4799_v52 = vadd.f32 %v3467_v7, %v4707_v2 }
 0x19b   :  { %v4802_v54 = vadd.f32 %v3406_v19, %v4709_v30  ;;  %v4805_v12 = vadd.f32 %v3470_v38, %v4712_v16 }
 0x19d   :  { %v3407_v5 = vpop.f32.mrb[84].mxu0  ;;  %v3471_v25 = vpop.f32.mrb[84].mxu1 }
 0x19e   :  { %v3408_v20 = vpop.f32.mrb[85].mxu0  ;;  %v3472_v53 = vpop.f32.mrb[85].mxu1 }
 0x19f   :  { %v3409_v43 = vadd.f32 %v3408_v20, %v3407_v5  ;;  %v3473_v40 = vadd.f32 %v3472_v53, %v3471_v25  ;;  %v3410_v35 = vpop.f32.mrb[86].mxu0  ;;  %v3474_v10 = vpop.f32.mrb[86].mxu1 }
 0x1a0   :  { %v3411_v41 = vpop.f32.mrb[87].mxu0  ;;  %v3475_v47 = vpop.f32.mrb[87].mxu1 }
 0x1a1   :  { %v4808_v21 = vadd.f32 %v3409_v43, %v4714_v22  ;;  %v3412_v2 = vadd.f32 %v3411_v41, %v3410_v35  ;;  %v3476_v57 = vadd.f32 %v3475_v47, %v3474_v10  ;;  %v4811_v30 = vadd.f32 %v3473_v40, %v4717_v8 }
 0x1a3   :  { %v4814_v16 = vadd.f32 %v3412_v2, %v4719_v46  ;;  %v4817_v28 = vadd.f32 %v3476_v57, %v4722_v11 }
 0x1a5   :  { %v3413_v48 = vpop.f32.mrb[88].mxu0  ;;  %v3477_v51 = vpop.f32.mrb[88].mxu1 }
 0x1a6   :  { %v3414_v36 = vpop.f32.mrb[89].mxu0  ;;  %v3478_v59 = vpop.f32.mrb[89].mxu1 }
 0x1a7   :  { %v3415_v61 = vadd.f32 %v3414_v36, %v3413_v48  ;;  %v3479_v63 = vadd.f32 %v3478_v59, %v3477_v51  ;;  %v3416_v4 = vpop.f32.mrb[90].mxu0  ;;  %v3480_v22 = vpop.f32.mrb[90].mxu1 }
 0x1a8   :  { %v3417_v3 = vpop.f32.mrb[91].mxu0  ;;  %v3481_v37 = vpop.f32.mrb[91].mxu1 }
 0x1a9   :  { %v4820_v7 = vadd.f32 %v3415_v61, %v4725_v29  ;;  %v3418_v8 = vadd.f32 %v3417_v3, %v3416_v4  ;;  %v3482_v15 = vadd.f32 %v3481_v37, %v3480_v22  ;;  %v4823_v46 = vadd.f32 %v3479_v63, %v4728_v45 }
 0x1ab   :  { %v4826_v11 = vadd.f32 %v3418_v8, %v4730_v33  ;;  %v4829_v44 = vadd.f32 %v3482_v15, %v4733_v49 }
 0x1ad   :  { %v3419_v32 = vpop.f32.mrb[92].mxu0  ;;  %v3483_v26 = vpop.f32.mrb[92].mxu1 }
 0x1ae   :  { %v3420_v19 = vpop.f32.mrb[93].mxu0  ;;  %v3484_v38 = vpop.f32.mrb[93].mxu1 }
 0x1af   :  { %v3421_v5 = vadd.f32 %v3420_v19, %v3419_v32  ;;  %v3485_v25 = vadd.f32 %v3484_v38, %v3483_v26  ;;  %v3422_v20 = vpop.f32.mrb[94].mxu0  ;;  %v3486_v29 = vpop.f32.mrb[94].mxu1 }
 0x1b0   :  { %v3423_v53 = vpop.f32.mrb[95].mxu0  ;;  %v3487_v43 = vpop.f32.mrb[95].mxu1 }
 0x1b1   :  { %v4832_v40 = vadd.f32 %v3421_v5, %v4736_v50  ;;  %v3424_v45 = vadd.f32 %v3423_v53, %v3422_v20  ;;  %v3488_v35 = vadd.f32 %v3487_v43, %v3486_v29  ;;  %v4835_v33 = vadd.f32 %v3485_v25, %v4739_v23 }
 0x1b3   :  { %v4838_v49 = vadd.f32 %v3424_v45, %v4742_v55  ;;  %v4841_v10 = vadd.f32 %v3488_v35, %v4745_v62 }
 0x1b5   :  { %v3425_v41 = vpop.f32.mrb[96].mxu0  ;;  %v3489_v47 = vpop.f32.mrb[96].mxu1 }
 0x1b6   :  { %v3426_v2 = vpop.f32.mrb[97].mxu0  ;;  %v3490_v57 = vpop.f32.mrb[97].mxu1 }
 0x1b7   :  { %v3427_v48 = vadd.f32 %v3426_v2, %v3425_v41  ;;  %v3491_v51 = vadd.f32 %v3490_v57, %v3489_v47  ;;  %v3428_v36 = vpop.f32.mrb[98].mxu0  ;;  %v3492_v50 = vpop.f32.mrb[98].mxu1 }
 0x1b8   :  { %v3429_v59 = vpop.f32.mrb[99].mxu0  ;;  %v3493_v61 = vpop.f32.mrb[99].mxu1 }
 0x1b9   :  { %v4844_v63 = vadd.f32 %v3427_v48, %v4748_v13  ;;  %v3430_v23 = vadd.f32 %v3429_v59, %v3428_v36  ;;  %v3494_v4 = vadd.f32 %v3493_v61, %v3492_v50  ;;  %v4847_v55 = vadd.f32 %v3491_v51, %v4751_v14 }
 0x1bb   :  { %v4850_v62 = vadd.f32 %v3430_v23, %v4754_v17  ;;  %v4853_v22 = vadd.f32 %v3494_v4, %v4757_v42 }
 0x1bd   :  { %v3431_v3 = vpop.f32.mrb[100].mxu0  ;;  %v3495_v37 = vpop.f32.mrb[100].mxu1 }
 0x1be   :  { %v3432_v8 = vpop.f32.mrb[101].mxu0  ;;  %v3496_v15 = vpop.f32.mrb[101].mxu1 }
 0x1bf   :  { %v3433_v32 = vadd.f32 %v3432_v8, %v3431_v3  ;;  %v3497_v26 = vadd.f32 %v3496_v15, %v3495_v37  ;;  %v3434_v19 = vpop.f32.mrb[102].mxu0  ;;  %v3498_v13 = vpop.f32.mrb[102].mxu1 }
 0x1c0   :  { %v3435_v38 = vpop.f32.mrb[103].mxu0  ;;  %v3499_v5 = vpop.f32.mrb[103].mxu1 }
 0x1c1   :  { %v4856_v25 = vadd.f32 %v3433_v32, %v4760_v34  ;;  %v3436_v14 = vadd.f32 %v3435_v38, %v3434_v19  ;;  %v3500_v20 = vadd.f32 %v3499_v5, %v3498_v13  ;;  %v4859_v17 = vadd.f32 %v3497_v26, %v4763_v1 }
 0x1c3   :  { %v4862_v42 = vadd.f32 %v3436_v14, %v4766_v39  ;;  %v4865_v29 = vadd.f32 %v3500_v20, %v4769_v6  ;;  %v4894_v14 = vld [vmem:[%s5065_s2] ss:$0 sm:$0xff] }
 0x1c5   :  { %v3437_v53 = vpop.f32.mrb[104].mxu0  ;;  %v3501_v43 = vpop.f32.mrb[104].mxu1 }
 0x1c6   :  { %v3438_v45 = vpop.f32.mrb[105].mxu0  ;;  %v3502_v35 = vpop.f32.mrb[105].mxu1 }
 0x1c7   :  { %v3439_v41 = vadd.f32 %v3438_v45, %v3437_v53  ;;  %v3503_v47 = vadd.f32 %v3502_v35, %v3501_v43  ;;  %v3440_v2 = vpop.f32.mrb[106].mxu0  ;;  %v3504_v34 = vpop.f32.mrb[106].mxu1 }
 0x1c8   :  { %v3441_v57 = vpop.f32.mrb[107].mxu0  ;;  %v3505_v48 = vpop.f32.mrb[107].mxu1 }
 0x1c9   :  { %v4868_v51 = vadd.f32 %v3439_v41, %v4772_v0  ;;  %v3442_v1 = vadd.f32 %v3441_v57, %v3440_v2  ;;  %v3506_v36 = vadd.f32 %v3505_v48, %v3504_v34  ;;  %v4871_v39 = vadd.f32 %v3503_v47, %v4775_v27 }
 0x1cb   :  { %v4874_v6 = vadd.f32 %v3442_v1, %v4778_v58  ;;  %v4877_v50 = vadd.f32 %v3506_v36, %v4781_v24 }
 0x1cd   :  { %v3443_v59 = vpop.f32.mrb[108].mxu0  ;;  %v3507_v61 = vpop.f32.mrb[108].mxu1 }
 0x1ce   :  { %v3444_v23 = vpop.f32.mrb[109].mxu0  ;;  %v3508_v4 = vpop.f32.mrb[109].mxu1 }
 0x1cf   :  { %v3445_v3 = vadd.f32 %v3444_v23, %v3443_v59  ;;  %v3509_v37 = vadd.f32 %v3508_v4, %v3507_v61  ;;  %v3446_v8 = vpop.f32.mrb[110].mxu0  ;;  %v3510_v0 = vpop.f32.mrb[110].mxu1 }
 0x1d0   :  { %v3447_v15 = vpop.f32.mrb[111].mxu0  ;;  %v3511_v32 = vpop.f32.mrb[111].mxu1 }
 0x1d1   :  { %v4880_v26 = vadd.f32 %v3445_v3, %v4784_v9  ;;  %v3448_v27 = vadd.f32 %v3447_v15, %v3446_v8  ;;  %v3512_v19 = vadd.f32 %v3511_v32, %v3510_v0  ;;  %v4883_v58 = vadd.f32 %v3509_v37, %v4787_v56  ;;  %v4900_v56 = vld [vmem:[%s5066_s3] ss:$0 sm:$0xff] }
 0x1d3   :  { %v4886_v24 = vadd.f32 %v3448_v27, %v4790_v18  ;;  %v4889_v13 = vadd.f32 %v3512_v19, %v4793_v60 }
 0x1d5   :  { %v3513_v38 = vpop.f32.mrb[112].mxu1  ;;  %v3603_v5 = vpop.f32.mrb[112].mxu0 }
 0x1d6   :  { %v2245_v9 = vadd.f32 %v3603_v5, %v4811_v30  ;;  %v3514_v20 = vpop.f32.mrb[113].mxu1  ;;  %v2236_v53 = vpop.f32.mrb[113].mxu0 }
 0x1d7   :  { %v3515_v18 = vadd.f32 %v3514_v20, %v3513_v38  ;;  %v2237_v60 = vadd.f32 %v2236_v53, %v4799_v52  ;;  %v3516_v43 = vpop.f32.mrb[114].mxu1  ;;  %v3604_v45 = vpop.f32.mrb[114].mxu0 }
 0x1d8   :  { %v2471_v35 = vmul.f32 %v4894_v14, %v2245_v9  ;;  %v2248_v41 = vadd.f32 %v3604_v45, %v4817_v28  ;;  %v3517_v47 = vpop.f32.mrb[115].mxu1  ;;  %v2239_v2 = vpop.f32.mrb[115].mxu0 }
 0x1d9   :  { %v2469_v30 = vmul.f32 %v4894_v14, %v2237_v60  ;;  %v3518_v34 = vadd.f32 %v3517_v47, %v3516_v43  ;;  %v2240_v57 = vadd.f32 %v2239_v2, %v4805_v12  ;;  %v4908_v48 = vadd.f32 %v3515_v18, %v4796_v31 }
 0x1da   :  { %v2510_v1 = vadd.f32 %v4900_v56, %v2471_v35  ;;  %v2472_v52 = vmul.f32 %v4894_v14, %v2248_v41 }
 0x1db   :  { %v2508_v36 = vadd.f32 %v4900_v56, %v2469_v30  ;;  %v2470_v59 = vmul.f32 %v4894_v14, %v2240_v57  ;;  %v4915_v28 = vadd.f32 %v3518_v34, %v4802_v54 }
 0x1dc   :  { %v2511_v61 = vadd.f32 %v4900_v56, %v2472_v52  ;;  %v2542_v3 = vmax.f32 %v2510_v1, 0.0 }
 0x1dd   :  { %v2509_v23 = vadd.f32 %v4900_v56, %v2470_v59  ;;  %v3519_v4 = vpop.f32.mrb[116].mxu1  ;;  %v3607_v12 = vpop.f32.mrb[116].mxu0  ;;  %v2540_v15 = vmax.f32 %v2508_v36, 0.0 }
 0x1de   :  { %v2543_v31 = vmax.f32 %v2511_v61, 0.0  ;;  %v2261_v37 = vadd.f32 %v3607_v12, %v4835_v33  ;;  %v3520_v8 = vpop.f32.mrb[117].mxu1  ;;  %v2252_v0 = vpop.f32.mrb[117].mxu0 }
 0x1df   :  { %v2541_v32 = vmax.f32 %v2509_v23, 0.0  ;;  %v3521_v27 = vadd.f32 %v3520_v8, %v3519_v4  ;;  %v2253_v19 = vadd.f32 %v2252_v0, %v4823_v46  ;;  %v3522_v38 = vpop.f32.mrb[118].mxu1  ;;  %v3608_v54 = vpop.f32.mrb[118].mxu0 }
 0x1e0   :  { %v3026_v5 = vpack.c.bf16 %v2543_v31, %v2542_v3  ;;  %v2475_v9 = vmul.f32 %v4894_v14, %v2261_v37  ;;  %v2264_v20 = vadd.f32 %v3608_v54, %v4841_v10  ;;  %v3523_v53 = vpop.f32.mrb[119].mxu1  ;;  %v2255_v18 = vpop.f32.mrb[119].mxu0 }
 0x1e1   :  { %v3021_v60 = vpack.c.bf16 %v2541_v32, %v2540_v15  ;;  %v2473_v43 = vmul.f32 %v4894_v14, %v2253_v19  ;;  %v3524_v33 = vadd.f32 %v3523_v53, %v3522_v38  ;;  %v2256_v45 = vadd.f32 %v2255_v18, %v4829_v44 }
 0x1e2   :  { %3098 = vst [vmem:[%s5067_s4 + $0x8] sm:$0xff] %v3026_v5   ;;  %v2514_v46 = vadd.f32 %v4900_v56, %v2475_v9  ;;  %v2476_v35 = vmul.f32 %v4894_v14, %v2264_v20  ;;  %v4931_v41 = vadd.f32 %v3521_v27, %v4808_v21 }
 0x1e3   :  { %3022 = vst [vmem:[%s5067_s4] sm:$0xff] %v3021_v60   ;;  %v2512_v10 = vadd.f32 %v4900_v56, %v2473_v43  ;;  %v2474_v47 = vmul.f32 %v4894_v14, %v2256_v45  ;;  %v4939_v44 = vadd.f32 %v3524_v33, %v4814_v16 }
 0x1e4   :  { %v2515_v2 = vadd.f32 %v4900_v56, %v2476_v35  ;;  %v2546_v1 = vmax.f32 %v2514_v46, 0.0 }
 0x1e5   :  { %v2513_v30 = vadd.f32 %v4900_v56, %v2474_v47  ;;  %v3525_v34 = vpop.f32.mrb[120].mxu1  ;;  %v3611_v57 = vpop.f32.mrb[120].mxu0  ;;  %v2544_v61 = vmax.f32 %v2512_v10, 0.0 }
 0x1e6   :  { %v2547_v21 = vmax.f32 %v2515_v2, 0.0  ;;  %v2277_v52 = vadd.f32 %v3611_v57, %v4859_v17  ;;  %v3526_v36 = vpop.f32.mrb[121].mxu1  ;;  %v2268_v59 = vpop.f32.mrb[121].mxu0 }
 0x1e7   :  { %v2545_v23 = vmax.f32 %v2513_v30, 0.0  ;;  %v3527_v4 = vadd.f32 %v3526_v36, %v3525_v34  ;;  %v2269_v12 = vadd.f32 %v2268_v59, %v4847_v55  ;;  %v3528_v3 = vpop.f32.mrb[122].mxu1  ;;  %v3612_v16 = vpop.f32.mrb[122].mxu0 }
 0x1e8   :  { %v3036_v31 = vpack.c.bf16 %v2547_v21, %v2546_v1  ;;  %v2479_v37 = vmul.f32 %v4894_v14, %v2277_v52  ;;  %v2280_v8 = vadd.f32 %v3612_v16, %v4865_v29  ;;  %v3529_v0 = vpop.f32.mrb[123].mxu1  ;;  %v2271_v15 = vpop.f32.mrb[123].mxu0 }
 0x1e9   :  { %v3031_v32 = vpack.c.bf16 %v2545_v23, %v2544_v61  ;;  %v2477_v27 = vmul.f32 %v4894_v14, %v2269_v12  ;;  %v3530_v17 = vadd.f32 %v3529_v0, %v3528_v3  ;;  %v2272_v19 = vadd.f32 %v2271_v15, %v4853_v22 }
 0x1ea   :  { %3100 = vst [vmem:[%s5067_s4 + $0x18] sm:$0xff] %v3036_v31   ;;  %v2518_v55 = vadd.f32 %v4900_v56, %v2479_v37  ;;  %v2480_v38 = vmul.f32 %v4894_v14, %v2280_v8  ;;  %v4955_v54 = vadd.f32 %v3527_v4, %v4820_v7 }
 0x1eb   :  { %3099 = vst [vmem:[%s5067_s4 + $0x10] sm:$0xff] %v3031_v32   ;;  %v2516_v29 = vadd.f32 %v4900_v56, %v2477_v27  ;;  %v2478_v5 = vmul.f32 %v4894_v14, %v2272_v19  ;;  %v4963_v22 = vadd.f32 %v3530_v17, %v4826_v11 }
 0x1ec   :  { %v2519_v9 = vadd.f32 %v4900_v56, %v2480_v38  ;;  %v2550_v60 = vmax.f32 %v2518_v55, 0.0 }
 0x1ed   :  { %v2517_v20 = vadd.f32 %v4900_v56, %v2478_v5  ;;  %v3531_v53 = vpop.f32.mrb[124].mxu1  ;;  %v3615_v18 = vpop.f32.mrb[124].mxu0  ;;  %v2548_v46 = vmax.f32 %v2516_v29, 0.0 }
 0x1ee   :  { %v2551_v7 = vmax.f32 %v2519_v9, 0.0  ;;  %v2293_v43 = vadd.f32 %v3615_v18, %v4883_v58  ;;  %v3532_v33 = vpop.f32.mrb[125].mxu1  ;;  %v2284_v45 = vpop.f32.mrb[125].mxu0 }
 0x1ef   :  { %v2549_v35 = vmax.f32 %v2517_v20, 0.0  ;;  %v3533_v10 = vadd.f32 %v3532_v33, %v3531_v53  ;;  %v2285_v47 = vadd.f32 %v2284_v45, %v4871_v39  ;;  %v3534_v2 = vpop.f32.mrb[126].mxu1  ;;  %v3616_v11 = vpop.f32.mrb[126].mxu0 }
 0x1f0   :  { %v3046_v30 = vpack.c.bf16 %v2551_v7, %v2550_v60  ;;  %v2483_v34 = vmul.f32 %v4894_v14, %v2293_v43  ;;  %v2296_v57 = vadd.f32 %v3616_v11, %v4889_v13  ;;  %v3535_v1 = vpop.f32.mrb[127].mxu1  ;;  %v2287_v21 = vpop.f32.mrb[127].mxu0 }
 0x1f1   :  { %v3041_v52 = vpack.c.bf16 %v2549_v35, %v2548_v46  ;;  %v2481_v36 = vmul.f32 %v4894_v14, %v2285_v47  ;;  %v3536_v58 = vadd.f32 %v3535_v1, %v3534_v2  ;;  %v2288_v59 = vadd.f32 %v2287_v21, %v4877_v50 }
 0x1f2   :  { %3102 = vst [vmem:[%s5067_s4 + $0x28] sm:$0xff] %v3046_v30   ;;  %v2522_v39 = vadd.f32 %v4900_v56, %v2483_v34  ;;  %v2484_v61 = vmul.f32 %v4894_v14, %v2296_v57  ;;  %v2164_v23 = vadd.f32 %v3533_v10, %v4832_v40 }
 0x1f3   :  { %3101 = vst [vmem:[%s5067_s4 + $0x20] sm:$0xff] %v3041_v52   ;;  %v2520_v13 = vadd.f32 %v4900_v56, %v2481_v36  ;;  %v2482_v4 = vmul.f32 %v4894_v14, %v2288_v59  ;;  %v2167_v50 = vadd.f32 %v3536_v58, %v4838_v49 }
 0x1f4   :  { %v2523_v12 = vadd.f32 %v4900_v56, %v2484_v61  ;;  %v2554_v37 = vmax.f32 %v2522_v39, 0.0 }
 0x1f5   :  { %v2521_v3 = vadd.f32 %v4900_v56, %v2482_v4  ;;  %v3537_v16 = vpop.f32.mrb[128].mxu1  ;;  %v3619_v31 = vpop.f32.mrb[128].mxu0  ;;  %v2552_v32 = vmax.f32 %v2520_v13, 0.0 }
 0x1f6   :  { %v2555_v8 = vmax.f32 %v2523_v12, 0.0  ;;  %v2309_v40 = vadd.f32 %v3619_v31, %v4931_v41  ;;  %v3538_v0 = vpop.f32.mrb[129].mxu1  ;;  %v2300_v15 = vpop.f32.mrb[129].mxu0 }
 0x1f7   :  { %v2553_v27 = vmax.f32 %v2521_v3, 0.0  ;;  %v3539_v17 = vadd.f32 %v3538_v0, %v3537_v16  ;;  %v2301_v19 = vadd.f32 %v2300_v15, %v4908_v48  ;;  %v3540_v55 = vpop.f32.mrb[130].mxu1  ;;  %v3620_v38 = vpop.f32.mrb[130].mxu0 }
 0x1f8   :  { %v3056_v49 = vpack.c.bf16 %v2555_v8, %v2554_v37  ;;  %v2487_v29 = vmul.f32 %v4894_v14, %v2309_v40  ;;  %v2312_v5 = vadd.f32 %v3620_v38, %v4939_v44  ;;  %v3541_v9 = vpop.f32.mrb[131].mxu1  ;;  %v2303_v20 = vpop.f32.mrb[131].mxu0 }
 0x1f9   :  { %v3051_v53 = vpack.c.bf16 %v2553_v27, %v2552_v32  ;;  %v2485_v18 = vmul.f32 %v4894_v14, %v2301_v19  ;;  %v3542_v41 = vadd.f32 %v3541_v9, %v3540_v55  ;;  %v2304_v60 = vadd.f32 %v2303_v20, %v4915_v28 }
 0x1fa   :  { %3104 = vst [vmem:[%s5067_s4 + $0x38] sm:$0xff] %v3056_v49   ;;  %v2526_v48 = vadd.f32 %v4900_v56, %v2487_v29  ;;  %v2488_v7 = vmul.f32 %v4894_v14, %v2312_v5  ;;  %v2172_v43 = vadd.f32 %v3539_v17, %v4844_v63 }
 0x1fb   :  { %3103 = vst [vmem:[%s5067_s4 + $0x30] sm:$0xff] %v3051_v53   ;;  %v2524_v44 = vadd.f32 %v4900_v56, %v2485_v18  ;;  %v2486_v33 = vmul.f32 %v4894_v14, %v2304_v60  ;;  %v2175_v28 = vadd.f32 %v3542_v41, %v4850_v62 }
 0x1fc   :  { %v2527_v45 = vadd.f32 %v4900_v56, %v2488_v7  ;;  %v2558_v47 = vmax.f32 %v2526_v48, 0.0 }
 0x1fd   :  { %v2525_v46 = vadd.f32 %v4900_v56, %v2486_v33  ;;  %v3543_v35 = vpop.f32.mrb[132].mxu1  ;;  %v3623_v10 = vpop.f32.mrb[132].mxu0  ;;  %v2556_v34 = vmax.f32 %v2524_v44, 0.0 }
 0x1fe   :  { %v2559_v2 = vmax.f32 %v2527_v45, 0.0  ;;  %v2325_v11 = vadd.f32 %v3623_v10, %v2164_v23  ;;  %v3544_v63 = vpop.f32.mrb[133].mxu1  ;;  %v2316_v30 = vpop.f32.mrb[133].mxu0 }
 0x1ff   :  { %v2557_v57 = vmax.f32 %v2525_v46, 0.0  ;;  %v3545_v1 = vadd.f32 %v3544_v63, %v3543_v35  ;;  %v2317_v21 = vadd.f32 %v2316_v30, %v4955_v54  ;;  %v3546_v52 = vpop.f32.mrb[134].mxu1  ;;  %v3624_v36 = vpop.f32.mrb[134].mxu0 }
 0x200   :  { %v3066_v58 = vpack.c.bf16 %v2559_v2, %v2558_v47  ;;  %v2491_v62 = vmul.f32 %v4894_v14, %v2325_v11  ;;  %v2328_v59 = vadd.f32 %v3624_v36, %v2167_v50  ;;  %v3547_v39 = vpop.f32.mrb[135].mxu1  ;;  %v2319_v61 = vpop.f32.mrb[135].mxu0 }
 0x201   :  { %v3061_v13 = vpack.c.bf16 %v2557_v57, %v2556_v34  ;;  %v2489_v4 = vmul.f32 %v4894_v14, %v2317_v21  ;;  %v3548_v12 = vadd.f32 %v3547_v39, %v3546_v52  ;;  %v2320_v23 = vadd.f32 %v2319_v61, %v4963_v22 }
 0x202   :  { %3106 = vst [vmem:[%s5067_s4 + $0x48] sm:$0xff] %v3066_v58   ;;  %v2530_v54 = vadd.f32 %v4900_v56, %v2491_v62  ;;  %v2492_v3 = vmul.f32 %v4894_v14, %v2328_v59  ;;  %v2180_v16 = vadd.f32 %v3545_v1, %v4856_v25 }
 0x203   :  { %3105 = vst [vmem:[%s5067_s4 + $0x40] sm:$0xff] %v3061_v13   ;;  %v2528_v50 = vadd.f32 %v4900_v56, %v2489_v4  ;;  %v2490_v31 = vmul.f32 %v4894_v14, %v2320_v23  ;;  %v2183_v22 = vadd.f32 %v3548_v12, %v4862_v42 }
 0x204   :  { %v2531_v37 = vadd.f32 %v4900_v56, %v2492_v3  ;;  %v2562_v15 = vmax.f32 %v2530_v54, 0.0 }
 0x205   :  { %v2529_v8 = vadd.f32 %v4900_v56, %v2490_v31  ;;  %v3549_v40 = vpop.f32.mrb[136].mxu1  ;;  %v3627_v0 = vpop.f32.mrb[136].mxu0  ;;  %v2560_v19 = vmax.f32 %v2528_v50, 0.0 }
 0x206   :  { %v2563_v32 = vmax.f32 %v2531_v37, 0.0  ;;  %v2341_v27 = vadd.f32 %v3627_v0, %v2180_v16  ;;  %v3550_v25 = vpop.f32.mrb[137].mxu1  ;;  %v2332_v17 = vpop.f32.mrb[137].mxu0 }
 0x207   :  { %v2561_v55 = vmax.f32 %v2529_v8, 0.0  ;;  %v3551_v38 = vadd.f32 %v3550_v25, %v3549_v40  ;;  %v2333_v49 = vadd.f32 %v2332_v17, %v2172_v43  ;;  %v3552_v29 = vpop.f32.mrb[138].mxu1  ;;  %v3628_v5 = vpop.f32.mrb[138].mxu0 }
 0x208   :  { %v3076_v9 = vpack.c.bf16 %v2563_v32, %v2562_v15  ;;  %v2495_v42 = vmul.f32 %v4894_v14, %v2341_v27  ;;  %v2344_v20 = vadd.f32 %v3628_v5, %v2183_v22  ;;  %v3553_v53 = vpop.f32.mrb[139].mxu1  ;;  %v2335_v18 = vpop.f32.mrb[139].mxu0 }
 0x209   :  { %v3071_v41 = vpack.c.bf16 %v2561_v55, %v2560_v19  ;;  %v2493_v60 = vmul.f32 %v4894_v14, %v2333_v49  ;;  %v3554_v48 = vadd.f32 %v3553_v53, %v3552_v29  ;;  %v2336_v7 = vadd.f32 %v2335_v18, %v2175_v28 }
 0x20a   :  { %3108 = vst [vmem:[%s5067_s4 + $0x58] sm:$0xff] %v3076_v9   ;;  %v2534_v44 = vadd.f32 %v4900_v56, %v2495_v42  ;;  %v2496_v43 = vmul.f32 %v4894_v14, %v2344_v20  ;;  %v2188_v33 = vadd.f32 %v3551_v38, %v4868_v51 }
 0x20b   :  { %3107 = vst [vmem:[%s5067_s4 + $0x50] sm:$0xff] %v3071_v41   ;;  %v2532_v45 = vadd.f32 %v4900_v56, %v2493_v60  ;;  %v2494_v46 = vmul.f32 %v4894_v14, %v2336_v7  ;;  %v2191_v28 = vadd.f32 %v3554_v48, %v4874_v6 }
 0x20c   :  { %v2535_v35 = vadd.f32 %v4900_v56, %v2496_v43  ;;  %v2566_v11 = vmax.f32 %v2534_v44, 0.0 }
 0x20d   :  { %v2533_v10 = vadd.f32 %v4900_v56, %v2494_v46  ;;  %v3555_v47 = vpop.f32.mrb[140].mxu1  ;;  %v3631_v2 = vpop.f32.mrb[140].mxu0  ;;  %v2564_v34 = vmax.f32 %v2532_v45, 0.0 }
 0x20e   :  { %v2567_v63 = vmax.f32 %v2535_v35, 0.0  ;;  %v3556_v30 = vpop.f32.mrb[141].mxu1  ;;  %v2348_v51 = vpop.f32.mrb[141].mxu0 }
 0x20f   :  { %v2565_v57 = vmax.f32 %v2533_v10, 0.0  ;;  %v3557_v1 = vadd.f32 %v3556_v30, %v3555_v47  ;;  %v2349_v21 = vadd.f32 %v2348_v51, %v2188_v33  ;;  %v3558_v52 = vpop.f32.mrb[142].mxu1  ;;  %v3632_v36 = vpop.f32.mrb[142].mxu0 }
 0x210   :  { %v3086_v58 = vpack.c.bf16 %v2567_v63, %v2566_v11  ;;  %v3559_v62 = vpop.f32.mrb[143].mxu1  ;;  %v2351_v59 = vpop.f32.mrb[143].mxu0 }
 0x211   :  { %v3081_v6 = vpack.c.bf16 %v2565_v57, %v2564_v34  ;;  %v2196_v39 = vadd.f32 %v3557_v1, %v4880_v26  ;;  %v2497_v61 = vmul.f32 %v4894_v14, %v2349_v21  ;;  %v3560_v13 = vadd.f32 %v3559_v62, %v3558_v52 }
 0x212   :  { %3110 = vst [vmem:[%s5067_s4 + $0x68] sm:$0xff] %v3086_v58   ;;  %v2352_v4 = vadd.f32 %v2351_v59, %v2191_v28 }
 0x213   :  { %3109 = vst [vmem:[%s5067_s4 + $0x60] sm:$0xff] %v3081_v6   ;;  %v2357_v12 = vadd.f32 %v3631_v2, %v2196_v39  ;;  %v2199_v23 = vadd.f32 %v3560_v13, %v4886_v24  ;;  %v2536_v54 = vadd.f32 %v4900_v56, %v2497_v61 }
 0x214   :  { %v2498_v3 = vmul.f32 %v4894_v14, %v2352_v4 }
 0x215   :  { %v2499_v26 = vmul.f32 %v4894_v14, %v2357_v12  ;;  %v2360_v16 = vadd.f32 %v3632_v36, %v2199_v23  ;;  %v2568_v37 = vmax.f32 %v2536_v54, 0.0 }
 0x216   :  { %v2537_v50 = vadd.f32 %v4900_v56, %v2498_v3 }
 0x217   :  { %v2538_v31 = vadd.f32 %v4900_v56, %v2499_v26  ;;  %v2500_v22 = vmul.f32 %v4894_v14, %v2360_v16 }
 0x218   :  { %v2569_v8 = vmax.f32 %v2537_v50, 0.0 }
 0x219   :  { %v2539_v40 = vadd.f32 %v4900_v56, %v2500_v22  ;;  %v2570_v15 = vmax.f32 %v2538_v31, 0.0 }
 0x21a   :  { %v3091_v0 = vpack.c.bf16 %v2569_v8, %v2568_v37 }
 0x21b   :  { %v2571_v24 = vmax.f32 %v2539_v40, 0.0 }
 0x21c   :  { %3111 = vst [vmem:[%s5067_s4 + $0x70] sm:$0xff] %v3091_v0  }
 0x21d   :  { %v3096_v32 = vpack.c.bf16 %v2571_v24, %v2570_v15 }
 0x21f   :  { %3112 = vst [vmem:[%s5067_s4 + $0x78] sm:$0xff] %v3096_v32  }

// kernel: mva_net_forward.25
= control target key start
LH: loop header
LB: loop body
LE: loop exit
PB: predicated region body
PF: predicated region fallthrough
CT: control target
= control target key end

     0   :  { %s5031_s1 = inlined_call_operand.vmem [shape: bf16[1152,128], index: 1, kind: input, shape index: {}]   ;;  %s5032_s0 = inlined_call_operand.vmem [shape: bf16[256,1152], index: 0, kind: input, shape index: {}]   ;;  %s5033_s2 = inlined_call_operand.vmem [shape: f32[1,128], index: 2, kind: input, shape index: {}]   ;;  %s5034_s3 = inlined_call_operand.vmem [shape: f32[1,128], index: 3, kind: input, shape index: {}]   ;;  %s5035_s4 = inlined_call_operand.vmem [shape: bf16[256,128], index: 4, kind: output, shape index: {}]  }
   0x1   :  { %v3617_v0 = vld [vmem:[%s5031_s1 + $0x40] sm:$0xff]   ;;  %v3619_v2 = vld [vmem:[%s5031_s1 + $0x48] sm:$0xff]   ;;  %v3621_v4 = vld [vmem:[%s5031_s1 + $0x50] sm:$0xff]  }
   0x2   :  { %v3618_v1 = vld [vmem:[%s5031_s1] sm:$0xff]   ;;  %3081 = vmatprep.subr.bf16.mxu0 %v3617_v0  ;;  %3601 = vmatprep.subr.bf16.mxu1 %v3617_v0  ;;  %v3620_v3 = vld [vmem:[%s5031_s1 + $0x8] sm:$0xff]   ;;  %v3622_v5 = vld [vmem:[%s5031_s1 + $0x10] sm:$0xff]  }
   0x3   :  { %3082 = vmatpush3.bf16.msra.mxu0 %v3618_v1  ;;  %3609 = vmatpush3.bf16.msra.mxu1 %v3618_v1  ;;  %v3623_v6 = vld [vmem:[%s5031_s1 + $0x58] sm:$0xff]   ;;  %v3625_v8 = vld [vmem:[%s5031_s1 + $0x60] sm:$0xff]   ;;  %v3627_v10 = vld [vmem:[%s5031_s1 + $0x68] sm:$0xff]  }
   0x4   :  { %3083 = vmatprep.subr.bf16.mxu0 %v3619_v2  ;;  %3602 = vmatprep.subr.bf16.mxu1 %v3619_v2  ;;  %v3624_v7 = vld [vmem:[%s5031_s1 + $0x18] sm:$0xff]   ;;  %v3626_v9 = vld [vmem:[%s5031_s1 + $0x20] sm:$0xff]   ;;  %v3628_v13 = vld [vmem:[%s5031_s1 + $0x28] sm:$0xff]  }
   0x5   :  { %v3635_v11 = vld [vmem:[%s5032_s0 + $0x4] ss:$36 sps:$4 sm:$0xff]   ;;  %v3629_v14 = vld [vmem:[%s5031_s1 + $0x70] sm:$0xff]   ;;  %v3631_v16 = vld [vmem:[%s5031_s1 + $0x78] sm:$0xff]  }
   0x6   :  { %v3638_v12 = vld [vmem:[%s5032_s0 + $0x364] ss:$36 sps:$4 sm:$0xff]   ;;  %1590 = vmatprep.mubr.bf16.mxu0 %v3635_v11  ;;  %v3630_v15 = vld [vmem:[%s5031_s1 + $0x30] sm:$0xff]   ;;  %v3632_v17 = vld [vmem:[%s5031_s1 + $0x38] sm:$0xff]  }
   0x7   :  { %3084 = vmatpush3.bf16.msra.mxu0 %v3620_v3  ;;  %3610 = vmatpush3.bf16.msra.mxu1 %v3620_v3  ;;  %v3639_v18 = vld [vmem:[%s5031_s1 + $0xc0] sm:$0xff]   ;;  %v3641_v23 = vld [vmem:[%s5031_s1 + $0xc8] sm:$0xff]   ;;  %v3651_v31 = vld [vmem:[%s5031_s1 + $0xd0] sm:$0xff]  }
   0x8   :  { %3085 = vmatprep.subr.bf16.mxu0 %v3621_v4  ;;  %3603 = vmatprep.subr.bf16.mxu1 %v3621_v4  ;;  %v3633_v19 = vld [vmem:[%s5032_s0] ss:$36 sps:$4 sm:$0xff]   ;;  %v3645_v25 = vld [vmem:[%s5032_s0 + $0x4c] ss:$36 sps:$4 sm:$0xff]   ;;  %v3653_v34 = vld [vmem:[%s5031_s1 + $0xd8] sm:$0xff]  }
   0x9   :  { %1686 = vmatprep.mubr.bf16.mxu1 %v3638_v12  ;;  %v3636_v20 = vld [vmem:[%s5032_s0 + $0x360] ss:$36 sps:$4 sm:$0xff]   ;;  %v3647_v26 = vld [vmem:[%s5032_s0 + $0x3ac] ss:$36 sps:$4 sm:$0xff]   ;;  %v3655_v35 = vld [vmem:[%s5032_s0 + $0x94] ss:$36 sps:$4 sm:$0xff]  }
   0xa   :  { %v3642_v21 = vld [vmem:[%s5031_s1 + $0x140] sm:$0xff]   ;;  %v3643_v27 = vld [vmem:[%s5031_s1 + $0x88] sm:$0xff]   ;;  %v3652_v32 = vld [vmem:[%s5031_s1 + $0x90] sm:$0xff]  }
   0xb   :  { %3086 = vmatpush3.bf16.msra.mxu0 %v3622_v5  ;;  %3611 = vmatpush3.bf16.msra.mxu1 %v3622_v5  ;;  %v3640_v22 = vld [vmem:[%s5031_s1 + $0x80] sm:$0xff]   ;;  %v3662_v28 = vld [vmem:[%s5031_s1 + $0x148] sm:$0xff]   ;;  %v3657_v36 = vld [vmem:[%s5032_s0 + $0x3f4] ss:$36 sps:$4 sm:$0xff]  }
   0xc   :  { %3087 = vmatprep.subr.bf16.mxu0 %v3623_v6  ;;  %3604 = vmatprep.subr.bf16.mxu1 %v3623_v6  ;;  %v3644_v24 = vld [vmem:[%s5031_s1 + $0x100] sm:$0xff]   ;;  %v3649_v29 = vld [vmem:[%s5032_s0 + $0x48] ss:$36 sps:$4 sm:$0xff]   ;;  %v3654_v37 = vld [vmem:[%s5031_s1 + $0x98] sm:$0xff]  }
   0xd   :  { %v3650_v30 = vld [vmem:[%s5032_s0 + $0x3a8] ss:$36 sps:$4 sm:$0xff]   ;;  %v3659_v38 = vld [vmem:[%s5032_s0 + $0x90] ss:$36 sps:$4 sm:$0xff]   ;;  %v3661_v40 = vld [vmem:[%s5031_s1 + $0xe0] sm:$0xff]  }
   0xe   :  { %v3664_v33 = vld [vmem:[%s5031_s1 + $0x108] sm:$0xff]   ;;  %v3660_v39 = vld [vmem:[%s5032_s0 + $0x3f0] ss:$36 sps:$4 sm:$0xff]   ;;  %v3663_v41 = vld [vmem:[%s5031_s1 + $0xa0] sm:$0xff]  }
   0xf   :  { %3088 = vmatpush3.bf16.msra.mxu0 %v3624_v7  ;;  %3612 = vmatpush3.bf16.msra.mxu1 %v3624_v7  ;;  %v3665_v42 = vld [vmem:[%s5031_s1 + $0xe8] sm:$0xff]   ;;  %v3676_v43 = vld [vmem:[%s5031_s1 + $0x150] sm:$0xff]   ;;  %v3667_v44 = vld [vmem:[%s5032_s0 + $0xdc] ss:$36 sps:$4 sm:$0xff]  }
  0x10   :  { %3089 = vmatprep.subr.bf16.mxu0 %v3625_v8  ;;  %3605 = vmatprep.subr.bf16.mxu1 %v3625_v8  ;;  %v3669_v45 = vld [vmem:[%s5032_s0 + $0x43c] ss:$36 sps:$4 sm:$0xff]   ;;  %v3678_v46 = vld [vmem:[%s5031_s1 + $0x110] sm:$0xff]   ;;  %v3666_v47 = vld [vmem:[%s5031_s1 + $0xa8] sm:$0xff]  }
  0x11   :  { %v3673_v48 = vld [vmem:[%s5031_s1 + $0xf0] sm:$0xff]   ;;  %v3671_v49 = vld [vmem:[%s5032_s0 + $0xd8] ss:$36 sps:$4 sm:$0xff]   ;;  %v3679_v53 = vld [vmem:[%s5032_s0 + $0x124] ss:$36 sps:$4 sm:$0xff]  }
  0x12   :  { %v3672_v50 = vld [vmem:[%s5032_s0 + $0x438] ss:$36 sps:$4 sm:$0xff]   ;;  %v3674_v51 = vld [vmem:[%s5031_s1 + $0xb0] sm:$0xff]   ;;  %v3681_v58 = vld [vmem:[%s5032_s0 + $0x8] ss:$36 sps:$4 sm:$0xff]  }
  0x13   :  { %3090 = vmatpush3.bf16.msra.mxu0 %v3626_v9  ;;  %3613 = vmatpush3.bf16.msra.mxu1 %v3626_v9  ;;  %v3675_v52 = vld [vmem:[%s5031_s1 + $0xf8] sm:$0xff]   ;;  %v3683_v54 = vld [vmem:[%s5032_s0 + $0xc] ss:$36 sps:$4 sm:$0xff]   ;;  %v3684_v59 = vld [vmem:[%s5032_s0 + $0x120] ss:$36 sps:$4 sm:$0xff]  }
  0x14   :  { %3091 = vmatprep.subr.bf16.mxu0 %v3627_v10  ;;  %3606 = vmatprep.subr.bf16.mxu1 %v3627_v10  ;;  %v3693_v55 = vld [vmem:[%s5031_s1 + $0x158] sm:$0xff]   ;;  %v3685_v60 = vld [vmem:[%s5031_s1 + $0x1c0] sm:$0xff]   ;;  %v3687_v62 = vld [vmem:[%s5032_s0 + $0x16c] ss:$36 sps:$4 sm:$0xff]  }
  0x15   :  { %v3694_v56 = vld [vmem:[%s5031_s1 + $0x118] sm:$0xff]   ;;  %v3686_v61 = vld [vmem:[%s5031_s1 + $0x180] sm:$0xff]   ;;  %v3701_v1 = vld [vmem:[%s5031_s1 + $0x1c8] sm:$0xff]  }
  0x16   :  { %v3677_v57 = vld [vmem:[%s5031_s1 + $0xb8] sm:$0xff]   ;;  %v3703_v0 = vld [vmem:[%s5031_s1 + $0x160] sm:$0xff]   ;;  %v3702_v3 = vld [vmem:[%s5031_s1 + $0x188] sm:$0xff]  }
  0x17   :  { %3092 = vmatpush3.bf16.msra.mxu0 %v3628_v13  ;;  %3614 = vmatpush3.bf16.msra.mxu1 %v3628_v13  ;;  %v3689_v63 = vld [vmem:[%s5032_s0 + $0x54] ss:$36 sps:$4 sm:$0xff]   ;;  %v3704_v2 = vld [vmem:[%s5031_s1 + $0x120] sm:$0xff]   ;;  %v3691_v4 = vld [vmem:[%s5032_s0 + $0x168] ss:$36 sps:$4 sm:$0xff]  }
  0x18   :  { %3093 = vmatprep.subr.bf16.mxu0 %v3629_v14  ;;  %3607 = vmatprep.subr.bf16.mxu1 %v3629_v14  ;;  %v3692_v5 = vld [vmem:[%s5032_s0 + $0x50] ss:$36 sps:$4 sm:$0xff]   ;;  %v3697_v7 = vld [vmem:[%s5032_s0 + $0x9c] ss:$36 sps:$4 sm:$0xff]   ;;  %v3717_v8 = vld [vmem:[%s5031_s1 + $0x168] sm:$0xff]  }
  0x19   :  { %v3695_v6 = vld [vmem:[%s5032_s0 + $0x1b4] ss:$36 sps:$4 sm:$0xff]   ;;  %v3719_v10 = vld [vmem:[%s5031_s1 + $0x128] sm:$0xff]   ;;  %v3705_v14 = vld [vmem:[%s5032_s0 + $0x1fc] ss:$36 sps:$4 sm:$0xff]  }
  0x1a   :  { %v3718_v9 = vld [vmem:[%s5031_s1 + $0x1d0] sm:$0xff]   ;;  %v3700_v13 = vld [vmem:[%s5032_s0 + $0x98] ss:$36 sps:$4 sm:$0xff]  }
  0x1b   :  { %3094 = vmatpush3.bf16.msra.mxu0 %v3630_v15  ;;  %3615 = vmatpush3.bf16.msra.mxu1 %v3630_v15  ;;  %v3720_v11 = vld [vmem:[%s5031_s1 + $0x190] sm:$0xff]  }
  0x1c   :  { %3095 = vmatprep.subr.bf16.mxu0 %v3631_v16  ;;  %3608 = vmatprep.subr.bf16.mxu1 %v3631_v16  ;;  %v3699_v12 = vld [vmem:[%s5032_s0 + $0x1b0] ss:$36 sps:$4 sm:$0xff]  }
  0x1d   :  { %v3727_v15 = vld [vmem:[%s5031_s1 + $0x170] sm:$0xff]  }
  0x1e   :  { %v3728_v16 = vld [vmem:[%s5031_s1 + $0x130] sm:$0xff]  }
  0x1f   :  { %3096 = vmatpush3.bf16.msra.mxu0 %v3632_v17  ;;  %3616 = vmatpush3.bf16.msra.mxu1 %v3632_v17  ;;  %v3707_v17 = vld [vmem:[%s5032_s0 + $0xe4] ss:$36 sps:$4 sm:$0xff]  }
  0x20   :  { %3193 = vmatprep.subr.bf16.mxu1 %v3639_v18  ;;  %3305 = vmatprep.subr.bf16.mxu0 %v3642_v21  ;;  %v3735_v18 = vld [vmem:[%s5031_s1 + $0x1d8] sm:$0xff]   ;;  %v3710_v21 = vld [vmem:[%s5032_s0 + $0xe0] ss:$36 sps:$4 sm:$0xff]  }
  0x22   :  { %1591 = vmatmul.mubr.bf16.vlgmr.msra.gmra.mrb[0].mxu0 %v3633_v19  ;;  %1687 = vmatmul.mubr.bf16.vlgmr.msra.gmra.mrb[0].mxu1 %v3636_v20  ;;  %v3736_v19 = vld [vmem:[%s5031_s1 + $0x198] sm:$0xff]  }
  0x23   :  { %3194 = vmatpush3.bf16.msra.mxu1 %v3640_v22  ;;  %3306 = vmatpush3.bf16.msra.mxu0 %v3644_v24  ;;  %v3709_v20 = vld [vmem:[%s5032_s0 + $0x1f8] ss:$36 sps:$4 sm:$0xff]   ;;  %v3711_v22 = vld [vmem:[%s5032_s0 + $0x244] ss:$36 sps:$4 sm:$0xff]  }
  0x24   :  { %3195 = vmatprep.subr.bf16.mxu1 %v3641_v23  ;;  %1598 = vmatprep.mubr.bf16.mxu0 %v3645_v25  ;;  %v3713_v23 = vld [vmem:[%s5032_s0 + $0x12c] ss:$36 sps:$4 sm:$0xff]   ;;  %v3743_v24 = vld [vmem:[%s5031_s1 + $0x178] sm:$0xff]  }
  0x25   :  { %1694 = vmatprep.mubr.bf16.mxu1 %v3647_v26  ;;  %3307 = vmatprep.subr.bf16.mxu0 %v3662_v28  ;;  %v3744_v25 = vld [vmem:[%s5031_s1 + $0x138] sm:$0xff]   ;;  %v3751_v26 = vld [vmem:[%s5031_s1 + $0x1e0] sm:$0xff]  }
  0x26   :  { %v3752_v28 = vld [vmem:[%s5031_s1 + $0x1a0] sm:$0xff]  }
  0x27   :  { %3196 = vmatpush3.bf16.msra.mxu1 %v3643_v27  ;;  %3308 = vmatpush3.bf16.msra.mxu0 %v3664_v33  ;;  %v3715_v27 = vld [vmem:[%s5032_s0 + $0x240] ss:$36 sps:$4 sm:$0xff]   ;;  %v3766_v33 = vld [vmem:[%s5031_s1 + $0x1e8] sm:$0xff]  }
  0x28   :  { %3197 = vmatprep.subr.bf16.mxu1 %v3651_v31  ;;  %3309 = vmatprep.subr.bf16.mxu0 %v3676_v43  ;;  %v3721_v31 = vld [vmem:[%s5032_s0 + $0x28c] ss:$36 sps:$4 sm:$0xff]   ;;  %v3737_v43 = vld [vmem:[%s5032_s0 + $0x31c] ss:$36 sps:$4 sm:$0xff]  }
  0x2a   :  { %1599 = vmatmul.mubr.bf16.gmra.mrb[4].mxu0 %v3649_v29  ;;  %1695 = vmatmul.mubr.bf16.gmra.mrb[4].mxu1 %v3650_v30  ;;  %v3753_v29 = vld [vmem:[%s5031_s1 + $0x200] sm:$0xff]   ;;  %v3716_v30 = vld [vmem:[%s5032_s0 + $0x128] ss:$36 sps:$4 sm:$0xff]  }
  0x2b   :  { %3198 = vmatpush3.bf16.msra.mxu1 %v3652_v32  ;;  %1606 = vmatprep.mubr.bf16.mxu0 %v3655_v35  ;;  %v3723_v32 = vld [vmem:[%s5032_s0 + $0x174] ss:$36 sps:$4 sm:$0xff]   ;;  %v3767_v35 = vld [vmem:[%s5031_s1 + $0x1a8] sm:$0xff]  }
  0x2c   :  { %3199 = vmatprep.subr.bf16.mxu1 %v3653_v34  ;;  %1702 = vmatprep.mubr.bf16.mxu1 %v3657_v36  ;;  %v3725_v34 = vld [vmem:[%s5032_s0 + $0x288] ss:$36 sps:$4 sm:$0xff]   ;;  %v3726_v36 = vld [vmem:[%s5032_s0 + $0x170] ss:$36 sps:$4 sm:$0xff]  }
  0x2d   :  { %3310 = vmatpush3.bf16.msra.mxu0 %v3678_v46  ;;  %v3742_v46 = vld [vmem:[%s5032_s0 + $0x200] ss:$36 sps:$4 sm:$0xff]  }
  0x2e   :  { %3311 = vmatprep.subr.bf16.mxu0 %v3693_v55  ;;  %v3768_v55 = vld [vmem:[%s5031_s1 + $0x208] sm:$0xff]  }
  0x2f   :  { %3200 = vmatpush3.bf16.msra.mxu1 %v3654_v37  ;;  %v3729_v37 = vld [vmem:[%s5032_s0 + $0x2d4] ss:$36 sps:$4 sm:$0xff]  }
  0x30   :  { %3201 = vmatprep.subr.bf16.mxu1 %v3661_v40  ;;  %v3734_v40 = vld [vmem:[%s5032_s0 + $0x1b8] ss:$36 sps:$4 sm:$0xff]  }
  0x31   :  { %3312 = vmatpush3.bf16.msra.mxu0 %v3694_v56  ;;  %v3783_v56 = vld [vmem:[%s5031_s1 + $0x210] sm:$0xff]  }
  0x32   :  { %1607 = vmatmul.mubr.bf16.gmra.mrb[8].mxu0 %v3659_v38  ;;  %1703 = vmatmul.mubr.bf16.gmra.mrb[8].mxu1 %v3660_v39  ;;  %v3731_v38 = vld [vmem:[%s5032_s0 + $0x1bc] ss:$36 sps:$4 sm:$0xff]   ;;  %v3733_v39 = vld [vmem:[%s5032_s0 + $0x2d0] ss:$36 sps:$4 sm:$0xff]  }
  0x33   :  { %3202 = vmatpush3.bf16.msra.mxu1 %v3663_v41  ;;  %1614 = vmatprep.mubr.bf16.mxu0 %v3667_v44  ;;  %v3781_v41 = vld [vmem:[%s5031_s1 + $0x1f0] sm:$0xff]   ;;  %v3739_v44 = vld [vmem:[%s5032_s0 + $0x204] ss:$36 sps:$4 sm:$0xff]  }
  0x34   :  { %3203 = vmatprep.subr.bf16.mxu1 %v3665_v42  ;;  %1710 = vmatprep.mubr.bf16.mxu1 %v3669_v45  ;;  %v3782_v42 = vld [vmem:[%s5031_s1 + $0x1b0] sm:$0xff]   ;;  %v3741_v45 = vld [vmem:[%s5032_s0 + $0x318] ss:$36 sps:$4 sm:$0xff]  }
  0x35   :  { %3313 = vmatprep.subr.bf16.mxu0 %v3703_v0  ;;  %v3765_v0 = vld [vmem:[%s5032_s0 + $0xa0] ss:$36 sps:$4 sm:$0xff]  }
  0x36   :  { %3314 = vmatpush3.bf16.msra.mxu0 %v3704_v2  ;;  %v3771_v2 = vld [vmem:[%s5032_s0 + $0xec] ss:$36 sps:$4 sm:$0xff]  }
  0x37   :  { %3204 = vmatpush3.bf16.msra.mxu1 %v3666_v47  ;;  %3315 = vmatprep.subr.bf16.mxu0 %v3717_v8  ;;  %v3796_v47 = vld [vmem:[%s5031_s1 + $0x1f8] sm:$0xff]  }
  0x38   :  { %3205 = vmatprep.subr.bf16.mxu1 %v3673_v48  ;;  %v3797_v48 = vld [vmem:[%s5031_s1 + $0x1b8] sm:$0xff]  }
  0x39   :  { %v3777_v8 = vld [vmem:[%s5032_s0 + $0x134] ss:$36 sps:$4 sm:$0xff]  }
  0x3a   :  { %1615 = vmatmul.mubr.bf16.gmra.mrb[12].mxu0 %v3671_v49  ;;  %1711 = vmatmul.mubr.bf16.gmra.mrb[12].mxu1 %v3672_v50  ;;  %v3745_v49 = vld [vmem:[%s5032_s0 + $0x24c] ss:$36 sps:$4 sm:$0xff]   ;;  %v3749_v50 = vld [vmem:[%s5032_s0 + $0x14] ss:$36 sps:$4 sm:$0xff]  }
  0x3b   :  { %3206 = vmatpush3.bf16.msra.mxu1 %v3674_v51  ;;  %1622 = vmatprep.mubr.bf16.mxu0 %v3679_v53  ;;  %v3747_v51 = vld [vmem:[%s5032_s0 + $0x10] ss:$36 sps:$4 sm:$0xff]  }
  0x3c   :  { %3207 = vmatprep.subr.bf16.mxu1 %v3675_v52  ;;  %1751 = vmatprep.mubr.bf16.mxu1 %v3683_v54  ;;  %v3750_v52 = vld [vmem:[%s5032_s0 + $0x248] ss:$36 sps:$4 sm:$0xff]   ;;  %v3754_v53 = vld [vmem:[%s5032_s0 + $0x294] ss:$36 sps:$4 sm:$0xff]   ;;  %v3756_v54 = vld [vmem:[%s5032_s0 + $0x5c] ss:$36 sps:$4 sm:$0xff]  }
  0x3d   :  { %3316 = vmatpush3.bf16.msra.mxu0 %v3719_v10  ;;  %v3779_v10 = vld [vmem:[%s5032_s0 + $0x368] ss:$36 sps:$4 sm:$0xff]  }
  0x3e   :  { %3317 = vmatprep.subr.bf16.mxu0 %v3727_v15  ;;  %v3789_v15 = vld [vmem:[%s5032_s0 + $0x178] ss:$36 sps:$4 sm:$0xff]  }
  0x3f   :  { %3208 = vmatpush3.bf16.msra.mxu1 %v3677_v57  ;;  %v3758_v57 = vld [vmem:[%s5032_s0 + $0x290] ss:$36 sps:$4 sm:$0xff]  }
  0x40   :  { %3417 = vmatprep.subr.bf16.mxu1 %v3685_v60  ;;  %v3762_v60 = vld [vmem:[%s5032_s0 + $0xa4] ss:$36 sps:$4 sm:$0xff]  }
  0x41   :  { %3318 = vmatpush3.bf16.msra.mxu0 %v3728_v16  ;;  %v3790_v16 = vld [vmem:[%s5032_s0 + $0x3fc] ss:$36 sps:$4 sm:$0xff]  }
  0x42   :  { %1623 = vmatmul.mubr.bf16.gmra.mrb[16].mxu0 %v3684_v59  ;;  %1752 = vmatmul.mubr.bf16.vlgmr.msra.gmra.mrb[16].mxu1 %v3681_v58  ;;  %v3759_v58 = vld [vmem:[%s5032_s0 + $0x58] ss:$36 sps:$4 sm:$0xff]  }
  0x43   :  { %3418 = vmatpush3.bf16.msra.mxu1 %v3686_v61  ;;  %1630 = vmatprep.mubr.bf16.mxu0 %v3687_v62  ;;  %v3760_v59 = vld [vmem:[%s5032_s0 + $0x2dc] ss:$36 sps:$4 sm:$0xff]  }
  0x44   :  { %1759 = vmatprep.mubr.bf16.mxu1 %v3689_v63  ;;  %3419 = vmatprep.subr.bf16.mxu1 %v3701_v1  ;;  %v3798_v61 = vld [vmem:[%s5031_s1 + $0x218] sm:$0xff]   ;;  %v3811_v62 = vld [vmem:[%s5031_s1 + $0x220] sm:$0xff]  }
  0x45   :  { %3319 = vmatprep.subr.bf16.mxu0 %v3743_v24  ;;  %v3764_v63 = vld [vmem:[%s5032_s0 + $0x2d8] ss:$36 sps:$4 sm:$0xff]   ;;  %v3769_v1 = vld [vmem:[%s5032_s0 + $0x324] ss:$36 sps:$4 sm:$0xff]  }
  0x46   :  { %3320 = vmatpush3.bf16.msra.mxu0 %v3744_v25  ;;  %v3805_v24 = vld [vmem:[%s5032_s0 + $0x254] ss:$36 sps:$4 sm:$0xff]   ;;  %v3809_v25 = vld [vmem:[%s5032_s0 + $0x1c] ss:$36 sps:$4 sm:$0xff]  }
  0x47   :  { %3420 = vmatpush3.bf16.msra.mxu1 %v3702_v3  ;;  %3553 = vmatprep.subr.bf16.mxu0 %v3753_v29  ;;  %v3824_v3 = vld [vmem:[%s5031_s1 + $0x228] sm:$0xff]  }
  0x48   :  { %3421 = vmatprep.subr.bf16.mxu1 %v3718_v9  ;;  %v3850_v9 = vld [vmem:[%s5031_s1 + $0x238] sm:$0xff]  }
  0x4a   :  { %1631 = vmatmul.mubr.bf16.gmra.mrb[20].mxu0 %v3691_v4  ;;  %1760 = vmatmul.mubr.bf16.gmra.mrb[20].mxu1 %v3692_v5  ;;  %v3773_v4 = vld [vmem:[%s5032_s0 + $0x320] ss:$36 sps:$4 sm:$0xff]   ;;  %v3774_v5 = vld [vmem:[%s5032_s0 + $0xe8] ss:$36 sps:$4 sm:$0xff]  }
  0x4b   :  { %1638 = vmatprep.mubr.bf16.mxu0 %v3695_v6  ;;  %1767 = vmatprep.mubr.bf16.mxu1 %v3697_v7  ;;  %v3837_v6 = vld [vmem:[%s5031_s1 + $0x230] sm:$0xff]  }
  0x4c   :  { %3422 = vmatpush3.bf16.msra.mxu1 %v3720_v11  ;;  %v3775_v7 = vld [vmem:[%s5032_s0 + $0x36c] ss:$36 sps:$4 sm:$0xff]  }
  0x4d   :  { %3423 = vmatprep.subr.bf16.mxu1 %v3735_v18  ;;  %v3780_v11 = vld [vmem:[%s5032_s0 + $0x130] ss:$36 sps:$4 sm:$0xff]   ;;  %v3794_v18 = vld [vmem:[%s5032_s0 + $0x3f8] ss:$36 sps:$4 sm:$0xff]  }
  0x50   :  { %3424 = vmatpush3.bf16.msra.mxu1 %v3736_v19  ;;  %v3795_v19 = vld [vmem:[%s5032_s0 + $0x1c0] ss:$36 sps:$4 sm:$0xff]  }
  0x51   :  { %3425 = vmatprep.subr.bf16.mxu1 %v3751_v26  ;;  %v3807_v26 = vld [vmem:[%s5032_s0 + $0x18] ss:$36 sps:$4 sm:$0xff]  }
  0x52   :  { %1639 = vmatmul.mubr.bf16.gmra.mrb[24].mxu0 %v3699_v12  ;;  %1768 = vmatmul.mubr.bf16.gmra.mrb[24].mxu1 %v3700_v13  ;;  %v3784_v12 = vld [vmem:[%s5032_s0 + $0x3b4] ss:$36 sps:$4 sm:$0xff]   ;;  %v3786_v13 = vld [vmem:[%s5032_s0 + $0x17c] ss:$36 sps:$4 sm:$0xff]  }
  0x53   :  { %1646 = vmatprep.mubr.bf16.mxu0 %v3705_v14  ;;  %1775 = vmatprep.mubr.bf16.mxu1 %v3707_v17  ;;  %v3788_v14 = vld [vmem:[%s5032_s0 + $0x3b0] ss:$36 sps:$4 sm:$0xff]   ;;  %v3792_v17 = vld [vmem:[%s5032_s0 + $0x1c4] ss:$36 sps:$4 sm:$0xff]  }
  0x54   :  { %3426 = vmatpush3.bf16.msra.mxu1 %v3752_v28  ;;  %v3812_v28 = vld [vmem:[%s5032_s0 + $0x29c] ss:$36 sps:$4 sm:$0xff]  }
  0x55   :  { %3427 = vmatprep.subr.bf16.mxu1 %v3766_v33  ;;  %v3820_v33 = vld [vmem:[%s5032_s0 + $0xac] ss:$36 sps:$4 sm:$0xff]  }
  0x58   :  { %3428 = vmatpush3.bf16.msra.mxu1 %v3767_v35  ;;  %v3823_v35 = vld [vmem:[%s5032_s0 + $0xa8] ss:$36 sps:$4 sm:$0xff]  }
  0x59   :  { %3429 = vmatprep.subr.bf16.mxu1 %v3781_v41  ;;  %v3833_v41 = vld [vmem:[%s5032_s0 + $0x13c] ss:$36 sps:$4 sm:$0xff]  }
  0x5a   :  { %1647 = vmatmul.mubr.bf16.gmra.mrb[28].mxu0 %v3709_v20  ;;  %1776 = vmatmul.mubr.bf16.gmra.mrb[28].mxu1 %v3710_v21  ;;  %v3799_v20 = vld [vmem:[%s5032_s0 + $0x444] ss:$36 sps:$4 sm:$0xff]   ;;  %v3801_v21 = vld [vmem:[%s5032_s0 + $0x20c] ss:$36 sps:$4 sm:$0xff]  }
  0x5b   :  { %1654 = vmatprep.mubr.bf16.mxu0 %v3711_v22  ;;  %1783 = vmatprep.mubr.bf16.mxu1 %v3713_v23  ;;  %v3803_v22 = vld [vmem:[%s5032_s0 + $0x440] ss:$36 sps:$4 sm:$0xff]   ;;  %v3804_v23 = vld [vmem:[%s5032_s0 + $0x208] ss:$36 sps:$4 sm:$0xff]  }
  0x5c   :  { %3430 = vmatpush3.bf16.msra.mxu1 %v3782_v42  ;;  %v3835_v42 = vld [vmem:[%s5032_s0 + $0x370] ss:$36 sps:$4 sm:$0xff]  }
  0x5d   :  { %3431 = vmatprep.subr.bf16.mxu1 %v3796_v47  ;;  %v3843_v47 = vld [vmem:[%s5032_s0 + $0x180] ss:$36 sps:$4 sm:$0xff]  }
  0x60   :  { %3432 = vmatpush3.bf16.msra.mxu1 %v3797_v48  ;;  %v3844_v48 = vld [vmem:[%s5032_s0 + $0x404] ss:$36 sps:$4 sm:$0xff]  }
  0x62   :  { %1655 = vmatmul.mubr.bf16.gmra.mrb[32].mxu0 %v3715_v27  ;;  %1784 = vmatmul.mubr.bf16.gmra.mrb[32].mxu1 %v3716_v30  ;;  %v3810_v27 = vld [vmem:[%s5032_s0 + $0x250] ss:$36 sps:$4 sm:$0xff]   ;;  %v3816_v30 = vld [vmem:[%s5032_s0 + $0x298] ss:$36 sps:$4 sm:$0xff]  }
  0x63   :  { %1662 = vmatprep.mubr.bf16.mxu0 %v3721_v31  ;;  %1791 = vmatprep.mubr.bf16.mxu1 %v3723_v32  ;;  %v3817_v31 = vld [vmem:[%s5032_s0 + $0x60] ss:$36 sps:$4 sm:$0xff]  }
  0x64   :  { %v3818_v32 = vld [vmem:[%s5032_s0 + $0x2e4] ss:$36 sps:$4 sm:$0xff]  }
  0x6a   :  { %1663 = vmatmul.mubr.bf16.gmra.mrb[36].mxu0 %v3725_v34  ;;  %1792 = vmatmul.mubr.bf16.gmra.mrb[36].mxu1 %v3726_v36  ;;  %v3822_v34 = vld [vmem:[%s5032_s0 + $0x2e0] ss:$36 sps:$4 sm:$0xff]   ;;  %v3825_v36 = vld [vmem:[%s5032_s0 + $0x32c] ss:$36 sps:$4 sm:$0xff]  }
  0x6b   :  { %1670 = vmatprep.mubr.bf16.mxu0 %v3729_v37  ;;  %1799 = vmatprep.mubr.bf16.mxu1 %v3731_v38  ;;  %v3827_v37 = vld [vmem:[%s5032_s0 + $0xf4] ss:$36 sps:$4 sm:$0xff]   ;;  %v3829_v38 = vld [vmem:[%s5032_s0 + $0x328] ss:$36 sps:$4 sm:$0xff]  }
  0x72   :  { %1671 = vmatmul.mubr.bf16.gmra.mrb[40].mxu0 %v3733_v39  ;;  %1800 = vmatmul.mubr.bf16.gmra.mrb[40].mxu1 %v3734_v40  ;;  %v3830_v39 = vld [vmem:[%s5032_s0 + $0xf0] ss:$36 sps:$4 sm:$0xff]  }
  0x73   :  { %1678 = vmatprep.mubr.bf16.mxu0 %v3737_v43  ;;  %1807 = vmatprep.mubr.bf16.mxu1 %v3739_v44  ;;  %v3831_v40 = vld [vmem:[%s5032_s0 + $0x374] ss:$36 sps:$4 sm:$0xff]   ;;  %v3838_v44 = vld [vmem:[%s5032_s0 + $0x3bc] ss:$36 sps:$4 sm:$0xff]  }
  0x74   :  { %v3836_v43 = vld [vmem:[%s5032_s0 + $0x138] ss:$36 sps:$4 sm:$0xff]  }
  0x7a   :  { %1679 = vmatmul.mubr.bf16.gmra.mrb[44].mxu0 %v3741_v45  ;;  %1808 = vmatmul.mubr.bf16.gmra.mrb[44].mxu1 %v3742_v46  ;;  %v3840_v45 = vld [vmem:[%s5032_s0 + $0x184] ss:$36 sps:$4 sm:$0xff]   ;;  %v3842_v46 = vld [vmem:[%s5032_s0 + $0x3b8] ss:$36 sps:$4 sm:$0xff]  }
  0x7b   :  { %1815 = vmatprep.mubr.bf16.mxu1 %v3745_v49  ;;  %1912 = vmatprep.mubr.bf16.mxu0 %v3749_v50  ;;  %v3846_v49 = vld [vmem:[%s5032_s0 + $0x1cc] ss:$36 sps:$4 sm:$0xff]   ;;  %v3848_v50 = vld [vmem:[%s5032_s0 + $0x400] ss:$36 sps:$4 sm:$0xff]  }
  0x82   :  { %1816 = vmatmul.mubr.bf16.gmra.mrb[48].mxu1 %v3750_v52  ;;  %1913 = vmatmul.mubr.bf16.vlgmr.msra.gmra.mrb[48].mxu0 %v3747_v51  ;;  %v3849_v51 = vld [vmem:[%s5032_s0 + $0x1c8] ss:$36 sps:$4 sm:$0xff]  }
  0x83   :  { %3554 = vmatpush3.bf16.msra.mxu0 %v3753_v29  ;;  %1823 = vmatprep.mubr.bf16.mxu1 %v3754_v53  ;;  %v3814_v29 = vld [vmem:[%s5032_s0 + $0x64] ss:$36 sps:$4 sm:$0xff]   ;;  %v3851_v52 = vld [vmem:[%s5032_s0 + $0x44c] ss:$36 sps:$4 sm:$0xff]   ;;  %v3853_v53 = vld [vmem:[%s5032_s0 + $0x214] ss:$36 sps:$4 sm:$0xff]  }
  0x84   :  { %1920 = vmatprep.mubr.bf16.mxu0 %v3756_v54  ;;  %3555 = vmatprep.subr.bf16.mxu0 %v3768_v55 }
  0x87   :  { %3556 = vmatpush3.bf16.msra.mxu0 %v3768_v55 }
  0x88   :  { %3557 = vmatprep.subr.bf16.mxu0 %v3783_v56 }
  0x8a   :  { %1824 = vmatmul.mubr.bf16.gmra.mrb[52].mxu1 %v3758_v57  ;;  %1921 = vmatmul.mubr.bf16.gmra.mrb[52].mxu0 %v3759_v58  ;;  %v3855_v58 = vld [vmem:[%s5032_s0 + $0x448] ss:$36 sps:$4 sm:$0xff]  }
  0x8b   :  { %1831 = vmatprep.mubr.bf16.mxu1 %v3760_v59  ;;  %1928 = vmatprep.mubr.bf16.mxu0 %v3762_v60  ;;  %v3856_v59 = vld [vmem:[%s5032_s0 + $0x210] ss:$36 sps:$4 sm:$0xff]  }
  0x8c   :  { %3558 = vmatpush3.bf16.msra.mxu0 %v3783_v56 }
  0x8d   :  { %3559 = vmatprep.subr.bf16.mxu0 %v3798_v61 }
  0x90   :  { %3560 = vmatpush3.bf16.msra.mxu0 %v3798_v61 }
  0x91   :  { %3561 = vmatprep.subr.bf16.mxu0 %v3811_v62 }
  0x92   :  { %1832 = vmatmul.mubr.bf16.gmra.mrb[56].mxu1 %v3764_v63  ;;  %1929 = vmatmul.mubr.bf16.gmra.mrb[56].mxu0 %v3765_v0  ;;  %v3857_v0 = vld [vmem:[%s5032_s0 + $0x25c] ss:$36 sps:$4 sm:$0xff]  }
  0x93   :  { %1839 = vmatprep.mubr.bf16.mxu1 %v3769_v1  ;;  %1936 = vmatprep.mubr.bf16.mxu0 %v3771_v2  ;;  %v3859_v1 = vld [vmem:[%s5032_s0 + $0x20] ss:$36 sps:$4 sm:$0xff]  }
  0x94   :  { %3562 = vmatpush3.bf16.msra.mxu0 %v3811_v62 }
  0x95   :  { %3563 = vmatprep.subr.bf16.mxu0 %v3824_v3 }
  0x98   :  { %3564 = vmatpush3.bf16.msra.mxu0 %v3824_v3 }
  0x99   :  { %3565 = vmatprep.subr.bf16.mxu0 %v3837_v6 }
  0x9a   :  { %1840 = vmatmul.mubr.bf16.gmra.mrb[60].mxu1 %v3773_v4  ;;  %1937 = vmatmul.mubr.bf16.gmra.mrb[60].mxu0 %v3774_v5 }
  0x9b   :  { %1847 = vmatprep.mubr.bf16.mxu1 %v3775_v7  ;;  %1944 = vmatprep.mubr.bf16.mxu0 %v3777_v8 }
  0x9c   :  { %3566 = vmatpush3.bf16.msra.mxu0 %v3837_v6 }
  0x9d   :  { %3567 = vmatprep.subr.bf16.mxu0 %v3850_v9 }
  0xa0   :  { %3568 = vmatpush3.bf16.msra.mxu0 %v3850_v9 }
  0xa2   :  { %1848 = vmatmul.mubr.bf16.gmra.mrb[64].mxu1 %v3779_v10  ;;  %1945 = vmatmul.mubr.bf16.gmra.mrb[64].mxu0 %v3780_v11  ;;  %v3860_v10 = vld [vmem:[%s5032_s0 + $0x258] ss:$36 sps:$4 sm:$0xff]   ;;  %v3861_v11 = vld [vmem:[%s5032_s0 + $0x68] ss:$36 sps:$4 sm:$0xff]  }
  0xa3   :  { %1855 = vmatprep.mubr.bf16.mxu1 %v3784_v12  ;;  %1952 = vmatprep.mubr.bf16.mxu0 %v3786_v13 }
  0xaa   :  { %1856 = vmatmul.mubr.bf16.gmra.mrb[68].mxu1 %v3788_v14  ;;  %1953 = vmatmul.mubr.bf16.gmra.mrb[68].mxu0 %v3789_v15 }
  0xab   :  { %1863 = vmatprep.mubr.bf16.mxu1 %v3790_v16  ;;  %1960 = vmatprep.mubr.bf16.mxu0 %v3792_v17  ;;  %v3862_v16 = vld [vmem:[%s5032_s0 + $0x2a4] ss:$36 sps:$4 sm:$0xff]   ;;  %v3864_v17 = vld [vmem:[%s5032_s0 + $0xb0] ss:$36 sps:$4 sm:$0xff]  }
  0xb2   :  { %1864 = vmatmul.mubr.bf16.gmra.mrb[72].mxu1 %v3794_v18  ;;  %1961 = vmatmul.mubr.bf16.gmra.mrb[72].mxu0 %v3795_v19 }
  0xb3   :  { %1871 = vmatprep.mubr.bf16.mxu1 %v3799_v20  ;;  %1968 = vmatprep.mubr.bf16.mxu0 %v3801_v21 }
  0xba   :  { %1872 = vmatmul.mubr.bf16.gmra.mrb[76].mxu1 %v3803_v22  ;;  %1969 = vmatmul.mubr.bf16.gmra.mrb[76].mxu0 %v3804_v23 }
  0xbb   :  { %1976 = vmatprep.mubr.bf16.mxu0 %v3805_v24  ;;  %2073 = vmatprep.mubr.bf16.mxu1 %v3809_v25 }
  0xc2   :  { %1977 = vmatmul.mubr.bf16.gmra.mrb[80].mxu0 %v3810_v27  ;;  %2074 = vmatmul.mubr.bf16.vlgmr.msra.gmra.mrb[80].mxu1 %v3807_v26  ;;  %v3865_v26 = vld [vmem:[%s5032_s0 + $0x2a0] ss:$36 sps:$4 sm:$0xff]   ;;  %v3866_v27 = vld [vmem:[%s5032_s0 + $0xf8] ss:$36 sps:$4 sm:$0xff]  }
  0xc3   :  { %1984 = vmatprep.mubr.bf16.mxu0 %v3812_v28  ;;  %2081 = vmatprep.mubr.bf16.mxu1 %v3814_v29 }
  0xca   :  { %1985 = vmatmul.mubr.bf16.gmra.mrb[84].mxu0 %v3816_v30  ;;  %2082 = vmatmul.mubr.bf16.gmra.mrb[84].mxu1 %v3817_v31 }
  0xcb   :  { %1992 = vmatprep.mubr.bf16.mxu0 %v3818_v32  ;;  %2089 = vmatprep.mubr.bf16.mxu1 %v3820_v33  ;;  %v3867_v32 = vld [vmem:[%s5032_s0 + $0x2ec] ss:$36 sps:$4 sm:$0xff]   ;;  %v3869_v33 = vld [vmem:[%s5032_s0 + $0x140] ss:$36 sps:$4 sm:$0xff]  }
  0xd2   :  { %1993 = vmatmul.mubr.bf16.gmra.mrb[88].mxu0 %v3822_v34  ;;  %2090 = vmatmul.mubr.bf16.gmra.mrb[88].mxu1 %v3823_v35 }
  0xd3   :  { %2000 = vmatprep.mubr.bf16.mxu0 %v3825_v36  ;;  %2097 = vmatprep.mubr.bf16.mxu1 %v3827_v37 }
  0xda   :  { %2001 = vmatmul.mubr.bf16.gmra.mrb[92].mxu0 %v3829_v38  ;;  %2098 = vmatmul.mubr.bf16.gmra.mrb[92].mxu1 %v3830_v39 }
  0xdb   :  { %2008 = vmatprep.mubr.bf16.mxu0 %v3831_v40  ;;  %2105 = vmatprep.mubr.bf16.mxu1 %v3833_v41 }
  0xe2   :  { %2009 = vmatmul.mubr.bf16.gmra.mrb[96].mxu0 %v3835_v42  ;;  %2106 = vmatmul.mubr.bf16.gmra.mrb[96].mxu1 %v3836_v43  ;;  %v3870_v42 = vld [vmem:[%s5032_s0 + $0x2e8] ss:$36 sps:$4 sm:$0xff]  }
  0xe3   :  { %2016 = vmatprep.mubr.bf16.mxu0 %v3838_v44  ;;  %2113 = vmatprep.mubr.bf16.mxu1 %v3840_v45  ;;  %v3871_v43 = vld [vmem:[%s5032_s0 + $0x188] ss:$36 sps:$4 sm:$0xff]  }
  0xea   :  { %2017 = vmatmul.mubr.bf16.gmra.mrb[100].mxu0 %v3842_v46  ;;  %2114 = vmatmul.mubr.bf16.gmra.mrb[100].mxu1 %v3843_v47 }
  0xeb   :  { %2024 = vmatprep.mubr.bf16.mxu0 %v3844_v48  ;;  %2121 = vmatprep.mubr.bf16.mxu1 %v3846_v49  ;;  %v3872_v48 = vld [vmem:[%s5032_s0 + $0x334] ss:$36 sps:$4 sm:$0xff]  }
  0xec   :  { %v3874_v49 = vld [vmem:[%s5032_s0 + $0x1d0] ss:$36 sps:$4 sm:$0xff]  }
  0xf2   :  { %2025 = vmatmul.mubr.bf16.gmra.mrb[104].mxu0 %v3848_v50  ;;  %2122 = vmatmul.mubr.bf16.gmra.mrb[104].mxu1 %v3849_v51 }
  0xf3   :  { %2032 = vmatprep.mubr.bf16.mxu0 %v3851_v52  ;;  %2129 = vmatprep.mubr.bf16.mxu1 %v3853_v53 }
  0xf5   :  { %v3169_v54 = vpop.f32.mrb[0].mxu1  ;;  %v3097_v55 = vpop.f32.mrb[0].mxu0 }
  0xf6   :  { %v3170_v56 = vpop.f32.mrb[1].mxu1  ;;  %v3098_v57 = vpop.f32.mrb[1].mxu0 }
  0xf7   :  { %v4474_v60 = vadd.f32 %v3170_v56, %v3169_v54  ;;  %v3172_v61 = vpop.f32.mrb[2].mxu1  ;;  %v4476_v62 = vadd.f32 %v3098_v57, %v3097_v55  ;;  %v3100_v63 = vpop.f32.mrb[2].mxu0 }
  0xf8   :  { %v3173_v2 = vpop.f32.mrb[3].mxu1  ;;  %v3101_v3 = vpop.f32.mrb[3].mxu0 }
  0xf9   :  { %v4484_v4 = vadd.f32 %v3173_v2, %v3172_v61  ;;  %v4486_v5 = vadd.f32 %v3101_v3, %v3100_v63  ;;  %v3877_v2 = vld [vmem:[%s5032_s0 + $0x37c] ss:$36 sps:$4 sm:$0xff]  }
  0xfa   :  { %2033 = vmatmul.mubr.bf16.gmra.mrb[108].mxu0 %v3855_v58  ;;  %2130 = vmatmul.mubr.bf16.gmra.mrb[108].mxu1 %v3856_v59  ;;  %v3875_v58 = vld [vmem:[%s5032_s0 + $0x330] ss:$36 sps:$4 sm:$0xff]   ;;  %v3876_v59 = vld [vmem:[%s5032_s0 + $0x218] ss:$36 sps:$4 sm:$0xff]   ;;  %v3879_v3 = vld [vmem:[%s5032_s0 + $0x260] ss:$36 sps:$4 sm:$0xff]  }
  0xfb   :  { %2137 = vmatprep.mubr.bf16.mxu1 %v3857_v0  ;;  %3569 = vmatprep.mubr.bf16.mxu0 %v3859_v1 }
  0xfd   :  { %v3175_v6 = vpop.f32.mrb[4].mxu1  ;;  %v3103_v7 = vpop.f32.mrb[4].mxu0 }
  0xfe   :  { %v3176_v8 = vpop.f32.mrb[5].mxu1  ;;  %v3104_v9 = vpop.f32.mrb[5].mxu0 }
  0xff   :  { %v4494_v12 = vadd.f32 %v3176_v8, %v3175_v6  ;;  %v3178_v13 = vpop.f32.mrb[6].mxu1  ;;  %v4496_v14 = vadd.f32 %v3104_v9, %v3103_v7  ;;  %v3106_v15 = vpop.f32.mrb[6].mxu0 }
 0x100   :  { %v3179_v18 = vpop.f32.mrb[7].mxu1  ;;  %v3107_v19 = vpop.f32.mrb[7].mxu0 }
 0x101   :  { %v4504_v20 = vadd.f32 %v3179_v18, %v3178_v13  ;;  %v4506_v21 = vadd.f32 %v3107_v19, %v3106_v15  ;;  %v3880_v18 = vld [vmem:[%s5032_s0 + $0x378] ss:$36 sps:$4 sm:$0xff]  }
 0x102   :  { %2138 = vmatmul.mubr.bf16.gmra.mrb[112].mxu1 %v3860_v10  ;;  %3570 = vmatmul.mubr.bf16.vlgmr.msra.gmra.mrb[112].mxu0 %v3861_v11 }
 0x103   :  { %2145 = vmatprep.mubr.bf16.mxu1 %v3862_v16  ;;  %3573 = vmatprep.mubr.bf16.mxu0 %v3864_v17 }
 0x105   :  { %v3181_v22 = vpop.f32.mrb[8].mxu1  ;;  %v3109_v23 = vpop.f32.mrb[8].mxu0 }
 0x106   :  { %v3182_v24 = vpop.f32.mrb[9].mxu1  ;;  %v3110_v25 = vpop.f32.mrb[9].mxu0 }
 0x107   :  { %v4514_v28 = vadd.f32 %v3182_v24, %v3181_v22  ;;  %v3184_v29 = vpop.f32.mrb[10].mxu1  ;;  %v4516_v30 = vadd.f32 %v3110_v25, %v3109_v23  ;;  %v3112_v31 = vpop.f32.mrb[10].mxu0  ;;  %v3882_v24 = vld [vmem:[%s5032_s0 + $0x3c4] ss:$36 sps:$4 sm:$0xff]   ;;  %v3884_v25 = vld [vmem:[%s5032_s0 + $0x2f0] ss:$36 sps:$4 sm:$0xff]  }
 0x108   :  { %v3185_v34 = vpop.f32.mrb[11].mxu1  ;;  %v3113_v35 = vpop.f32.mrb[11].mxu0 }
 0x109   :  { %v4524_v36 = vadd.f32 %v3185_v34, %v3184_v29  ;;  %v4526_v37 = vadd.f32 %v3113_v35, %v3112_v31 }
 0x10a   :  { %2146 = vmatmul.mubr.bf16.gmra.mrb[116].mxu1 %v3865_v26  ;;  %3574 = vmatmul.mubr.bf16.gmra.mrb[116].mxu0 %v3866_v27 }
 0x10b   :  { %2153 = vmatprep.mubr.bf16.mxu1 %v3867_v32  ;;  %3577 = vmatprep.mubr.bf16.mxu0 %v3869_v33 }
 0x10d   :  { %v3187_v38 = vpop.f32.mrb[12].mxu1  ;;  %v3115_v39 = vpop.f32.mrb[12].mxu0 }
 0x10e   :  { %v3188_v40 = vpop.f32.mrb[13].mxu1  ;;  %v3116_v41 = vpop.f32.mrb[13].mxu0 }
 0x10f   :  { %v4534_v44 = vadd.f32 %v3188_v40, %v3187_v38  ;;  %v3190_v45 = vpop.f32.mrb[14].mxu1  ;;  %v4536_v46 = vadd.f32 %v3116_v41, %v3115_v39  ;;  %v3118_v47 = vpop.f32.mrb[14].mxu0  ;;  %v3885_v40 = vld [vmem:[%s5032_s0 + $0x3c0] ss:$36 sps:$4 sm:$0xff]  }
 0x110   :  { %v3191_v50 = vpop.f32.mrb[15].mxu1  ;;  %v3119_v51 = vpop.f32.mrb[15].mxu0 }
 0x111   :  { %v4544_v52 = vadd.f32 %v3191_v50, %v3190_v45  ;;  %v4546_v53 = vadd.f32 %v3119_v51, %v3118_v47  ;;  %v3887_v45 = vld [vmem:[%s5032_s0 + $0x40c] ss:$36 sps:$4 sm:$0xff]   ;;  %v3889_v47 = vld [vmem:[%s5032_s0 + $0x380] ss:$36 sps:$4 sm:$0xff]  }
 0x112   :  { %2154 = vmatmul.mubr.bf16.gmra.mrb[120].mxu1 %v3870_v42  ;;  %3578 = vmatmul.mubr.bf16.gmra.mrb[120].mxu0 %v3871_v43 }
 0x113   :  { %2161 = vmatprep.mubr.bf16.mxu1 %v3872_v48  ;;  %3581 = vmatprep.mubr.bf16.mxu0 %v3874_v49 }
 0x115   :  { %v3209_v54 = vpop.f32.mrb[16].mxu1  ;;  %v3121_v55 = vpop.f32.mrb[16].mxu0 }
 0x116   :  { %v3210_v56 = vpop.f32.mrb[17].mxu1  ;;  %v3122_v57 = vpop.f32.mrb[17].mxu0 }
 0x117   :  { %v3211_v61 = vadd.f32 %v3210_v56, %v3209_v54  ;;  %v3212_v63 = vpop.f32.mrb[18].mxu1  ;;  %v4554_v0 = vadd.f32 %v3122_v57, %v3121_v55  ;;  %v3124_v1 = vpop.f32.mrb[18].mxu0 }
 0x118   :  { %v3213_v6 = vpop.f32.mrb[19].mxu1  ;;  %v3125_v7 = vpop.f32.mrb[19].mxu0 }
 0x119   :  { %v4563_v8 = vadd.f32 %v3211_v61, %v4476_v62  ;;  %v3214_v9 = vadd.f32 %v3213_v6, %v3212_v63  ;;  %v4565_v10 = vadd.f32 %v3125_v7, %v3124_v1  ;;  %v3881_v62 = vld [vmem:[%s5032_s0 + $0x2a8] ss:$36 sps:$4 sm:$0xff]   ;;  %v3894_v6 = vld [vmem:[%s5032_s0 + $0x410] ss:$36 sps:$4 sm:$0xff]  }
 0x11a   :  { %2162 = vmatmul.mubr.bf16.gmra.mrb[124].mxu1 %v3875_v58  ;;  %3582 = vmatmul.mubr.bf16.gmra.mrb[124].mxu0 %v3876_v59  ;;  %v3890_v61 = vld [vmem:[%s5032_s0 + $0x408] ss:$36 sps:$4 sm:$0xff]  }
 0x11b   :  { %v4568_v11 = vadd.f32 %v3214_v9, %v4486_v5  ;;  %2169 = vmatprep.mubr.bf16.mxu1 %v3877_v2  ;;  %3585 = vmatprep.mubr.bf16.mxu0 %v3879_v3  ;;  %v3892_v3 = vld [vmem:[%s5032_s0 + $0x454] ss:$36 sps:$4 sm:$0xff]  }
 0x11d   :  { %v3215_v13 = vpop.f32.mrb[20].mxu1  ;;  %v3127_v15 = vpop.f32.mrb[20].mxu0 }
 0x11e   :  { %v3216_v16 = vpop.f32.mrb[21].mxu1  ;;  %v3128_v17 = vpop.f32.mrb[21].mxu0 }
 0x11f   :  { %v3217_v19 = vadd.f32 %v3216_v16, %v3215_v13  ;;  %v3218_v22 = vpop.f32.mrb[22].mxu1  ;;  %v4576_v23 = vadd.f32 %v3128_v17, %v3127_v15  ;;  %v3130_v5 = vpop.f32.mrb[22].mxu0 }
 0x120   :  { %v3219_v26 = vpop.f32.mrb[23].mxu1  ;;  %v3131_v27 = vpop.f32.mrb[23].mxu0 }
 0x121   :  { %v4585_v29 = vadd.f32 %v3217_v19, %v4496_v14  ;;  %v3220_v31 = vadd.f32 %v3219_v26, %v3218_v22  ;;  %v4587_v32 = vadd.f32 %v3131_v27, %v3130_v5  ;;  %v3886_v14 = vld [vmem:[%s5032_s0 + $0x338] ss:$36 sps:$4 sm:$0xff]   ;;  %v3895_v5 = vld [vmem:[%s5032_s0 + $0x450] ss:$36 sps:$4 sm:$0xff]  }
 0x122   :  { %2170 = vmatmul.mubr.bf16.gmra.mrb[128].mxu1 %v3880_v18  ;;  %3586 = vmatmul.mubr.bf16.gmra.mrb[128].mxu0 %v3881_v62 }
 0x123   :  { %v4590_v33 = vadd.f32 %v3220_v31, %v4506_v21  ;;  %2177 = vmatprep.mubr.bf16.mxu1 %v3882_v24  ;;  %3589 = vmatprep.mubr.bf16.mxu0 %v3884_v25 }
 0x125   :  { %v3221_v34 = vpop.f32.mrb[24].mxu1  ;;  %v3133_v35 = vpop.f32.mrb[24].mxu0 }
 0x126   :  { %v3222_v38 = vpop.f32.mrb[25].mxu1  ;;  %v3134_v39 = vpop.f32.mrb[25].mxu0 }
 0x127   :  { %v3223_v41 = vadd.f32 %v3222_v38, %v3221_v34  ;;  %v3224_v42 = vpop.f32.mrb[26].mxu1  ;;  %v4598_v43 = vadd.f32 %v3134_v39, %v3133_v35  ;;  %v3136_v21 = vpop.f32.mrb[26].mxu0 }
 0x128   :  { %v3225_v48 = vpop.f32.mrb[27].mxu1  ;;  %v3137_v49 = vpop.f32.mrb[27].mxu0 }
 0x129   :  { %v4607_v50 = vadd.f32 %v3223_v41, %v4516_v30  ;;  %v3226_v51 = vadd.f32 %v3225_v48, %v3224_v42  ;;  %v4609_v54 = vadd.f32 %v3137_v49, %v3136_v21  ;;  %v3891_v30 = vld [vmem:[%s5032_s0 + $0x3c8] ss:$36 sps:$4 sm:$0xff]  }
 0x12a   :  { %2178 = vmatmul.mubr.bf16.gmra.mrb[132].mxu1 %v3885_v40  ;;  %3590 = vmatmul.mubr.bf16.gmra.mrb[132].mxu0 %v3886_v14 }
 0x12b   :  { %v4612_v55 = vadd.f32 %v3226_v51, %v4526_v37  ;;  %2185 = vmatprep.mubr.bf16.mxu1 %v3887_v45  ;;  %3593 = vmatprep.mubr.bf16.mxu0 %v3889_v47 }
 0x12d   :  { %v3227_v56 = vpop.f32.mrb[28].mxu1  ;;  %v3139_v57 = vpop.f32.mrb[28].mxu0 }
 0x12e   :  { %v3228_v58 = vpop.f32.mrb[29].mxu1  ;;  %v3140_v59 = vpop.f32.mrb[29].mxu0 }
 0x12f   :  { %v3229_v63 = vadd.f32 %v3228_v58, %v3227_v56  ;;  %v3230_v1 = vpop.f32.mrb[30].mxu1  ;;  %v4620_v2 = vadd.f32 %v3140_v59, %v3139_v57  ;;  %v3142_v37 = vpop.f32.mrb[30].mxu0 }
 0x130   :  { %v3231_v7 = vpop.f32.mrb[31].mxu1  ;;  %v3143_v9 = vpop.f32.mrb[31].mxu0 }
 0x131   :  { %v4629_v13 = vadd.f32 %v3229_v63, %v4536_v46  ;;  %v3232_v15 = vadd.f32 %v3231_v7, %v3230_v1  ;;  %v4631_v16 = vadd.f32 %v3143_v9, %v3142_v37  ;;  %v3896_v46 = vld [vmem:[%s5032_s0 + $0x458] ss:$36 sps:$4 sm:$0xff]  }
 0x132   :  { %2186 = vmatmul.mubr.bf16.gmra.mrb[136].mxu1 %v3890_v61  ;;  %3594 = vmatmul.mubr.bf16.gmra.mrb[136].mxu0 %v3891_v30 }
 0x133   :  { %v4634_v17 = vadd.f32 %v3232_v15, %v4546_v53  ;;  %2193 = vmatprep.mubr.bf16.mxu1 %v3892_v3  ;;  %3597 = vmatprep.mubr.bf16.mxu0 %v3894_v6 }
 0x135   :  { %v3233_v18 = vpop.f32.mrb[32].mxu1  ;;  %v3145_v62 = vpop.f32.mrb[32].mxu0 }
 0x136   :  { %v3234_v19 = vpop.f32.mrb[33].mxu1  ;;  %v3146_v22 = vpop.f32.mrb[33].mxu0 }
 0x137   :  { %v3235_v24 = vadd.f32 %v3234_v19, %v3233_v18  ;;  %v3236_v25 = vpop.f32.mrb[34].mxu1  ;;  %v3147_v26 = vadd.f32 %v3146_v22, %v3145_v62  ;;  %v3148_v27 = vpop.f32.mrb[34].mxu0 }
 0x138   :  { %v3237_v53 = vpop.f32.mrb[35].mxu1  ;;  %v3149_v31 = vpop.f32.mrb[35].mxu0 }
 0x139   :  { %v4643_v34 = vadd.f32 %v3235_v24, %v4554_v0  ;;  %v3238_v35 = vadd.f32 %v3237_v53, %v3236_v25  ;;  %v3150_v38 = vadd.f32 %v3149_v31, %v3148_v27 }
 0x13a   :  { %2194 = vmatmul.mubr.bf16.gmra.mrb[140].mxu1 %v3895_v5  ;;  %3598 = vmatmul.mubr.bf16.gmra.mrb[140].mxu0 %v3896_v46 }
 0x13b   :  { %v4646_v39 = vadd.f32 %v3238_v35, %v4565_v10 }
 0x13d   :  { %v3239_v40 = vpop.f32.mrb[36].mxu1  ;;  %v3151_v14 = vpop.f32.mrb[36].mxu0 }
 0x13e   :  { %v3240_v41 = vpop.f32.mrb[37].mxu1  ;;  %v3152_v42 = vpop.f32.mrb[37].mxu0 }
 0x13f   :  { %v3241_v21 = vadd.f32 %v3240_v41, %v3239_v40  ;;  %v3242_v45 = vpop.f32.mrb[38].mxu1  ;;  %v3153_v47 = vadd.f32 %v3152_v42, %v3151_v14  ;;  %v3154_v48 = vpop.f32.mrb[38].mxu0 }
 0x140   :  { %v3243_v49 = vpop.f32.mrb[39].mxu1  ;;  %v3155_v51 = vpop.f32.mrb[39].mxu0 }
 0x141   :  { %v4649_v0 = vadd.f32 %v3241_v21, %v4576_v23  ;;  %v3244_v56 = vadd.f32 %v3243_v49, %v3242_v45  ;;  %v3156_v57 = vadd.f32 %v3155_v51, %v3154_v48 }
 0x143   :  { %v4652_v58 = vadd.f32 %v3244_v56, %v4587_v32 }
 0x145   :  { %v3245_v10 = vpop.f32.mrb[40].mxu1  ;;  %v3157_v59 = vpop.f32.mrb[40].mxu0 }
 0x146   :  { %v3246_v61 = vpop.f32.mrb[41].mxu1  ;;  %v3158_v30 = vpop.f32.mrb[41].mxu0 }
 0x147   :  { %v3247_v63 = vadd.f32 %v3246_v61, %v3245_v10  ;;  %v3248_v1 = vpop.f32.mrb[42].mxu1  ;;  %v4654_v37 = vadd.f32 %v3158_v30, %v3157_v59  ;;  %v3160_v3 = vpop.f32.mrb[42].mxu0 }
 0x148   :  { %v3249_v6 = vpop.f32.mrb[43].mxu1  ;;  %v3161_v7 = vpop.f32.mrb[43].mxu0 }
 0x149   :  { %v4657_v9 = vadd.f32 %v3247_v63, %v4598_v43  ;;  %v3250_v23 = vadd.f32 %v3249_v6, %v3248_v1  ;;  %v3162_v15 = vadd.f32 %v3161_v7, %v3160_v3 }
 0x14b   :  { %v4660_v18 = vadd.f32 %v3250_v23, %v4609_v54 }
 0x14d   :  { %v3251_v32 = vpop.f32.mrb[44].mxu1  ;;  %v3163_v62 = vpop.f32.mrb[44].mxu0 }
 0x14e   :  { %v3252_v19 = vpop.f32.mrb[45].mxu1  ;;  %v3164_v22 = vpop.f32.mrb[45].mxu0 }
 0x14f   :  { %v3253_v5 = vadd.f32 %v3252_v19, %v3251_v32  ;;  %v3254_v46 = vpop.f32.mrb[46].mxu1  ;;  %v4662_v24 = vadd.f32 %v3164_v22, %v3163_v62  ;;  %v3166_v25 = vpop.f32.mrb[46].mxu0 }
 0x150   :  { %v3255_v27 = vpop.f32.mrb[47].mxu1  ;;  %v3167_v53 = vpop.f32.mrb[47].mxu0 }
 0x151   :  { %v4665_v31 = vadd.f32 %v3253_v5, %v4620_v2  ;;  %v3256_v43 = vadd.f32 %v3255_v27, %v3254_v46  ;;  %v4667_v35 = vadd.f32 %v3167_v53, %v3166_v25 }
 0x153   :  { %v4670_v54 = vadd.f32 %v3256_v43, %v4631_v16 }
 0x155   :  { %v3257_v40 = vpop.f32.mrb[48].mxu1  ;;  %v3321_v14 = vpop.f32.mrb[48].mxu0 }
 0x156   :  { %v3258_v41 = vpop.f32.mrb[49].mxu1  ;;  %v3322_v42 = vpop.f32.mrb[49].mxu0 }
 0x157   :  { %v3259_v21 = vadd.f32 %v3258_v41, %v3257_v40  ;;  %v3323_v45 = vadd.f32 %v3322_v42, %v3321_v14  ;;  %v3260_v48 = vpop.f32.mrb[50].mxu1  ;;  %v3324_v49 = vpop.f32.mrb[50].mxu0 }
 0x158   :  { %v3261_v51 = vpop.f32.mrb[51].mxu1  ;;  %v3325_v56 = vpop.f32.mrb[51].mxu0 }
 0x159   :  { %v4672_v10 = vadd.f32 %v3259_v21, %v3147_v26  ;;  %v4675_v2 = vadd.f32 %v3323_v45, %v4563_v8  ;;  %v3262_v59 = vadd.f32 %v3261_v51, %v3260_v48  ;;  %v3326_v61 = vadd.f32 %v3325_v56, %v3324_v49 }
 0x15b   :  { %v4677_v30 = vadd.f32 %v3262_v59, %v3150_v38  ;;  %v4680_v16 = vadd.f32 %v3326_v61, %v4568_v11 }
 0x15d   :  { %v3263_v63 = vpop.f32.mrb[52].mxu1  ;;  %v3327_v1 = vpop.f32.mrb[52].mxu0 }
 0x15e   :  { %v3264_v3 = vpop.f32.mrb[53].mxu1  ;;  %v3328_v6 = vpop.f32.mrb[53].mxu0 }
 0x15f   :  { %v3265_v7 = vadd.f32 %v3264_v3, %v3263_v63  ;;  %v3329_v23 = vadd.f32 %v3328_v6, %v3327_v1  ;;  %v3266_v32 = vpop.f32.mrb[54].mxu1  ;;  %v3330_v62 = vpop.f32.mrb[54].mxu0 }
 0x160   :  { %v3267_v26 = vpop.f32.mrb[55].mxu1  ;;  %v3331_v19 = vpop.f32.mrb[55].mxu0 }
 0x161   :  { %v4682_v22 = vadd.f32 %v3265_v7, %v3153_v47  ;;  %v4685_v8 = vadd.f32 %v3329_v23, %v4585_v29  ;;  %v3268_v38 = vadd.f32 %v3267_v26, %v3266_v32  ;;  %v3332_v5 = vadd.f32 %v3331_v19, %v3330_v62 }
 0x163   :  { %v4687_v46 = vadd.f32 %v3268_v38, %v3156_v57  ;;  %v4690_v11 = vadd.f32 %v3332_v5, %v4590_v33 }
 0x165   :  { %v3269_v25 = vpop.f32.mrb[56].mxu1  ;;  %v3333_v27 = vpop.f32.mrb[56].mxu0 }
 0x166   :  { %v3270_v53 = vpop.f32.mrb[57].mxu1  ;;  %v3334_v43 = vpop.f32.mrb[57].mxu0 }
 0x167   :  { %v3271_v40 = vadd.f32 %v3270_v53, %v3269_v25  ;;  %v3335_v14 = vadd.f32 %v3334_v43, %v3333_v27  ;;  %v3272_v41 = vpop.f32.mrb[58].mxu1  ;;  %v3336_v42 = vpop.f32.mrb[58].mxu0 }
 0x168   :  { %v3273_v47 = vpop.f32.mrb[59].mxu1  ;;  %v3337_v21 = vpop.f32.mrb[59].mxu0 }
 0x169   :  { %v4693_v29 = vadd.f32 %v3271_v40, %v4654_v37  ;;  %v4696_v45 = vadd.f32 %v3335_v14, %v4607_v50  ;;  %v3274_v57 = vadd.f32 %v3273_v47, %v3272_v41  ;;  %v3338_v48 = vadd.f32 %v3337_v21, %v3336_v42 }
 0x16b   :  { %v4698_v33 = vadd.f32 %v3274_v57, %v3162_v15  ;;  %v4701_v49 = vadd.f32 %v3338_v48, %v4612_v55 }
 0x16d   :  { %v3275_v51 = vpop.f32.mrb[60].mxu1  ;;  %v3339_v56 = vpop.f32.mrb[60].mxu0 }
 0x16e   :  { %v3276_v59 = vpop.f32.mrb[61].mxu1  ;;  %v3340_v61 = vpop.f32.mrb[61].mxu0 }
 0x16f   :  { %v3277_v63 = vadd.f32 %v3276_v59, %v3275_v51  ;;  %v3341_v1 = vadd.f32 %v3340_v61, %v3339_v56  ;;  %v3278_v3 = vpop.f32.mrb[62].mxu1  ;;  %v3342_v6 = vpop.f32.mrb[62].mxu0 }
 0x170   :  { %v3279_v37 = vpop.f32.mrb[63].mxu1  ;;  %v3343_v7 = vpop.f32.mrb[63].mxu0 }
 0x171   :  { %v4704_v50 = vadd.f32 %v3277_v63, %v4662_v24  ;;  %v4707_v23 = vadd.f32 %v3341_v1, %v4629_v13  ;;  %v3280_v15 = vadd.f32 %v3279_v37, %v3278_v3  ;;  %v3344_v32 = vadd.f32 %v3343_v7, %v3342_v6 }
 0x173   :  { %v4710_v55 = vadd.f32 %v3280_v15, %v4667_v35  ;;  %v4713_v62 = vadd.f32 %v3344_v32, %v4634_v17 }
 0x175   :  { %v3281_v26 = vpop.f32.mrb[64].mxu1  ;;  %v3345_v19 = vpop.f32.mrb[64].mxu0 }
 0x176   :  { %v3282_v38 = vpop.f32.mrb[65].mxu1  ;;  %v3346_v5 = vpop.f32.mrb[65].mxu0 }
 0x177   :  { %v3283_v25 = vadd.f32 %v3282_v38, %v3281_v26  ;;  %v3347_v27 = vadd.f32 %v3346_v5, %v3345_v19  ;;  %v3284_v53 = vpop.f32.mrb[66].mxu1  ;;  %v3348_v24 = vpop.f32.mrb[66].mxu0 }
 0x178   :  { %v3285_v43 = vpop.f32.mrb[67].mxu1  ;;  %v3349_v40 = vpop.f32.mrb[67].mxu0 }
 0x179   :  { %v4716_v13 = vadd.f32 %v3283_v25, %v4474_v60  ;;  %v4719_v14 = vadd.f32 %v3347_v27, %v4643_v34  ;;  %v3286_v35 = vadd.f32 %v3285_v43, %v3284_v53  ;;  %v3350_v41 = vadd.f32 %v3349_v40, %v3348_v24 }
 0x17b   :  { %v4722_v17 = vadd.f32 %v3286_v35, %v4484_v4  ;;  %v4725_v42 = vadd.f32 %v3350_v41, %v4646_v39 }
 0x17d   :  { %v3287_v47 = vpop.f32.mrb[68].mxu1  ;;  %v3351_v21 = vpop.f32.mrb[68].mxu0 }
 0x17e   :  { %v3288_v57 = vpop.f32.mrb[69].mxu1  ;;  %v3352_v48 = vpop.f32.mrb[69].mxu0 }
 0x17f   :  { %v3289_v51 = vadd.f32 %v3288_v57, %v3287_v47  ;;  %v3353_v56 = vadd.f32 %v3352_v48, %v3351_v21  ;;  %v3290_v59 = vpop.f32.mrb[70].mxu1  ;;  %v3354_v60 = vpop.f32.mrb[70].mxu0 }
 0x180   :  { %v3291_v61 = vpop.f32.mrb[71].mxu1  ;;  %v3355_v63 = vpop.f32.mrb[71].mxu0 }
 0x181   :  { %v4728_v34 = vadd.f32 %v3289_v51, %v4494_v12  ;;  %v4731_v1 = vadd.f32 %v3353_v56, %v4649_v0  ;;  %v3292_v4 = vadd.f32 %v3291_v61, %v3290_v59  ;;  %v3356_v3 = vadd.f32 %v3355_v63, %v3354_v60 }
 0x183   :  { %v4734_v39 = vadd.f32 %v3292_v4, %v4504_v20  ;;  %v4737_v6 = vadd.f32 %v3356_v3, %v4652_v58 }
 0x185   :  { %v3293_v37 = vpop.f32.mrb[72].mxu1  ;;  %v3357_v7 = vpop.f32.mrb[72].mxu0 }
 0x186   :  { %v3294_v15 = vpop.f32.mrb[73].mxu1  ;;  %v3358_v32 = vpop.f32.mrb[73].mxu0 }
 0x187   :  { %v3295_v26 = vadd.f32 %v3294_v15, %v3293_v37  ;;  %v3359_v19 = vadd.f32 %v3358_v32, %v3357_v7  ;;  %v3296_v38 = vpop.f32.mrb[74].mxu1  ;;  %v3360_v12 = vpop.f32.mrb[74].mxu0 }
 0x188   :  { %v3297_v5 = vpop.f32.mrb[75].mxu1  ;;  %v3361_v25 = vpop.f32.mrb[75].mxu0 }
 0x189   :  { %v4740_v0 = vadd.f32 %v3295_v26, %v4514_v28  ;;  %v4743_v27 = vadd.f32 %v3359_v19, %v4657_v9  ;;  %v3298_v20 = vadd.f32 %v3297_v5, %v3296_v38  ;;  %v3362_v53 = vadd.f32 %v3361_v25, %v3360_v12 }
 0x18b   :  { %v4746_v58 = vadd.f32 %v3298_v20, %v4524_v36  ;;  %v4749_v24 = vadd.f32 %v3362_v53, %v4660_v18 }
 0x18d   :  { %v3299_v43 = vpop.f32.mrb[76].mxu1  ;;  %v3363_v40 = vpop.f32.mrb[76].mxu0 }
 0x18e   :  { %v3300_v35 = vpop.f32.mrb[77].mxu1  ;;  %v3364_v41 = vpop.f32.mrb[77].mxu0 }
 0x18f   :  { %v3301_v47 = vadd.f32 %v3300_v35, %v3299_v43  ;;  %v3365_v21 = vadd.f32 %v3364_v41, %v3363_v40  ;;  %v3302_v57 = vpop.f32.mrb[78].mxu1  ;;  %v3366_v28 = vpop.f32.mrb[78].mxu0 }
 0x190   :  { %v3303_v48 = vpop.f32.mrb[79].mxu1  ;;  %v3367_v51 = vpop.f32.mrb[79].mxu0 }
 0x191   :  { %v4752_v9 = vadd.f32 %v3301_v47, %v4534_v44  ;;  %v4755_v56 = vadd.f32 %v3365_v21, %v4665_v31  ;;  %v3304_v36 = vadd.f32 %v3303_v48, %v3302_v57  ;;  %v3368_v59 = vadd.f32 %v3367_v51, %v3366_v28 }
 0x193   :  { %v4758_v18 = vadd.f32 %v3304_v36, %v4544_v52  ;;  %v4761_v60 = vadd.f32 %v3368_v59, %v4670_v54 }
 0x195   :  { %v3369_v61 = vpop.f32.mrb[80].mxu0  ;;  %v3433_v63 = vpop.f32.mrb[80].mxu1 }
 0x196   :  { %v3370_v4 = vpop.f32.mrb[81].mxu0  ;;  %v3434_v3 = vpop.f32.mrb[81].mxu1 }
 0x197   :  { %v3371_v37 = vadd.f32 %v3370_v4, %v3369_v61  ;;  %v3435_v7 = vadd.f32 %v3434_v3, %v3433_v63  ;;  %v3372_v15 = vpop.f32.mrb[82].mxu0  ;;  %v3436_v44 = vpop.f32.mrb[82].mxu1 }
 0x198   :  { %v3373_v32 = vpop.f32.mrb[83].mxu0  ;;  %v3437_v26 = vpop.f32.mrb[83].mxu1 }
 0x199   :  { %v4764_v31 = vadd.f32 %v3371_v37, %v4672_v10  ;;  %v3374_v19 = vadd.f32 %v3373_v32, %v3372_v15  ;;  %v3438_v38 = vadd.f32 %v3437_v26, %v3436_v44  ;;  %v4767_v52 = vadd.f32 %v3435_v7, %v4675_v2 }
 0x19b   :  { %v4770_v54 = vadd.f32 %v3374_v19, %v4677_v30  ;;  %v4773_v12 = vadd.f32 %v3438_v38, %v4680_v16 }
 0x19d   :  { %v3375_v5 = vpop.f32.mrb[84].mxu0  ;;  %v3439_v25 = vpop.f32.mrb[84].mxu1 }
 0x19e   :  { %v3376_v20 = vpop.f32.mrb[85].mxu0  ;;  %v3440_v53 = vpop.f32.mrb[85].mxu1 }
 0x19f   :  { %v3377_v43 = vadd.f32 %v3376_v20, %v3375_v5  ;;  %v3441_v40 = vadd.f32 %v3440_v53, %v3439_v25  ;;  %v3378_v35 = vpop.f32.mrb[86].mxu0  ;;  %v3442_v10 = vpop.f32.mrb[86].mxu1 }
 0x1a0   :  { %v3379_v41 = vpop.f32.mrb[87].mxu0  ;;  %v3443_v47 = vpop.f32.mrb[87].mxu1 }
 0x1a1   :  { %v4776_v21 = vadd.f32 %v3377_v43, %v4682_v22  ;;  %v3380_v2 = vadd.f32 %v3379_v41, %v3378_v35  ;;  %v3444_v57 = vadd.f32 %v3443_v47, %v3442_v10  ;;  %v4779_v30 = vadd.f32 %v3441_v40, %v4685_v8 }
 0x1a3   :  { %v4782_v16 = vadd.f32 %v3380_v2, %v4687_v46  ;;  %v4785_v28 = vadd.f32 %v3444_v57, %v4690_v11 }
 0x1a5   :  { %v3381_v48 = vpop.f32.mrb[88].mxu0  ;;  %v3445_v51 = vpop.f32.mrb[88].mxu1 }
 0x1a6   :  { %v3382_v36 = vpop.f32.mrb[89].mxu0  ;;  %v3446_v59 = vpop.f32.mrb[89].mxu1 }
 0x1a7   :  { %v3383_v61 = vadd.f32 %v3382_v36, %v3381_v48  ;;  %v3447_v63 = vadd.f32 %v3446_v59, %v3445_v51  ;;  %v3384_v4 = vpop.f32.mrb[90].mxu0  ;;  %v3448_v22 = vpop.f32.mrb[90].mxu1 }
 0x1a8   :  { %v3385_v3 = vpop.f32.mrb[91].mxu0  ;;  %v3449_v37 = vpop.f32.mrb[91].mxu1 }
 0x1a9   :  { %v4788_v7 = vadd.f32 %v3383_v61, %v4693_v29  ;;  %v3386_v8 = vadd.f32 %v3385_v3, %v3384_v4  ;;  %v3450_v15 = vadd.f32 %v3449_v37, %v3448_v22  ;;  %v4791_v46 = vadd.f32 %v3447_v63, %v4696_v45 }
 0x1ab   :  { %v4794_v11 = vadd.f32 %v3386_v8, %v4698_v33  ;;  %v4797_v44 = vadd.f32 %v3450_v15, %v4701_v49 }
 0x1ad   :  { %v3387_v32 = vpop.f32.mrb[92].mxu0  ;;  %v3451_v26 = vpop.f32.mrb[92].mxu1 }
 0x1ae   :  { %v3388_v19 = vpop.f32.mrb[93].mxu0  ;;  %v3452_v38 = vpop.f32.mrb[93].mxu1 }
 0x1af   :  { %v3389_v5 = vadd.f32 %v3388_v19, %v3387_v32  ;;  %v3453_v25 = vadd.f32 %v3452_v38, %v3451_v26  ;;  %v3390_v20 = vpop.f32.mrb[94].mxu0  ;;  %v3454_v29 = vpop.f32.mrb[94].mxu1 }
 0x1b0   :  { %v3391_v53 = vpop.f32.mrb[95].mxu0  ;;  %v3455_v43 = vpop.f32.mrb[95].mxu1 }
 0x1b1   :  { %v4800_v40 = vadd.f32 %v3389_v5, %v4704_v50  ;;  %v3392_v45 = vadd.f32 %v3391_v53, %v3390_v20  ;;  %v3456_v35 = vadd.f32 %v3455_v43, %v3454_v29  ;;  %v4803_v33 = vadd.f32 %v3453_v25, %v4707_v23 }
 0x1b3   :  { %v4806_v49 = vadd.f32 %v3392_v45, %v4710_v55  ;;  %v4809_v10 = vadd.f32 %v3456_v35, %v4713_v62 }
 0x1b5   :  { %v3393_v41 = vpop.f32.mrb[96].mxu0  ;;  %v3457_v47 = vpop.f32.mrb[96].mxu1 }
 0x1b6   :  { %v3394_v2 = vpop.f32.mrb[97].mxu0  ;;  %v3458_v57 = vpop.f32.mrb[97].mxu1 }
 0x1b7   :  { %v3395_v48 = vadd.f32 %v3394_v2, %v3393_v41  ;;  %v3459_v51 = vadd.f32 %v3458_v57, %v3457_v47  ;;  %v3396_v36 = vpop.f32.mrb[98].mxu0  ;;  %v3460_v50 = vpop.f32.mrb[98].mxu1 }
 0x1b8   :  { %v3397_v59 = vpop.f32.mrb[99].mxu0  ;;  %v3461_v61 = vpop.f32.mrb[99].mxu1 }
 0x1b9   :  { %v4812_v63 = vadd.f32 %v3395_v48, %v4716_v13  ;;  %v3398_v23 = vadd.f32 %v3397_v59, %v3396_v36  ;;  %v3462_v4 = vadd.f32 %v3461_v61, %v3460_v50  ;;  %v4815_v55 = vadd.f32 %v3459_v51, %v4719_v14 }
 0x1bb   :  { %v4818_v62 = vadd.f32 %v3398_v23, %v4722_v17  ;;  %v4821_v22 = vadd.f32 %v3462_v4, %v4725_v42 }
 0x1bd   :  { %v3399_v3 = vpop.f32.mrb[100].mxu0  ;;  %v3463_v37 = vpop.f32.mrb[100].mxu1 }
 0x1be   :  { %v3400_v8 = vpop.f32.mrb[101].mxu0  ;;  %v3464_v15 = vpop.f32.mrb[101].mxu1 }
 0x1bf   :  { %v3401_v32 = vadd.f32 %v3400_v8, %v3399_v3  ;;  %v3465_v26 = vadd.f32 %v3464_v15, %v3463_v37  ;;  %v3402_v19 = vpop.f32.mrb[102].mxu0  ;;  %v3466_v13 = vpop.f32.mrb[102].mxu1 }
 0x1c0   :  { %v3403_v38 = vpop.f32.mrb[103].mxu0  ;;  %v3467_v5 = vpop.f32.mrb[103].mxu1 }
 0x1c1   :  { %v4824_v25 = vadd.f32 %v3401_v32, %v4728_v34  ;;  %v3404_v14 = vadd.f32 %v3403_v38, %v3402_v19  ;;  %v3468_v20 = vadd.f32 %v3467_v5, %v3466_v13  ;;  %v4827_v17 = vadd.f32 %v3465_v26, %v4731_v1 }
 0x1c3   :  { %v4830_v42 = vadd.f32 %v3404_v14, %v4734_v39  ;;  %v4833_v29 = vadd.f32 %v3468_v20, %v4737_v6  ;;  %v4862_v14 = vld [vmem:[%s5033_s2] ss:$0 sm:$0xff] }
 0x1c5   :  { %v3405_v53 = vpop.f32.mrb[104].mxu0  ;;  %v3469_v43 = vpop.f32.mrb[104].mxu1 }
 0x1c6   :  { %v3406_v45 = vpop.f32.mrb[105].mxu0  ;;  %v3470_v35 = vpop.f32.mrb[105].mxu1 }
 0x1c7   :  { %v3407_v41 = vadd.f32 %v3406_v45, %v3405_v53  ;;  %v3471_v47 = vadd.f32 %v3470_v35, %v3469_v43  ;;  %v3408_v2 = vpop.f32.mrb[106].mxu0  ;;  %v3472_v34 = vpop.f32.mrb[106].mxu1 }
 0x1c8   :  { %v3409_v57 = vpop.f32.mrb[107].mxu0  ;;  %v3473_v48 = vpop.f32.mrb[107].mxu1 }
 0x1c9   :  { %v4836_v51 = vadd.f32 %v3407_v41, %v4740_v0  ;;  %v3410_v1 = vadd.f32 %v3409_v57, %v3408_v2  ;;  %v3474_v36 = vadd.f32 %v3473_v48, %v3472_v34  ;;  %v4839_v39 = vadd.f32 %v3471_v47, %v4743_v27  ;;  %v4871_v2 = vld [vmem:[%s5034_s3] ss:$0 sm:$0xff] }
 0x1cb   :  { %v4842_v6 = vadd.f32 %v3410_v1, %v4746_v58  ;;  %v4845_v50 = vadd.f32 %v3474_v36, %v4749_v24 }
 0x1cd   :  { %v3411_v59 = vpop.f32.mrb[108].mxu0  ;;  %v3475_v61 = vpop.f32.mrb[108].mxu1 }
 0x1ce   :  { %v3412_v23 = vpop.f32.mrb[109].mxu0  ;;  %v3476_v4 = vpop.f32.mrb[109].mxu1 }
 0x1cf   :  { %v3413_v3 = vadd.f32 %v3412_v23, %v3411_v59  ;;  %v3477_v37 = vadd.f32 %v3476_v4, %v3475_v61  ;;  %v3414_v8 = vpop.f32.mrb[110].mxu0  ;;  %v3478_v0 = vpop.f32.mrb[110].mxu1 }
 0x1d0   :  { %v3415_v15 = vpop.f32.mrb[111].mxu0  ;;  %v3479_v32 = vpop.f32.mrb[111].mxu1 }
 0x1d1   :  { %v4848_v26 = vadd.f32 %v3413_v3, %v4752_v9  ;;  %v3416_v27 = vadd.f32 %v3415_v15, %v3414_v8  ;;  %v3480_v19 = vadd.f32 %v3479_v32, %v3478_v0  ;;  %v4851_v58 = vadd.f32 %v3477_v37, %v4755_v56 }
 0x1d3   :  { %v4854_v24 = vadd.f32 %v3416_v27, %v4758_v18  ;;  %v4857_v13 = vadd.f32 %v3480_v19, %v4761_v60 }
 0x1d5   :  { %v3481_v38 = vpop.f32.mrb[112].mxu1  ;;  %v3571_v5 = vpop.f32.mrb[112].mxu0 }
 0x1d6   :  { %v2245_v9 = vadd.f32 %v3571_v5, %v4779_v30  ;;  %v3482_v20 = vpop.f32.mrb[113].mxu1  ;;  %v2236_v53 = vpop.f32.mrb[113].mxu0 }
 0x1d7   :  { %v3483_v43 = vadd.f32 %v3482_v20, %v3481_v38  ;;  %v2237_v56 = vadd.f32 %v2236_v53, %v4767_v52  ;;  %v3484_v45 = vpop.f32.mrb[114].mxu1  ;;  %v3572_v18 = vpop.f32.mrb[114].mxu0 }
 0x1d8   :  { %v2471_v35 = vmul.f32 %v4862_v14, %v2245_v9  ;;  %v2248_v60 = vadd.f32 %v3572_v18, %v4785_v28  ;;  %v3485_v41 = vpop.f32.mrb[115].mxu1  ;;  %v2239_v47 = vpop.f32.mrb[115].mxu0 }
 0x1d9   :  { %v2469_v30 = vmul.f32 %v4862_v14, %v2237_v56  ;;  %v3486_v34 = vadd.f32 %v3485_v41, %v3484_v45  ;;  %v2240_v57 = vadd.f32 %v2239_v47, %v4773_v12  ;;  %v4876_v52 = vadd.f32 %v3483_v43, %v4764_v31 }
 0x1da   :  { %v2472_v48 = vmul.f32 %v4862_v14, %v2248_v60  ;;  %v2510_v36 = vadd.f32 %v4871_v2, %v2471_v35 }
 0x1db   :  { %v2470_v1 = vmul.f32 %v4862_v14, %v2240_v57  ;;  %v4881_v28 = vadd.f32 %v3486_v34, %v4770_v54  ;;  %v2508_v61 = vadd.f32 %v4871_v2, %v2469_v30 }
 0x1dc   :  { %v2511_v59 = vadd.f32 %v4871_v2, %v2472_v48 }
 0x1dd   :  { %v2509_v23 = vadd.f32 %v4871_v2, %v2470_v1  ;;  %v3487_v4 = vpop.f32.mrb[116].mxu1  ;;  %v3575_v12 = vpop.f32.mrb[116].mxu0 }
 0x1de   :  { %v2994_v3 = vpack.c.bf16 %v2511_v59, %v2510_v36  ;;  %v2261_v31 = vadd.f32 %v3575_v12, %v4803_v33  ;;  %v3488_v37 = vpop.f32.mrb[117].mxu1  ;;  %v2252_v8 = vpop.f32.mrb[117].mxu0 }
 0x1df   :  { %v2989_v0 = vpack.c.bf16 %v2509_v23, %v2508_v61  ;;  %v3489_v15 = vadd.f32 %v3488_v37, %v3487_v4  ;;  %v2253_v54 = vadd.f32 %v2252_v8, %v4791_v46  ;;  %v3490_v32 = vpop.f32.mrb[118].mxu1  ;;  %v3576_v27 = vpop.f32.mrb[118].mxu0 }
 0x1e0   :  { %3066 = vst [vmem:[%s5035_s4 + $0x8] sm:$0xff] %v2994_v3   ;;  %v2475_v19 = vmul.f32 %v4862_v14, %v2261_v31  ;;  %v2264_v38 = vadd.f32 %v3576_v27, %v4809_v10  ;;  %v3491_v5 = vpop.f32.mrb[119].mxu1  ;;  %v2255_v9 = vpop.f32.mrb[119].mxu0 }
 0x1e1   :  { %2990 = vst [vmem:[%s5035_s4] sm:$0xff] %v2989_v0   ;;  %v2473_v33 = vmul.f32 %v4862_v14, %v2253_v54  ;;  %v3492_v20 = vadd.f32 %v3491_v5, %v3490_v32  ;;  %v2256_v46 = vadd.f32 %v2255_v9, %v4797_v44  ;;  %v4900_v53 = vadd.f32 %v3489_v15, %v4776_v21 }
 0x1e2   :  { %v2476_v43 = vmul.f32 %v4862_v14, %v2264_v38  ;;  %v2514_v45 = vadd.f32 %v4871_v2, %v2475_v19 }
 0x1e3   :  { %v2474_v56 = vmul.f32 %v4862_v14, %v2256_v46  ;;  %v4905_v10 = vadd.f32 %v3492_v20, %v4782_v16  ;;  %v2512_v35 = vadd.f32 %v4871_v2, %v2473_v33 }
 0x1e4   :  { %v2515_v18 = vadd.f32 %v4871_v2, %v2476_v43 }
 0x1e5   :  { %v2513_v60 = vadd.f32 %v4871_v2, %v2474_v56  ;;  %v3493_v41 = vpop.f32.mrb[120].mxu1  ;;  %v3579_v44 = vpop.f32.mrb[120].mxu0 }
 0x1e6   :  { %v3004_v47 = vpack.c.bf16 %v2515_v18, %v2514_v45  ;;  %v2277_v21 = vadd.f32 %v3579_v44, %v4827_v17  ;;  %v3494_v30 = vpop.f32.mrb[121].mxu1  ;;  %v2268_v34 = vpop.f32.mrb[121].mxu0 }
 0x1e7   :  { %v2999_v57 = vpack.c.bf16 %v2513_v60, %v2512_v35  ;;  %v3495_v48 = vadd.f32 %v3494_v30, %v3493_v41  ;;  %v2269_v16 = vadd.f32 %v2268_v34, %v4815_v55  ;;  %v3496_v1 = vpop.f32.mrb[122].mxu1  ;;  %v3580_v36 = vpop.f32.mrb[122].mxu0 }
 0x1e8   :  { %3068 = vst [vmem:[%s5035_s4 + $0x18] sm:$0xff] %v3004_v47   ;;  %v2479_v59 = vmul.f32 %v4862_v14, %v2277_v21  ;;  %v2280_v61 = vadd.f32 %v3580_v36, %v4833_v29  ;;  %v3497_v23 = vpop.f32.mrb[123].mxu1  ;;  %v2271_v4 = vpop.f32.mrb[123].mxu0 }
 0x1e9   :  { %3067 = vst [vmem:[%s5035_s4 + $0x10] sm:$0xff] %v2999_v57   ;;  %v2477_v17 = vmul.f32 %v4862_v14, %v2269_v16  ;;  %v3498_v12 = vadd.f32 %v3497_v23, %v3496_v1  ;;  %v2272_v55 = vadd.f32 %v2271_v4, %v4821_v22  ;;  %v4924_v3 = vadd.f32 %v3495_v48, %v4788_v7 }
 0x1ea   :  { %v2480_v31 = vmul.f32 %v4862_v14, %v2280_v61  ;;  %v2518_v8 = vadd.f32 %v4871_v2, %v2479_v59 }
 0x1eb   :  { %v2478_v37 = vmul.f32 %v4862_v14, %v2272_v55  ;;  %v4929_v29 = vadd.f32 %v3498_v12, %v4794_v11  ;;  %v2516_v15 = vadd.f32 %v4871_v2, %v2477_v17 }
 0x1ec   :  { %v2519_v0 = vadd.f32 %v4871_v2, %v2480_v31 }
 0x1ed   :  { %v2517_v54 = vadd.f32 %v4871_v2, %v2478_v37  ;;  %v3499_v32 = vpop.f32.mrb[124].mxu1  ;;  %v3583_v22 = vpop.f32.mrb[124].mxu0 }
 0x1ee   :  { %v3014_v27 = vpack.c.bf16 %v2519_v0, %v2518_v8  ;;  %v2293_v7 = vadd.f32 %v3583_v22, %v4851_v58  ;;  %v3500_v19 = vpop.f32.mrb[125].mxu1  ;;  %v2284_v38 = vpop.f32.mrb[125].mxu0 }
 0x1ef   :  { %v3009_v5 = vpack.c.bf16 %v2517_v54, %v2516_v15  ;;  %v3501_v9 = vadd.f32 %v3500_v19, %v3499_v32  ;;  %v2285_v11 = vadd.f32 %v2284_v38, %v4839_v39  ;;  %v3502_v33 = vpop.f32.mrb[126].mxu1  ;;  %v3584_v20 = vpop.f32.mrb[126].mxu0 }
 0x1f0   :  { %3070 = vst [vmem:[%s5035_s4 + $0x28] sm:$0xff] %v3014_v27   ;;  %v2483_v46 = vmul.f32 %v4862_v14, %v2293_v7  ;;  %v2296_v43 = vadd.f32 %v3584_v20, %v4857_v13  ;;  %v3503_v56 = vpop.f32.mrb[127].mxu1  ;;  %v2287_v45 = vpop.f32.mrb[127].mxu0 }
 0x1f1   :  { %3069 = vst [vmem:[%s5035_s4 + $0x20] sm:$0xff] %v3009_v5   ;;  %v2481_v58 = vmul.f32 %v4862_v14, %v2285_v11  ;;  %v3504_v18 = vadd.f32 %v3503_v56, %v3502_v33  ;;  %v2288_v39 = vadd.f32 %v2287_v45, %v4845_v50  ;;  %v2164_v35 = vadd.f32 %v3501_v9, %v4800_v40 }
 0x1f2   :  { %v2484_v60 = vmul.f32 %v4862_v14, %v2296_v43  ;;  %v2522_v13 = vadd.f32 %v4871_v2, %v2483_v46 }
 0x1f3   :  { %v2482_v41 = vmul.f32 %v4862_v14, %v2288_v39  ;;  %v2167_v44 = vadd.f32 %v3504_v18, %v4806_v49  ;;  %v2520_v21 = vadd.f32 %v4871_v2, %v2481_v58 }
 0x1f4   :  { %v2523_v47 = vadd.f32 %v4871_v2, %v2484_v60 }
 0x1f5   :  { %v2521_v30 = vadd.f32 %v4871_v2, %v2482_v41  ;;  %v3505_v34 = vpop.f32.mrb[128].mxu1  ;;  %v3587_v57 = vpop.f32.mrb[128].mxu0 }
 0x1f6   :  { %v3024_v48 = vpack.c.bf16 %v2523_v47, %v2522_v13  ;;  %v2309_v50 = vadd.f32 %v3587_v57, %v4900_v53  ;;  %v3506_v40 = vpop.f32.mrb[129].mxu1  ;;  %v2300_v16 = vpop.f32.mrb[129].mxu0 }
 0x1f7   :  { %v3019_v1 = vpack.c.bf16 %v2521_v30, %v2520_v21  ;;  %v3507_v36 = vadd.f32 %v3506_v40, %v3505_v34  ;;  %v2301_v59 = vadd.f32 %v2300_v16, %v4876_v52  ;;  %v3508_v49 = vpop.f32.mrb[130].mxu1  ;;  %v3588_v61 = vpop.f32.mrb[130].mxu0 }
 0x1f8   :  { %3072 = vst [vmem:[%s5035_s4 + $0x38] sm:$0xff] %v3024_v48   ;;  %v2487_v23 = vmul.f32 %v4862_v14, %v2309_v50  ;;  %v2312_v4 = vadd.f32 %v3588_v61, %v4905_v10  ;;  %v3509_v17 = vpop.f32.mrb[131].mxu1  ;;  %v2303_v12 = vpop.f32.mrb[131].mxu0 }
 0x1f9   :  { %3071 = vst [vmem:[%s5035_s4 + $0x30] sm:$0xff] %v3019_v1   ;;  %v2485_v53 = vmul.f32 %v4862_v14, %v2301_v59  ;;  %v3510_v55 = vadd.f32 %v3509_v17, %v3508_v49  ;;  %v2304_v52 = vadd.f32 %v2303_v12, %v4881_v28  ;;  %v2172_v31 = vadd.f32 %v3507_v36, %v4812_v63 }
 0x1fa   :  { %v2488_v37 = vmul.f32 %v4862_v14, %v2312_v4  ;;  %v2526_v10 = vadd.f32 %v4871_v2, %v2487_v23 }
 0x1fb   :  { %v2486_v8 = vmul.f32 %v4862_v14, %v2304_v52  ;;  %v2175_v0 = vadd.f32 %v3510_v55, %v4818_v62  ;;  %v2524_v54 = vadd.f32 %v4871_v2, %v2485_v53 }
 0x1fc   :  { %v2527_v15 = vadd.f32 %v4871_v2, %v2488_v37 }
 0x1fd   :  { %v2525_v32 = vadd.f32 %v4871_v2, %v2486_v8  ;;  %v3511_v22 = vpop.f32.mrb[132].mxu1  ;;  %v3591_v27 = vpop.f32.mrb[132].mxu0 }
 0x1fe   :  { %v3034_v7 = vpack.c.bf16 %v2527_v15, %v2526_v10  ;;  %v2325_v28 = vadd.f32 %v3591_v27, %v2164_v35  ;;  %v3512_v19 = vpop.f32.mrb[133].mxu1  ;;  %v2316_v63 = vpop.f32.mrb[133].mxu0 }
 0x1ff   :  { %v3029_v38 = vpack.c.bf16 %v2525_v32, %v2524_v54  ;;  %v3513_v5 = vadd.f32 %v3512_v19, %v3511_v22  ;;  %v2317_v9 = vadd.f32 %v2316_v63, %v4924_v3  ;;  %v3514_v11 = vpop.f32.mrb[134].mxu1  ;;  %v3592_v62 = vpop.f32.mrb[134].mxu0 }
 0x200   :  { %3074 = vst [vmem:[%s5035_s4 + $0x48] sm:$0xff] %v3034_v7   ;;  %v2491_v33 = vmul.f32 %v4862_v14, %v2325_v28  ;;  %v2328_v20 = vadd.f32 %v3592_v62, %v2167_v44  ;;  %v3515_v46 = vpop.f32.mrb[135].mxu1  ;;  %v2319_v43 = vpop.f32.mrb[135].mxu0 }
 0x201   :  { %3073 = vst [vmem:[%s5035_s4 + $0x40] sm:$0xff] %v3029_v38   ;;  %v2489_v56 = vmul.f32 %v4862_v14, %v2317_v9  ;;  %v3516_v45 = vadd.f32 %v3515_v46, %v3514_v11  ;;  %v2320_v3 = vadd.f32 %v2319_v43, %v4929_v29  ;;  %v2180_v58 = vadd.f32 %v3513_v5, %v4824_v25 }
 0x202   :  { %v2492_v18 = vmul.f32 %v4862_v14, %v2328_v20  ;;  %v2530_v60 = vadd.f32 %v4871_v2, %v2491_v33 }
 0x203   :  { %v2490_v39 = vmul.f32 %v4862_v14, %v2320_v3  ;;  %v2183_v35 = vadd.f32 %v3516_v45, %v4830_v42  ;;  %v2528_v44 = vadd.f32 %v4871_v2, %v2489_v56 }
 0x204   :  { %v2531_v41 = vadd.f32 %v4871_v2, %v2492_v18 }
 0x205   :  { %v2529_v13 = vadd.f32 %v4871_v2, %v2490_v39  ;;  %v3517_v47 = vpop.f32.mrb[136].mxu1  ;;  %v3595_v21 = vpop.f32.mrb[136].mxu0 }
 0x206   :  { %v3044_v30 = vpack.c.bf16 %v2531_v41, %v2530_v60  ;;  %v2341_v29 = vadd.f32 %v3595_v21, %v2180_v58  ;;  %v3518_v34 = vpop.f32.mrb[137].mxu1  ;;  %v2332_v25 = vpop.f32.mrb[137].mxu0 }
 0x207   :  { %v3039_v57 = vpack.c.bf16 %v2529_v13, %v2528_v44  ;;  %v3519_v48 = vadd.f32 %v3518_v34, %v3517_v47  ;;  %v2333_v50 = vadd.f32 %v2332_v25, %v2172_v31  ;;  %v3520_v40 = vpop.f32.mrb[138].mxu1  ;;  %v3596_v16 = vpop.f32.mrb[138].mxu0 }
 0x208   :  { %3076 = vst [vmem:[%s5035_s4 + $0x58] sm:$0xff] %v3044_v30   ;;  %v2495_v42 = vmul.f32 %v4862_v14, %v2341_v29  ;;  %v2344_v1 = vadd.f32 %v3596_v16, %v2183_v35  ;;  %v3521_v36 = vpop.f32.mrb[139].mxu1  ;;  %v2335_v59 = vpop.f32.mrb[139].mxu0 }
 0x209   :  { %3075 = vst [vmem:[%s5035_s4 + $0x50] sm:$0xff] %v3039_v57   ;;  %v2493_v49 = vmul.f32 %v4862_v14, %v2333_v50  ;;  %v3522_v61 = vadd.f32 %v3521_v36, %v3520_v40  ;;  %v2336_v23 = vadd.f32 %v2335_v59, %v2175_v0  ;;  %v2188_v4 = vadd.f32 %v3519_v48, %v4836_v51 }
 0x20a   :  { %v2496_v17 = vmul.f32 %v4862_v14, %v2344_v1  ;;  %v2534_v55 = vadd.f32 %v4871_v2, %v2495_v42 }
 0x20b   :  { %v2494_v12 = vmul.f32 %v4862_v14, %v2336_v23  ;;  %v2191_v53 = vadd.f32 %v3522_v61, %v4842_v6  ;;  %v2532_v31 = vadd.f32 %v4871_v2, %v2493_v49 }
 0x20c   :  { %v2535_v52 = vadd.f32 %v4871_v2, %v2496_v17 }
 0x20d   :  { %v2533_v37 = vadd.f32 %v4871_v2, %v2494_v12  ;;  %v3523_v8 = vpop.f32.mrb[140].mxu1  ;;  %v3599_v10 = vpop.f32.mrb[140].mxu0 }
 0x20e   :  { %v3054_v15 = vpack.c.bf16 %v2535_v52, %v2534_v55  ;;  %v3524_v0 = vpop.f32.mrb[141].mxu1  ;;  %v2348_v54 = vpop.f32.mrb[141].mxu0 }
 0x20f   :  { %v3049_v51 = vpack.c.bf16 %v2533_v37, %v2532_v31  ;;  %v3525_v32 = vadd.f32 %v3524_v0, %v3523_v8  ;;  %v2349_v22 = vadd.f32 %v2348_v54, %v2188_v4  ;;  %v3526_v27 = vpop.f32.mrb[142].mxu1  ;;  %v3600_v7 = vpop.f32.mrb[142].mxu0 }
 0x210   :  { %3078 = vst [vmem:[%s5035_s4 + $0x68] sm:$0xff] %v3054_v15   ;;  %v3527_v6 = vpop.f32.mrb[143].mxu1  ;;  %v2351_v28 = vpop.f32.mrb[143].mxu0 }
 0x211   :  { %3077 = vst [vmem:[%s5035_s4 + $0x60] sm:$0xff] %v3049_v51   ;;  %v2196_v19 = vadd.f32 %v3525_v32, %v4848_v26  ;;  %v2497_v63 = vmul.f32 %v4862_v14, %v2349_v22  ;;  %v3528_v38 = vadd.f32 %v3527_v6, %v3526_v27  ;;  %v2352_v5 = vadd.f32 %v2351_v28, %v2191_v53 }
 0x213   :  { %v2357_v9 = vadd.f32 %v3599_v10, %v2196_v19  ;;  %v2199_v11 = vadd.f32 %v3528_v38, %v4854_v24  ;;  %v2498_v62 = vmul.f32 %v4862_v14, %v2352_v5  ;;  %v2536_v20 = vadd.f32 %v4871_v2, %v2497_v63 }
 0x215   :  { %v2499_v33 = vmul.f32 %v4862_v14, %v2357_v9  ;;  %v2360_v46 = vadd.f32 %v3600_v7, %v2199_v11  ;;  %v2537_v43 = vadd.f32 %v4871_v2, %v2498_v62 }
 0x217   :  { %v2500_v56 = vmul.f32 %v4862_v14, %v2360_v46  ;;  %v3059_v45 = vpack.c.bf16 %v2537_v43, %v2536_v20  ;;  %v2538_v26 = vadd.f32 %v4871_v2, %v2499_v33 }
 0x219   :  { %v2539_v3 = vadd.f32 %v4871_v2, %v2500_v56  ;;  %3079 = vst [vmem:[%s5035_s4 + $0x70] sm:$0xff] %v3059_v45  }
 0x21b   :  { %v3064_v24 = vpack.c.bf16 %v2539_v3, %v2538_v26 }
 0x21d   :  { %3080 = vst [vmem:[%s5035_s4 + $0x78] sm:$0xff] %v3064_v24  }

// kernel: reverse
= control target key start
LH: loop header
LB: loop body
LE: loop exit
PB: predicated region body
PF: predicated region fallthrough
CT: control target
= control target key end

     0   :  { %v2_v0 = vlaneseq  ;;  %s264_s0 = inlined_call_operand.vmem [shape: f32[1,2,7,7], index: 0, kind: input, shape index: {}]   ;;  %s265_s1 = inlined_call_operand.vmem [shape: bf16[1,2,7,7], index: 1, kind: output, shape index: {}]  }
   0x2   :  { %v3_v1 = vsub.s32 6, %v2_v0 }
   0x4   :  { %4 = vset.pattern.permute.xlu0 %v3_v1 }
   0x5   :  { %240 = vset.pattern.permute.xlu1 %v3_v1  ;;  %v32_v2 = vld [vmem:[%s264_s0 + $0xc] sm:$0x3]  ;;  %v28_v3 = vld [vmem:[%s264_s0 + $0x4] sm:$0xff]   ;;  %v22_v4 = vld [vmem:[%s264_s0] sm:$0xf]   ;;  %v241_v27 = vmov 0.0  }
   0x6   :  { %33 = vst [vmem:[#allocation1 + $0xc] sm:$0x3] %v32_v2  ;;  %29 = vst [vmem:[#allocation1 + $0x4] sm:$0xff] %v28_v3  }
   0x7   :  { %23 = vst [vmem:[#allocation1] sm:$0xf] %v22_v4  }
   0xd   :  { %v72_v5 = vld [vmem:[#allocation1 + $0xc] sm:$0x3]  ;;  %v82_v6 = vld [vmem:[#allocation1 + $0x8] sm:$0x3]  ;;  %v77_v7 = vld [vmem:[#allocation1 + $0xa] sm:$0x3] }
   0xe   :  { %74 = vst [vmem:[#allocation0 + $0x30] sm:$0x3] %v72_v5  ;;  %84 = vst [vmem:[#allocation0 + $0x20] sm:$0x3] %v82_v6  ;;  %v87_v8 = vld [vmem:[#allocation1 + $0x6] sm:$0x3] }
   0xf   :  { %79 = vst [vmem:[#allocation0 + $0x28] sm:$0x3] %v77_v7  ;;  %v92_v9 = vld [vmem:[#allocation1 + $0x4] sm:$0x3]  ;;  %v96_v10 = vld [vmem:[#allocation1 + $0x2] sm:$0x3] }
  0x10   :  { %89 = vst [vmem:[#allocation0 + $0x18] sm:$0x3] %v87_v8  ;;  %94 = vst [vmem:[#allocation0 + $0x10] sm:$0x3] %v92_v9  ;;  %v99_v11 = vld [vmem:[#allocation1] sm:$0x3] }
  0x11   :  { %98 = vst [vmem:[#allocation0 + $0x8] sm:$0x3] %v96_v10  ;;  %100 = vst [vmem:[#allocation0] sm:$0x3] %v99_v11 }
  0x15   :  { %v102_v12 = vld [vmem:[#allocation0 + $0x30] sm:$0xff]  ;;  %v114_v13 = vld [vmem:[#allocation0 + $0x20] sm:$0xff] }
  0x16   :  { %103 = vperm.xlu0 %4, %v102_v12   ;;  %115 = vperm.xlu1 %240, %v114_v13   ;;  %v108_v14 = vld [vmem:[#allocation0 + $0x28] sm:$0xff] }
  0x17   :  { %v120_v15 = vld [vmem:[#allocation0 + $0x18] sm:$0xff]  ;;  %v126_v16 = vld [vmem:[#allocation0 + $0x10] sm:$0xff] }
  0x18   :  { %v132_v17 = vld [vmem:[#allocation0 + $0x8] sm:$0xff]  ;;  %v137_v18 = vld [vmem:[#allocation0] sm:$0xff] }
  0x1a   :  { %109 = vperm.xlu0 %4, %v108_v14   ;;  %121 = vperm.xlu1 %240, %v120_v15  }
  0x1e   :  { %127 = vperm.xlu0 %4, %v126_v16   ;;  %133 = vperm.xlu1 %240, %v132_v17  }
  0x22   :  { %138 = vperm.xlu0 %4, %v137_v18  }
  0x95   :  { %v104_v19 = vpop.permute.xlu0 %103  ;;  %v116_v20 = vpop.permute.xlu1 %115 }
  0x96   :  { %105 = vst [vmem:[#allocation2] sm:$0xff] %v104_v19  ;;  %117 = vst [vmem:[#allocation2 + $0x10] sm:$0xff] %v116_v20 }
  0x99   :  { %v110_v21 = vpop.permute.xlu0 %109  ;;  %v122_v22 = vpop.permute.xlu1 %121 }
  0x9a   :  { %111 = vst [vmem:[#allocation2 + $0x8] sm:$0xff] %v110_v21  ;;  %123 = vst [vmem:[#allocation2 + $0x18] sm:$0xff] %v122_v22 }
  0x9d   :  { %v145_v23 = vld [vmem:[#allocation2] sm:$0x3]  ;;  %v156_v24 = vld [vmem:[#allocation2 + $0x10] sm:$0x3]  ;;  %v128_v25 = vpop.permute.xlu0 %127  ;;  %v134_v26 = vpop.permute.xlu1 %133 }
  0x9e   :  { %v146_v28 = vpack.c.bf16 %v241_v27, %v145_v23  ;;  %v157_v29 = vpack.c.bf16 %v241_v27, %v156_v24  ;;  %129 = vst [vmem:[#allocation2 + $0x20] sm:$0xff] %v128_v25  ;;  %135 = vst [vmem:[#allocation2 + $0x28] sm:$0xff] %v134_v26 }
  0xa0   :  { %148 = vst [vmem:[#allocation3] sm:$0x1] %v146_v28  ;;  %161 = vst [vmem:[#allocation3 + $0x2] sm:$0x1] %v157_v29 }
  0xa1   :  { %v150_v30 = vld [vmem:[#allocation2 + $0x8] sm:$0x3]  ;;  %v163_v31 = vld [vmem:[#allocation2 + $0x18] sm:$0x3]  ;;  %v139_v32 = vpop.permute.xlu0 %138 }
  0xa2   :  { %v151_v33 = vpack.c.bf16 %v241_v27, %v150_v30  ;;  %v164_v34 = vpack.c.bf16 %v241_v27, %v163_v31  ;;  %140 = vst [vmem:[#allocation2 + $0x30] sm:$0xff] %v139_v32 }
  0xa4   :  { %154 = vst [vmem:[#allocation3 + $0x1] sm:$0x1] %v151_v33  ;;  %168 = vst [vmem:[#allocation3 + $0x3] sm:$0x1] %v164_v34 }
  0xa5   :  { %v170_v35 = vld [vmem:[#allocation2 + $0x20] sm:$0x3]  ;;  %v177_v36 = vld [vmem:[#allocation2 + $0x28] sm:$0x3] }
  0xa6   :  { %v171_v37 = vpack.c.bf16 %v241_v27, %v170_v35  ;;  %v178_v38 = vpack.c.bf16 %v241_v27, %v177_v36 }
  0xa8   :  { %175 = vst [vmem:[#allocation3 + $0x4] sm:$0x1] %v171_v37  ;;  %182 = vst [vmem:[#allocation3 + $0x5] sm:$0x1] %v178_v38 }
  0xa9   :  { %v184_v39 = vld [vmem:[#allocation2 + $0x30] sm:$0x3] }
  0xaa   :  { %v185_v40 = vpack.c.bf16 %v241_v27, %v184_v39 }
  0xac   :  { %189 = vst [vmem:[#allocation3 + $0x6] sm:$0x1] %v185_v40 }
  0xb3   :  { %v205_v41 = vld [vmem:[#allocation3] sm:$0x7f] }
  0xb4   :  { %206 = vst [vmem:[%s265_s1] sm:$0x7f] %v205_v41 }

// kernel: reverse.44
= control target key start
LH: loop header
LB: loop body
LE: loop exit
PB: predicated region body
PF: predicated region fallthrough
CT: control target
= control target key end

     0   :  { %v2_v0 = vlaneseq  ;;  %s146_s0 = inlined_call_operand.vmem [shape: f32[1,1,3,3], index: 0, kind: input, shape index: {}]   ;;  %s147_s1 = inlined_call_operand.vmem [shape: bf16[1,1,3,3], index: 1, kind: output, shape index: {}]  }
   0x2   :  { %v3_v1 = vsub.s32 2, %v2_v0 }
   0x4   :  { %4 = vset.pattern.permute.xlu0 %v3_v1 }
   0x5   :  { %v20_v2 = vld [vmem:[%s146_s0] sm:$0x7]  ;;  %128 = vset.pattern.permute.xlu1 %v3_v1  ;;  %v129_v14 = vmov 0.0  }
   0x6   :  { %21 = vst [vmem:[#allocation1] sm:$0x7] %v20_v2 }
   0xd   :  { %v40_v3 = vld [vmem:[#allocation1 + $0x2] sm:$0x1]  ;;  %v47_v4 = vld [vmem:[#allocation1] sm:$0x1]  ;;  %v44_v5 = vld [vmem:[#allocation1 + $0x1] sm:$0x1] }
   0xe   :  { %42 = vst [vmem:[#allocation0 + $0x10] sm:$0x1] %v40_v3  ;;  %48 = vst [vmem:[#allocation0] sm:$0x1] %v47_v4 }
   0xf   :  { %46 = vst [vmem:[#allocation0 + $0x8] sm:$0x1] %v44_v5 }
  0x15   :  { %v50_v6 = vld [vmem:[#allocation0 + $0x10] sm:$0xff]  ;;  %v61_v7 = vld [vmem:[#allocation0] sm:$0xff] }
  0x16   :  { %51 = vperm.xlu0 %4, %v50_v6   ;;  %62 = vperm.xlu1 %128, %v61_v7   ;;  %v56_v8 = vld [vmem:[#allocation0 + $0x8] sm:$0xff] }
  0x1a   :  { %57 = vperm.xlu0 %4, %v56_v8  }
  0x95   :  { %v52_v9 = vpop.permute.xlu0 %51  ;;  %v63_v10 = vpop.permute.xlu1 %62 }
  0x96   :  { %53 = vst [vmem:[#allocation2] sm:$0xff] %v52_v9  ;;  %64 = vst [vmem:[#allocation2 + $0x10] sm:$0xff] %v63_v10 }
  0x99   :  { %v58_v11 = vpop.permute.xlu0 %57 }
  0x9a   :  { %59 = vst [vmem:[#allocation2 + $0x8] sm:$0xff] %v58_v11 }
  0x9d   :  { %v69_v12 = vld [vmem:[#allocation2] sm:$0x3]  ;;  %v80_v13 = vld [vmem:[#allocation2 + $0x10] sm:$0x3] }
  0x9e   :  { %v70_v15 = vpack.c.bf16 %v129_v14, %v69_v12  ;;  %v81_v16 = vpack.c.bf16 %v129_v14, %v80_v13 }
  0xa0   :  { %72 = vst [vmem:[#allocation3] sm:$0x1] %v70_v15  ;;  %85 = vst [vmem:[#allocation3 + $0x2] sm:$0x1] %v81_v16 }
  0xa1   :  { %v74_v17 = vld [vmem:[#allocation2 + $0x8] sm:$0x3] }
  0xa2   :  { %v75_v18 = vpack.c.bf16 %v129_v14, %v74_v17 }
  0xa4   :  { %78 = vst [vmem:[#allocation3 + $0x1] sm:$0x1] %v75_v18 }
  0xab   :  { %v101_v19 = vld [vmem:[#allocation3] sm:$0x7] }
  0xac   :  { %102 = vst [vmem:[%s147_s1] sm:$0x7] %v101_v19 }

// kernel: custom-call.24
= control target key start
LH: loop header
LB: loop body
LE: loop exit
PB: predicated region body
PF: predicated region fallthrough
CT: control target
= control target key end

     0   :  { %s6_s0 = inlined_call_operand.vmem [shape: f32[1,64], index: 0, kind: output, shape index: {}]  }

// kernel: custom-call
= control target key start
LH: loop header
LB: loop body
LE: loop exit
PB: predicated region body
PF: predicated region fallthrough
CT: control target
= control target key end

     0   :  { %s6_s0 = inlined_call_operand.vmem [shape: f32[1,128], index: 0, kind: output, shape index: {}]  }

</bundles_post_ra>
